<compile_context>
chip_gen: v7x
topology: tpu7x:2x2x1
jax: 0.10.0
libtpu: 0.0.40
codegen_flags: <defaults>
</compile_context>

<pallas_src>
import functools

import jax
import jax.numpy as jnp
from jax.experimental import pallas as pl
from jax.experimental.pallas import tpu as pltpu


def _round_up(x, m):
    return ((x + m - 1) // m) * m


def _leaky_relu(x, slope=0.2):
    return jnp.where(x > 0, x, slope * x)


def generator_kernel(x_ref, w1_ref, b1_ref, w2_ref, b2_ref, w3_ref, b3_ref,
                     o_ref):
    """Fused 3-layer MLP: (Linear->LeakyReLU) x2 -> Linear -> Tanh.

    Weights are bf16 (in_features, out_features); biases are f32 (1, out).
    All matmuls accumulate in f32 on the MXU; elementwise math is f32.
    """
    x = x_ref[...].astype(jnp.bfloat16)

    # Layer 1: lat_pad -> 512, LeakyReLU(0.2)
    h1 = jnp.dot(x, w1_ref[...], preferred_element_type=jnp.float32)
    h1 = _leaky_relu(h1 + b1_ref[...])

    # Layer 2: 512 -> 1024, LeakyReLU(0.2)
    h2 = jnp.dot(h1.astype(jnp.bfloat16), w2_ref[...],
                 preferred_element_type=jnp.float32)
    h2 = _leaky_relu(h2 + b2_ref[...])

    # Layer 3: 1024 -> out_pad, Tanh (lane-dense store, out_pad % 128 == 0)
    h3 = jnp.dot(h2.astype(jnp.bfloat16), w3_ref[...],
                 preferred_element_type=jnp.float32)
    o_ref[...] = jnp.tanh(h3 + b3_ref[...]).astype(o_ref.dtype)


def init_generator_params(key, latent_dim=100, img_size=28, mult=1):
    """PyTorch nn.Linear-style init (U(-1/sqrt(fan_in), +1/sqrt(fan_in))).

    Weights are stored (in_features, out_features), zero-padded to
    lane/sublane-friendly shapes, and cast to bf16.  Biases stay f32.
    """
    out_dim = img_size * img_size * mult
    lat_pad = _round_up(latent_dim, 128)
    out_pad = _round_up(out_dim, 128)

    dims = [(latent_dim, 512, lat_pad, 512),
            (512, 1024, 512, 1024),
            (1024, out_dim, 1024, out_pad)]
    params = {}
    for idx, (fan_in, fan_out, in_pad, outp) in enumerate(dims, start=1):
        key, kw, kb = jax.random.split(key, 3)
        bound = 1.0 / jnp.sqrt(jnp.float32(fan_in))
        w = jax.random.uniform(kw, (fan_in, fan_out), jnp.float32,
                               minval=-bound, maxval=bound)
        b = jax.random.uniform(kb, (1, fan_out), jnp.float32,
                               minval=-bound, maxval=bound)
        w = jnp.pad(w, ((0, in_pad - fan_in), (0, outp - fan_out)))
        b = jnp.pad(b, ((0, 0), (0, outp - fan_out)))
        params[f"w{idx}"] = w.astype(jnp.bfloat16)
        params[f"b{idx}"] = b  # f32
    return params


@functools.partial(jax.jit, static_argnames=("img_size", "mult"))
def generator_forward(x, params, img_size=28, mult=1):
    """x: (B, latent_dim) -> (B, mult, img_size, img_size), NCHW like PyTorch."""
    batch, latent_dim = x.shape
    out_dim = img_size * img_size * mult

    lat_pad = params["w1"].shape[0]
    h1_dim = params["w1"].shape[1]
    h2_dim = params["w2"].shape[1]
    out_pad = params["w3"].shape[1]

    # Zero-pad latent dim (zeros contribute nothing to the dot).
    if latent_dim < lat_pad:
        x = jnp.pad(x, ((0, 0), (0, lat_pad - latent_dim)))

    # Batch tiling: single block at small batch, 256-row tiles otherwise.
    b_al = _round_up(batch, 8)
    tb = b_al if b_al <= 512 else 256
    b_pad = _round_up(b_al, tb)
    if b_pad > batch:
        x = jnp.pad(x, ((0, b_pad - batch), (0, 0)))
    grid = (b_pad // tb,)

    # Weights / biases stay VMEM-resident across grid steps (constant index_map).
    const_map = lambda i: (0, 0)
    in_specs = [
        pl.BlockSpec((tb, lat_pad), lambda i: (i, 0)),          # x tiles
        pl.BlockSpec((lat_pad, h1_dim), const_map),             # w1
        pl.BlockSpec((1, h1_dim), const_map),                   # b1
        pl.BlockSpec((h1_dim, h2_dim), const_map),              # w2
        pl.BlockSpec((1, h2_dim), const_map),                   # b2
        pl.BlockSpec((h2_dim, out_pad), const_map),             # w3
        pl.BlockSpec((1, out_pad), const_map),                  # b3
    ]
    out_specs = pl.BlockSpec((tb, out_pad), lambda i: (i, 0))

    weight_bytes = sum(int(params[k].size) * params[k].dtype.itemsize
                       for k in ("w1", "b1", "w2", "b2", "w3", "b3"))
    cost = pl.CostEstimate(
        flops=2 * b_pad * (lat_pad * h1_dim + h1_dim * h2_dim + h2_dim * out_pad),
        transcendentals=b_pad * out_pad,
        bytes_accessed=weight_bytes + b_pad * (lat_pad + out_pad) * 4,
    )

    flat = pl.pallas_call(
        generator_kernel,
        out_shape=jax.ShapeDtypeStruct((b_pad, out_pad), jnp.float32),
        grid=grid,
        in_specs=in_specs,
        out_specs=out_specs,
        compiler_params=pltpu.CompilerParams(
            dimension_semantics=("parallel",)),
        cost_estimate=cost,
    )(x, params["w1"], params["b1"],
      params["w2"], params["b2"],
      params["w3"], params["b3"])

    # Drop batch / lane padding, then NCHW view like PyTorch.
    flat = flat[:batch, :out_dim]
    return flat.reshape(-1, mult, img_size, img_size)


def _reference_forward(x, params, img_size=28, mult=1):
    """Pure-JAX reference using the same bf16-weight / f32-accumulate recipe."""
    out_dim = img_size * img_size * mult
    lat_pad = params["w1"].shape[0]
    xp = jnp.pad(x, ((0, 0), (0, lat_pad - x.shape[1])))

    h = jnp.dot(xp.astype(jnp.bfloat16), params["w1"],
                preferred_element_type=jnp.float32) + params["b1"]
    h = jnp.where(h > 0, h, 0.2 * h)
    h = jnp.dot(h.astype(jnp.bfloat16), params["w2"],
                preferred_element_type=jnp.float32) + params["b2"]
    h = jnp.where(h > 0, h, 0.2 * h)
    h = jnp.tanh(jnp.dot(h.astype(jnp.bfloat16), params["w3"],
                         preferred_element_type=jnp.float32) + params["b3"])
    return h[:, :out_dim].reshape(-1, mult, img_size, img_size)


if __name__ == "__main__":
    latent_dim = 100
    img_size = 28
    mult = 1
    batch = 8

    key = jax.random.PRNGKey(0)
    key, k_x = jax.random.split(key)
    x = jax.random.normal(k_x, (batch, latent_dim), jnp.float32)
    params = init_generator_params(key, latent_dim, img_size, mult)

    out = generator_forward(x, params, img_size=img_size, mult=mult)
    out = jax.block_until_ready(out)

    assert out.shape == (batch, mult, img_size, img_size), out.shape

    ref = _reference_forward(x, params, img_size=img_size, mult=mult)
    assert jnp.allclose(out, ref, atol=1e-4, rtol=1e-4), (
        "mismatch vs reference: max abs err "
        f"{jnp.max(jnp.abs(out - ref))}")

    print("KERNEL_OK")
</pallas_src>

<mosaic_0001>
module attributes {stable_mosaic.version = 11 : i64} {
  func.func @generator_kernel(%arg0: i32, %arg1: memref<8x128xf32, #tpu.memory_space<vmem>>, %arg2: memref<128x512xbf16, #tpu.memory_space<vmem>>, %arg3: memref<1x512xf32, #tpu.memory_space<vmem>>, %arg4: memref<512x1024xbf16, #tpu.memory_space<vmem>>, %arg5: memref<1x1024xf32, #tpu.memory_space<vmem>>, %arg6: memref<1024x896xbf16, #tpu.memory_space<vmem>>, %arg7: memref<1x896xf32, #tpu.memory_space<vmem>>, %arg8: memref<8x896xf32, #tpu.memory_space<vmem>>) attributes {dimension_semantics = [#tpu.dimension_semantics<parallel>], iteration_bounds = array<i64: 1>, scalar_prefetch = 0 : i64, scratch_operands = 0 : i64, tpu.core_type = #tpu.core_type<tc>, window_params = [{transform_indices = @transform_0, window_bounds = array<i64: 8, 128>}, {pipeline_mode = #tpu.pipeline_mode<synchronous>, transform_indices = @transform_1, window_bounds = array<i64: 128, 512>}, {pipeline_mode = #tpu.pipeline_mode<synchronous>, transform_indices = @transform_2, window_bounds = array<i64: 1, 512>}, {pipeline_mode = #tpu.pipeline_mode<synchronous>, transform_indices = @transform_3, window_bounds = array<i64: 512, 1024>}, {pipeline_mode = #tpu.pipeline_mode<synchronous>, transform_indices = @transform_4, window_bounds = array<i64: 1, 1024>}, {pipeline_mode = #tpu.pipeline_mode<synchronous>, transform_indices = @transform_5, window_bounds = array<i64: 1024, 896>}, {pipeline_mode = #tpu.pipeline_mode<synchronous>, transform_indices = @transform_6, window_bounds = array<i64: 1, 896>}, {transform_indices = @transform_7, window_bounds = array<i64: 8, 896>}]} {
    %c0 = arith.constant 0 : index
    %c0_0 = arith.constant 0 : index
    %0 = vector.load %arg1[%c0, %c0_0] : memref<8x128xf32, #tpu.memory_space<vmem>>, vector<8x128xf32>
    %1 = arith.truncf %0 : vector<8x128xf32> to vector<8x128xbf16>
    %c0_1 = arith.constant 0 : index
    %c0_2 = arith.constant 0 : index
    %2 = vector.load %arg2[%c0_1, %c0_2] : memref<128x512xbf16, #tpu.memory_space<vmem>>, vector<128x512xbf16>
    %cst = arith.constant dense<0.000000e+00> : vector<8x512xf32>
    %3 = tpu.matmul %1, %2, %cst {dimension_numbers = #tpu.dot_dimension_numbers<[1], [0], [0], [1], [0, 0, 1, 1], [], []>} : vector<8x128xbf16>, vector<128x512xbf16>, vector<8x512xf32> -> vector<8x512xf32>
    %c0_3 = arith.constant 0 : index
    %c0_4 = arith.constant 0 : index
    %4 = vector.load %arg3[%c0_3, %c0_4] : memref<1x512xf32, #tpu.memory_space<vmem>>, vector<1x512xf32>
    %5 = vector.broadcast %4 : vector<1x512xf32> to vector<8x512xf32>
    %6 = arith.addf %3, %5 : vector<8x512xf32>
    %cst_5 = arith.constant 0.000000e+00 : f32
    %7 = vector.broadcast %cst_5 : f32 to vector<8x512xf32>
    %8 = arith.cmpf ogt, %6, %7 : vector<8x512xf32>
    %cst_6 = arith.constant 2.000000e-01 : f32
    %9 = vector.broadcast %cst_6 : f32 to vector<8x512xf32>
    %10 = arith.mulf %9, %6 : vector<8x512xf32>
    %11 = arith.select %8, %6, %10 : vector<8x512xi1>, vector<8x512xf32>
    %12 = arith.truncf %11 : vector<8x512xf32> to vector<8x512xbf16>
    %c0_7 = arith.constant 0 : index
    %c0_8 = arith.constant 0 : index
    %13 = vector.load %arg4[%c0_7, %c0_8] : memref<512x1024xbf16, #tpu.memory_space<vmem>>, vector<512x1024xbf16>
    %cst_9 = arith.constant dense<0.000000e+00> : vector<8x1024xf32>
    %14 = tpu.matmul %12, %13, %cst_9 {dimension_numbers = #tpu.dot_dimension_numbers<[1], [0], [0], [1], [0, 0, 1, 1], [], []>} : vector<8x512xbf16>, vector<512x1024xbf16>, vector<8x1024xf32> -> vector<8x1024xf32>
    %c0_10 = arith.constant 0 : index
    %c0_11 = arith.constant 0 : index
    %15 = vector.load %arg5[%c0_10, %c0_11] : memref<1x1024xf32, #tpu.memory_space<vmem>>, vector<1x1024xf32>
    %16 = vector.broadcast %15 : vector<1x1024xf32> to vector<8x1024xf32>
    %17 = arith.addf %14, %16 : vector<8x1024xf32>
    %cst_12 = arith.constant 0.000000e+00 : f32
    %18 = vector.broadcast %cst_12 : f32 to vector<8x1024xf32>
    %19 = arith.cmpf ogt, %17, %18 : vector<8x1024xf32>
    %cst_13 = arith.constant 2.000000e-01 : f32
    %20 = vector.broadcast %cst_13 : f32 to vector<8x1024xf32>
    %21 = arith.mulf %20, %17 : vector<8x1024xf32>
    %22 = arith.select %19, %17, %21 : vector<8x1024xi1>, vector<8x1024xf32>
    %23 = arith.truncf %22 : vector<8x1024xf32> to vector<8x1024xbf16>
    %c0_14 = arith.constant 0 : index
    %c0_15 = arith.constant 0 : index
    %24 = vector.load %arg6[%c0_14, %c0_15] : memref<1024x896xbf16, #tpu.memory_space<vmem>>, vector<1024x896xbf16>
    %cst_16 = arith.constant dense<0.000000e+00> : vector<8x896xf32>
    %25 = tpu.matmul %23, %24, %cst_16 {dimension_numbers = #tpu.dot_dimension_numbers<[1], [0], [0], [1], [0, 0, 1, 1], [], []>} : vector<8x1024xbf16>, vector<1024x896xbf16>, vector<8x896xf32> -> vector<8x896xf32>
    %c0_17 = arith.constant 0 : index
    %c0_18 = arith.constant 0 : index
    %26 = vector.load %arg7[%c0_17, %c0_18] : memref<1x896xf32, #tpu.memory_space<vmem>>, vector<1x896xf32>
    %27 = vector.broadcast %26 : vector<1x896xf32> to vector<8x896xf32>
    %28 = arith.addf %25, %27 : vector<8x896xf32>
    %29 = math.tanh %28 : vector<8x896xf32>
    %c0_19 = arith.constant 0 : index
    %c0_20 = arith.constant 0 : index
    %30 = vector.load %arg8[%c0_19, %c0_20] : memref<8x896xf32, #tpu.memory_space<vmem>>, vector<8x896xf32>
    tpu.vector_store %arg8[%c0_19, %c0_20], %29 {strides = array<i32>} : memref<8x896xf32, #tpu.memory_space<vmem>>, vector<8x896xf32>,
    return
  }
  func.func @transform_0(%arg0: i32) -> (i32, i32) {
    %c0_i32 = arith.constant 0 : i32
    %c0_i32_0 = arith.constant 0 : i32
    return %arg0, %c0_i32 : i32, i32
  }
  func.func @transform_1(%arg0: i32) -> (i32, i32) {
    %c0_i32 = arith.constant 0 : i32
    %c0_i32_0 = arith.constant 0 : i32
    %c0_i32_1 = arith.constant 0 : i32
    return %c0_i32, %c0_i32_0 : i32, i32
  }
  func.func @transform_2(%arg0: i32) -> (i32, i32) {
    %c0_i32 = arith.constant 0 : i32
    %c0_i32_0 = arith.constant 0 : i32
    %c0_i32_1 = arith.constant 0 : i32
    return %c0_i32, %c0_i32_0 : i32, i32
  }
  func.func @transform_3(%arg0: i32) -> (i32, i32) {
    %c0_i32 = arith.constant 0 : i32
    %c0_i32_0 = arith.constant 0 : i32
    %c0_i32_1 = arith.constant 0 : i32
    return %c0_i32, %c0_i32_0 : i32, i32
  }
  func.func @transform_4(%arg0: i32) -> (i32, i32) {
    %c0_i32 = arith.constant 0 : i32
    %c0_i32_0 = arith.constant 0 : i32
    %c0_i32_1 = arith.constant 0 : i32
    return %c0_i32, %c0_i32_0 : i32, i32
  }
  func.func @transform_5(%arg0: i32) -> (i32, i32) {
    %c0_i32 = arith.constant 0 : i32
    %c0_i32_0 = arith.constant 0 : i32
    %c0_i32_1 = arith.constant 0 : i32
    return %c0_i32, %c0_i32_0 : i32, i32
  }
  func.func @transform_6(%arg0: i32) -> (i32, i32) {
    %c0_i32 = arith.constant 0 : i32
    %c0_i32_0 = arith.constant 0 : i32
    %c0_i32_1 = arith.constant 0 : i32
    return %c0_i32, %c0_i32_0 : i32, i32
  }
  func.func @transform_7(%arg0: i32) -> (i32, i32) {
    %c0_i32 = arith.constant 0 : i32
    %c0_i32_0 = arith.constant 0 : i32
    return %arg0, %c0_i32 : i32, i32
  }
}

</mosaic_0001>

<bundles_post_ra>
// kernel: generator_forward.1
= control target key start
LH: loop header
LB: loop body
LE: loop exit
PB: predicated region body
PF: predicated region fallthrough
CT: control target
= control target key end

     0   :  { %12 = vsyncpa [#allocation3], 0  ;;  %s7921_s0 = inlined_call_operand.vmem [shape: f32[8,128], index: 0, kind: input, shape index: {}]   ;;  %s7922_s1 = inlined_call_operand.hbm [shape: bf16[128,512], index: 1, kind: input, shape index: {}]   ;;  %s7923_s2 = inlined_call_operand.hbm [shape: f32[1,512], index: 2, kind: input, shape index: {}]   ;;  %s7924_s3 = inlined_call_operand.hbm [shape: bf16[512,1024], index: 3, kind: input, shape index: {}]   ;;  %s7925_s4 = inlined_call_operand.hbm [shape: f32[1,1024], index: 4, kind: input, shape index: {}]   ;;  %s7926_s5 = inlined_call_operand.hbm [shape: bf16[1024,896], index: 5, kind: input, shape index: {}]   ;;  %s7927_s6 = inlined_call_operand.hbm [shape: f32[1,896], index: 6, kind: input, shape index: {}]   ;;  %s7928_s7 = inlined_call_operand.vmem [shape: f32[8,896], index: 7, kind: output, shape index: {}]  }
   0x1   :  { %13 = vsyncpa [#allocation5], 0 }
   0x2   :  { %14 = vsyncpa [#allocation8], 0 }
   0x3   :  { %15 = vsyncpa [#allocation11], 0  ;;  %s7626_s24 = smov [#allocation4]   ;;  %s7627_s26 = smov [#allocation7]  }
   0x4   :  { %s36_s25 = sshll.u32 %s7626_s24, 4  ;;  %s58_s27 = sshll.u32 %s7627_s26, 4  ;;  %s37_s25 = int_to_ptr.vmem [resolvable:$true] %s36_s25  ;;  %s59_s27 = int_to_ptr.vmem [resolvable:$true] %s58_s27 }
   0x5   :  { %s7486_s30 = scalar_lea.hbm %s7923_s2, 64 }
   0x6   :  { %p7487_p0 = scmp.ne.s32.totalorder %s7923_s2, %s7486_s30  ;;  %p7490_p1 = scmp.lt.u32.totalorder %s7486_s30, %s7923_s2 }
   0x8   :  { %p7492_p2 = pnand %p7490_p1, %p7487_p0 }
   0xa   :  { %7495 = shalt.err (!%p7492_p2)
}
   0xb   :  { %s7496_s12 = scalar_lea.vmem %s37_s25, 64  ;;  %p7501_p4 = scmp.lt.s32.totalorder %s37_s25, %s37_s25 }
   0xc   :  { %p7497_p3 = scmp.ne.s32.totalorder %s37_s25, %s7496_s12  ;;  %p7502_p5 = scmp.lt.s32.totalorder %s7496_s12, %s7496_s12 }
   0xe   :  { %p7503_p6 = por %p7502_p5, %p7501_p4 }
  0x10   :  { %p7504_p7 = pnand %p7503_p6, %p7497_p3 }
  0x12   :  { %7507 = shalt.err (!%p7504_p7)
}
  0x13   :  { %39 = dma.hbm_to_vmem [thread:$0]  %s7923_s2, 64, %s37_s25, [#allocation5]  }
  0x14   :  { %s7508_s17 = scalar_lea.hbm %s7925_s4, 128 }
  0x15   :  { %p7509_p8 = scmp.ne.s32.totalorder %s7925_s4, %s7508_s17  ;;  %p7512_p9 = scmp.lt.u32.totalorder %s7508_s17, %s7925_s4 }
  0x17   :  { %p7514_p10 = pnand %p7512_p9, %p7509_p8 }
  0x19   :  { %7517 = shalt.err (!%p7514_p10)
}
  0x1a   :  { %s7518_s22 = scalar_lea.vmem %s59_s27, 128  ;;  %p7523_p12 = scmp.lt.s32.totalorder %s59_s27, %s59_s27 }
  0x1b   :  { %p7519_p11 = scmp.ne.s32.totalorder %s59_s27, %s7518_s22  ;;  %p7524_p13 = scmp.lt.s32.totalorder %s7518_s22, %s7518_s22 }
  0x1d   :  { %p7525_p0 = por %p7524_p13, %p7523_p12 }
  0x1f   :  { %p7526_p1 = pnand %p7525_p0, %p7519_p11 }
  0x21   :  { %7529 = shalt.err (!%p7526_p1)
}
  0x22   :  { %61 = dma.hbm_to_vmem [thread:$0]  %s7925_s4, 128, %s59_s27, [#allocation8]  }
  0x23   :  { %s7628_s24 = smov [#allocation2]   ;;  %s7530_s29 = scalar_lea.hbm %s7922_s1, 4096 }
  0x24   :  { %s23_s25 = sshll.u32 %s7628_s24, 4  ;;  %p7531_p2 = scmp.ne.s32.totalorder %s7922_s1, %s7530_s29  ;;  %s24_s25 = int_to_ptr.vmem [resolvable:$true] %s23_s25 }
  0x25   :  { %p7534_p3 = scmp.lt.u32.totalorder %s7530_s29, %s7922_s1 }
  0x27   :  { %p7536_p4 = pnand %p7534_p3, %p7531_p2 }
  0x29   :  { %7539 = shalt.err (!%p7536_p4)
}
  0x2a   :  { %s7540_s11 = scalar_lea.vmem %s24_s25, 4096  ;;  %p7545_p6 = scmp.lt.s32.totalorder %s24_s25, %s24_s25 }
  0x2b   :  { %p7541_p5 = scmp.ne.s32.totalorder %s24_s25, %s7540_s11  ;;  %p7546_p7 = scmp.lt.s32.totalorder %s7540_s11, %s7540_s11 }
  0x2d   :  { %p7547_p8 = por %p7546_p7, %p7545_p6 }
  0x2f   :  { %p7548_p9 = pnand %p7547_p8, %p7541_p5 }
  0x31   :  { %7551 = shalt.err (!%p7548_p9)
}
  0x32   :  { %s7629_s4 = smov 256   ;;  %s7630_s27 = smov 16  }
  0x33   :  { %29 = dma.hbm_to_vmem [thread:$0]  %s7922_s1, 4096, %s24_s25, [#allocation3], %s7629_s4, %s7629_s4, %s7630_s27  }
  0x34   :  { %s7631_s14 = smov [#allocation6]   ;;  %s7552_s18 = scalar_lea.hbm %s7924_s3, 32768 }
  0x35   :  { %s45_s15 = sshll.u32 %s7631_s14, 4  ;;  %p7553_p10 = scmp.ne.s32.totalorder %s7924_s3, %s7552_s18  ;;  %s46_s15 = int_to_ptr.vmem [resolvable:$true] %s45_s15 }
  0x36   :  { %p7556_p11 = scmp.lt.u32.totalorder %s7552_s18, %s7924_s3 }
  0x38   :  { %p7558_p12 = pnand %p7556_p11, %p7553_p10 }
  0x3a   :  { %7561 = shalt.err (!%p7558_p12)
}
  0x3b   :  { %s7562_s2 = scalar_lea.vmem %s46_s15, 32768  ;;  %p7567_p0 = scmp.lt.s32.totalorder %s46_s15, %s46_s15 }
  0x3c   :  { %p7563_p13 = scmp.ne.s32.totalorder %s46_s15, %s7562_s2  ;;  %p7568_p1 = scmp.lt.s32.totalorder %s7562_s2, %s7562_s2 }
  0x3e   :  { %p7569_p2 = por %p7568_p1, %p7567_p0 }
  0x40   :  { %p7570_p3 = pnand %p7569_p2, %p7563_p13 }
  0x42   :  { %7573 = shalt.err (!%p7570_p3)
}
  0x43   :  { %s7632_s1 = smov 512   ;;  %s7633_s23 = smov 32  }
  0x44   :  { %51 = dma.hbm_to_vmem [thread:$0]  %s7924_s3, 32768, %s46_s15, [#allocation5], %s7632_s1, %s7632_s1, %s7633_s23  }
  0x45   :  { %s7634_s26 = smov [#allocation9]   ;;  %s7574_s8 = scalar_lea.hbm %s7926_s5, 57344 }
  0x46   :  { %s67_s28 = sshll.u32 %s7634_s26, 4  ;;  %p7575_p4 = scmp.ne.s32.totalorder %s7926_s5, %s7574_s8  ;;  %s68_s28 = int_to_ptr.vmem [resolvable:$true] %s67_s28 }
  0x47   :  { %p7578_p5 = scmp.lt.u32.totalorder %s7574_s8, %s7926_s5 }
  0x49   :  { %p7580_p6 = pnand %p7578_p5, %p7575_p4 }
  0x4b   :  { %7583 = shalt.err (!%p7580_p6)
}
  0x4c   :  { %s7584_s27 = scalar_lea.vmem %s68_s28, 57344  ;;  %p7589_p8 = scmp.lt.s32.totalorder %s68_s28, %s68_s28 }
  0x4d   :  { %p7585_p7 = scmp.ne.s32.totalorder %s68_s28, %s7584_s27  ;;  %p7590_p9 = scmp.lt.s32.totalorder %s7584_s27, %s7584_s27 }
  0x4f   :  { %p7591_p10 = por %p7590_p9, %p7589_p8 }
  0x51   :  { %p7592_p11 = pnand %p7591_p10, %p7585_p7 }
  0x53   :  { %7595 = shalt.err (!%p7592_p11)
}
  0x54   :  { %s7635_s3 = smov 448   ;;  %s7636_s12 = smov 28  }
  0x55   :  { %73 = dma.hbm_to_vmem [thread:$0]  %s7926_s5, 57344, %s68_s28, [#allocation8], %s7635_s3, %s7635_s3, %s7636_s12  }
  0x56   :  { %s7637_s15 = smov [#allocation10]   ;;  %s7596_s19 = scalar_lea.hbm %s7927_s6, 112 }
  0x57   :  { %s80_s16 = sshll.u32 %s7637_s15, 4  ;;  %p7597_p12 = scmp.ne.s32.totalorder %s7927_s6, %s7596_s19  ;;  %s81_s16 = int_to_ptr.vmem [resolvable:$true] %s80_s16 }
  0x58   :  { %p7600_p13 = scmp.lt.u32.totalorder %s7596_s19, %s7927_s6 }
  0x5a   :  { %p7602_p0 = pnand %p7600_p13, %p7597_p12 }
  0x5c   :  { %7605 = shalt.err (!%p7602_p0)
}
  0x5d   :  { %s7606_s1 = scalar_lea.vmem %s81_s16, 112  ;;  %s7610_s5 = scalar_lea.vmem %s81_s16, 128 }
  0x5e   :  { %p7607_p1 = scmp.ne.s32.totalorder %s81_s16, %s7606_s1  ;;  %p7611_p2 = scmp.lt.s32.totalorder %s81_s16, %s81_s16 }
  0x5f   :  { %p7612_p3 = scmp.lt.s32.totalorder %s7610_s5, %s7606_s1 }
  0x61   :  { %p7613_p4 = por %p7612_p3, %p7611_p2 }
  0x63   :  { %p7614_p5 = pnand %p7613_p4, %p7607_p1 }
  0x65   :  { %7617 = shalt.err (!%p7614_p5)
}
  0x66   :  { %83 = dma.hbm_to_vmem [thread:$0]  %s7927_s6, 112, %s81_s16, [#allocation11]  }
  0x67   :  { %7618 = dma.done.wait [#allocation3], 4096  }
  0x68   :  { %7619 = vsyncadd [#allocation3], 4294963200 }
  0x69   :  { %7620 = dma.done.wait [#allocation5], 32832  }
  0x6a   :  { %7621 = vsyncadd [#allocation5], 4294934464 }
  0x6b   :  { %7622 = dma.done.wait [#allocation8], 57472  }
  0x6c   :  { %7623 = vsyncadd [#allocation8], 4294909824 }
  0x6d   :  { %7624 = dma.done.wait [#allocation11], 112  }
  0x6e   :  { %7625 = vsyncadd [#allocation11], 4294967184  ;;  %v7638_v0 = vmov 0   ;;  %v6783_v1 = vld [vmem:[#allocation2 + $0x4] ss:$16 sps:$4 sm:$0xff]  }
  0x6f   :  { %351 = vmatprep.mubr.bf16.mxu0 %v7638_v0  ;;  %392 = vmatprep.mubr.bf16.mxu1 %v7638_v0  ;;  %v6785_v2 = vld [vmem:[#allocation2 + $0xc] ss:$16 sps:$4 sm:$0xff]   ;;  %v6787_v3 = vld [vmem:[#allocation2] ss:$16 sps:$4 sm:$0xff]   ;;  %v6788_v4 = vld [vmem:[#allocation2 + $0x8] ss:$16 sps:$4 sm:$0xff]  }
  0x70   :  { %319 = vmatprep.subr.bf16.mxu0 %v6783_v1  ;;  %360 = vmatprep.subr.bf16.mxu1 %v6785_v2  ;;  %v6789_v5 = vld [vmem:[#allocation2 + $0x24] ss:$16 sps:$4 sm:$0xff]   ;;  %v6791_v6 = vld [vmem:[#allocation2 + $0x2c] ss:$16 sps:$4 sm:$0xff]   ;;  %v6793_v7 = vld [vmem:[#allocation2 + $0x20] ss:$16 sps:$4 sm:$0xff]  }
  0x71   :  { %320 = vmatpush1.bf16.msra.mxu0 %v6787_v3  ;;  %361 = vmatpush1.bf16.msra.mxu1 %v6788_v4  ;;  %v6794_v8 = vld [vmem:[#allocation2 + $0x28] ss:$16 sps:$4 sm:$0xff]   ;;  %v6795_v9 = vld [vmem:[#allocation2 + $0x44] ss:$16 sps:$4 sm:$0xff]   ;;  %v6797_v10 = vld [vmem:[#allocation2 + $0x4c] ss:$16 sps:$4 sm:$0xff]  }
  0x72   :  { %321 = vmatprep.subr.bf16.mxu0 %v6789_v5  ;;  %362 = vmatprep.subr.bf16.mxu1 %v6791_v6  ;;  %v6799_v11 = vld [vmem:[#allocation2 + $0x40] ss:$16 sps:$4 sm:$0xff]   ;;  %v6800_v12 = vld [vmem:[#allocation2 + $0x48] ss:$16 sps:$4 sm:$0xff]   ;;  %v6801_v13 = vld [vmem:[#allocation2 + $0x64] ss:$16 sps:$4 sm:$0xff]  }
  0x73   :  { %v6803_v14 = vld [vmem:[#allocation2 + $0x6c] ss:$16 sps:$4 sm:$0xff]   ;;  %v6805_v15 = vld [vmem:[#allocation2 + $0x60] ss:$16 sps:$4 sm:$0xff]   ;;  %v6806_v16 = vld [vmem:[#allocation2 + $0x68] ss:$16 sps:$4 sm:$0xff]  }
  0x74   :  { %v6807_v17 = vld [vmem:[#allocation2 + $0x84] ss:$16 sps:$4 sm:$0xff]   ;;  %v6809_v18 = vld [vmem:[#allocation2 + $0x8c] ss:$16 sps:$4 sm:$0xff]   ;;  %v6811_v19 = vld [vmem:[#allocation2 + $0x80] ss:$16 sps:$4 sm:$0xff]  }
  0x75   :  { %322 = vmatpush1.bf16.msra.mxu0 %v6793_v7  ;;  %363 = vmatpush1.bf16.msra.mxu1 %v6794_v8  ;;  %v6812_v20 = vld [vmem:[#allocation2 + $0x88] ss:$16 sps:$4 sm:$0xff]   ;;  %v6813_v21 = vld [vmem:[#allocation2 + $0xa4] ss:$16 sps:$4 sm:$0xff]   ;;  %v6815_v22 = vld [vmem:[#allocation2 + $0xac] ss:$16 sps:$4 sm:$0xff]  }
  0x76   :  { %323 = vmatprep.subr.bf16.mxu0 %v6795_v9  ;;  %364 = vmatprep.subr.bf16.mxu1 %v6797_v10  ;;  %v6817_v23 = vld [vmem:[#allocation2 + $0xa0] ss:$16 sps:$4 sm:$0xff]   ;;  %v6818_v24 = vld [vmem:[#allocation2 + $0xa8] ss:$16 sps:$4 sm:$0xff]   ;;  %v6819_v25 = vld [vmem:[#allocation2 + $0xc4] ss:$16 sps:$4 sm:$0xff]  }
  0x77   :  { %v6821_v26 = vld [vmem:[#allocation2 + $0xcc] ss:$16 sps:$4 sm:$0xff]   ;;  %v6823_v27 = vld [vmem:[#allocation2 + $0xc0] ss:$16 sps:$4 sm:$0xff]   ;;  %v6824_v28 = vld [vmem:[#allocation2 + $0xc8] ss:$16 sps:$4 sm:$0xff]  }
  0x78   :  { %v6825_v29 = vld [vmem:[#allocation2 + $0xe4] ss:$16 sps:$4 sm:$0xff]   ;;  %v6827_v30 = vld [vmem:[#allocation2 + $0xec] ss:$16 sps:$4 sm:$0xff]   ;;  %v6829_v35 = vld [vmem:[#allocation2 + $0xe0] ss:$16 sps:$4 sm:$0xff]  }
  0x79   :  { %324 = vmatpush1.bf16.msra.mxu0 %v6799_v11  ;;  %365 = vmatpush1.bf16.msra.mxu1 %v6800_v12  ;;  %v417_v31 = vld [vmem:[#allocation6] sm:$0xff] }
  0x7a   :  { %325 = vmatprep.subr.bf16.mxu0 %v6801_v13  ;;  %366 = vmatprep.subr.bf16.mxu1 %v6803_v14  ;;  %v421_v32 = vld [vmem:[#allocation6 + $0x20] sm:$0xff] }
  0x7b   :  { %v545_v33 = vld [vmem:[#allocation6 + $0x400] sm:$0xff]  ;;  %v5915_v38 = vcombine.high %v417_v31, %v421_v32  ;;  %v5914_v45 = vcombine.low %v417_v31, %v421_v32 }
  0x7c   :  { %v549_v34 = vld [vmem:[#allocation6 + $0x420] sm:$0xff] }
  0x7d   :  { %326 = vmatpush1.bf16.msra.mxu0 %v6805_v15  ;;  %367 = vmatpush1.bf16.msra.mxu1 %v6806_v16  ;;  %v6830_v36 = vld [vmem:[#allocation2 + $0xe8] ss:$16 sps:$4 sm:$0xff]   ;;  %v103_v37 = vld [vmem:[%s7921_s0] sm:$0xff]  ;;  %v6043_v39 = vcombine.high %v545_v33, %v549_v34  ;;  %v6042_v46 = vcombine.low %v545_v33, %v549_v34 }
  0x7e   :  { %327 = vmatprep.subr.bf16.mxu0 %v6807_v17  ;;  %368 = vmatprep.subr.bf16.mxu1 %v6809_v18  ;;  %v425_v40 = vld [vmem:[#allocation6 + $0x40] sm:$0xff]  ;;  %v104_v44 = vpack.c.bf16 %v103_v37, %v103_v37 }
  0x7f   :  { %v429_v41 = vld [vmem:[#allocation6 + $0x60] sm:$0xff] }
  0x80   :  { %v553_v42 = vld [vmem:[#allocation6 + $0x440] sm:$0xff]  ;;  %v5923_v47 = vcombine.high %v425_v40, %v429_v41  ;;  %v5922_v53 = vcombine.low %v425_v40, %v429_v41 }
  0x81   :  { %328 = vmatpush1.bf16.msra.mxu0 %v6811_v19  ;;  %369 = vmatpush1.bf16.msra.mxu1 %v6812_v20  ;;  %v557_v43 = vld [vmem:[#allocation6 + $0x460] sm:$0xff] }
  0x82   :  { %329 = vmatprep.subr.bf16.mxu0 %v6813_v21  ;;  %370 = vmatprep.subr.bf16.mxu1 %v6815_v22  ;;  %v6051_v48 = vcombine.high %v553_v42, %v557_v43  ;;  %v433_v49 = vld [vmem:[#allocation6 + $0x80] sm:$0xff]  ;;  %v6050_v54 = vcombine.low %v553_v42, %v557_v43 }
  0x83   :  { %v437_v50 = vld [vmem:[#allocation6 + $0xa0] sm:$0xff] }
  0x84   :  { %v561_v51 = vld [vmem:[#allocation6 + $0x480] sm:$0xff]  ;;  %v5931_v55 = vcombine.high %v433_v49, %v437_v50  ;;  %v5930_v61 = vcombine.low %v433_v49, %v437_v50 }
  0x85   :  { %330 = vmatpush1.bf16.msra.mxu0 %v6817_v23  ;;  %371 = vmatpush1.bf16.msra.mxu1 %v6818_v24  ;;  %v565_v52 = vld [vmem:[#allocation6 + $0x4a0] sm:$0xff] }
  0x86   :  { %331 = vmatprep.subr.bf16.mxu0 %v6819_v25  ;;  %372 = vmatprep.subr.bf16.mxu1 %v6821_v26  ;;  %v6059_v56 = vcombine.high %v561_v51, %v565_v52  ;;  %v441_v57 = vld [vmem:[#allocation6 + $0xc0] sm:$0xff]  ;;  %v6058_v62 = vcombine.low %v561_v51, %v565_v52 }
  0x87   :  { %v445_v58 = vld [vmem:[#allocation6 + $0xe0] sm:$0xff] }
  0x88   :  { %v569_v59 = vld [vmem:[#allocation6 + $0x4c0] sm:$0xff]  ;;  %v5939_v3 = vcombine.high %v441_v57, %v445_v58  ;;  %v5938_v5 = vcombine.low %v441_v57, %v445_v58 }
  0x89   :  { %332 = vmatpush1.bf16.msra.mxu0 %v6823_v27  ;;  %373 = vmatpush1.bf16.msra.mxu1 %v6824_v28  ;;  %v573_v60 = vld [vmem:[#allocation6 + $0x4e0] sm:$0xff] }
  0x8a   :  { %333 = vmatprep.subr.bf16.mxu0 %v6825_v29  ;;  %374 = vmatprep.subr.bf16.mxu1 %v6827_v30  ;;  %v449_v63 = vld [vmem:[#allocation6 + $0x100] sm:$0xff]  ;;  %v6067_v4 = vcombine.high %v569_v59, %v573_v60  ;;  %v6066_v6 = vcombine.low %v569_v59, %v573_v60 }
  0x8b   :  { %v453_v0 = vld [vmem:[#allocation6 + $0x120] sm:$0xff] }
  0x8c   :  { %v577_v1 = vld [vmem:[#allocation6 + $0x500] sm:$0xff]  ;;  %v5947_v11 = vcombine.high %v449_v63, %v453_v0  ;;  %v5946_v13 = vcombine.low %v449_v63, %v453_v0 }
  0x8d   :  { %334 = vmatpush1.bf16.msra.mxu0 %v6829_v35  ;;  %375 = vmatpush1.bf16.msra.mxu1 %v6830_v36  ;;  %v581_v2 = vld [vmem:[#allocation6 + $0x520] sm:$0xff] }
  0x8e   :  { %1995 = vmatprep.subr.bf16.mxu1 %v5915_v38  ;;  %2036 = vmatprep.subr.bf16.mxu0 %v6043_v39  ;;  %v457_v7 = vld [vmem:[#allocation6 + $0x140] sm:$0xff]  ;;  %v6075_v12 = vcombine.high %v577_v1, %v581_v2  ;;  %v6074_v14 = vcombine.low %v577_v1, %v581_v2 }
  0x8f   :  { %v461_v8 = vld [vmem:[#allocation6 + $0x160] sm:$0xff] }
  0x90   :  { %352 = vmatmul.mubr.bf16.vlgmr.msra.gmra.mrb[0].mxu0 %v104_v44  ;;  %393 = vmatmul.mubr.bf16.vlgmr.msra.gmra.mrb[0].mxu1 %v104_v44  ;;  %v585_v9 = vld [vmem:[#allocation6 + $0x540] sm:$0xff]  ;;  %v5955_v19 = vcombine.high %v457_v7, %v461_v8  ;;  %v5954_v21 = vcombine.low %v457_v7, %v461_v8 }
  0x91   :  { %1996 = vmatpush1.bf16.msra.mxu1 %v5914_v45  ;;  %2037 = vmatpush1.bf16.msra.mxu0 %v6042_v46  ;;  %v589_v10 = vld [vmem:[#allocation6 + $0x560] sm:$0xff] }
  0x92   :  { %1997 = vmatprep.subr.bf16.mxu1 %v5923_v47  ;;  %2038 = vmatprep.subr.bf16.mxu0 %v6051_v48  ;;  %v465_v15 = vld [vmem:[#allocation6 + $0x180] sm:$0xff]  ;;  %v6083_v20 = vcombine.high %v585_v9, %v589_v10  ;;  %v6082_v22 = vcombine.low %v585_v9, %v589_v10 }
  0x93   :  { %v469_v16 = vld [vmem:[#allocation6 + $0x1a0] sm:$0xff] }
  0x94   :  { %v593_v17 = vld [vmem:[#allocation6 + $0x580] sm:$0xff]  ;;  %v5963_v27 = vcombine.high %v465_v15, %v469_v16  ;;  %v5962_v29 = vcombine.low %v465_v15, %v469_v16 }
  0x95   :  { %1998 = vmatpush1.bf16.msra.mxu1 %v5922_v53  ;;  %2039 = vmatpush1.bf16.msra.mxu0 %v6050_v54  ;;  %v597_v18 = vld [vmem:[#allocation6 + $0x5a0] sm:$0xff] }
  0x96   :  { %1999 = vmatprep.subr.bf16.mxu1 %v5931_v55  ;;  %2040 = vmatprep.subr.bf16.mxu0 %v6059_v56  ;;  %v473_v23 = vld [vmem:[#allocation6 + $0x1c0] sm:$0xff]  ;;  %v6091_v28 = vcombine.high %v593_v17, %v597_v18  ;;  %v6090_v30 = vcombine.low %v593_v17, %v597_v18 }
  0x97   :  { %v477_v24 = vld [vmem:[#allocation6 + $0x1e0] sm:$0xff] }
  0x98   :  { %v601_v25 = vld [vmem:[#allocation6 + $0x5c0] sm:$0xff]  ;;  %v5971_v35 = vcombine.high %v473_v23, %v477_v24  ;;  %v5970_v37 = vcombine.low %v473_v23, %v477_v24 }
  0x99   :  { %2000 = vmatpush1.bf16.msra.mxu1 %v5930_v61  ;;  %2041 = vmatpush1.bf16.msra.mxu0 %v6058_v62  ;;  %v605_v26 = vld [vmem:[#allocation6 + $0x5e0] sm:$0xff] }
  0x9a   :  { %2001 = vmatprep.subr.bf16.mxu1 %v5939_v3  ;;  %2042 = vmatprep.subr.bf16.mxu0 %v6067_v4  ;;  %v481_v31 = vld [vmem:[#allocation6 + $0x200] sm:$0xff]  ;;  %v6099_v36 = vcombine.high %v601_v25, %v605_v26  ;;  %v6098_v38 = vcombine.low %v601_v25, %v605_v26 }
  0x9b   :  { %v485_v32 = vld [vmem:[#allocation6 + $0x220] sm:$0xff] }
  0x9c   :  { %v609_v33 = vld [vmem:[#allocation6 + $0x600] sm:$0xff]  ;;  %v5979_v43 = vcombine.high %v481_v31, %v485_v32  ;;  %v5978_v45 = vcombine.low %v481_v31, %v485_v32 }
  0x9d   :  { %2002 = vmatpush1.bf16.msra.mxu1 %v5938_v5  ;;  %2043 = vmatpush1.bf16.msra.mxu0 %v6066_v6  ;;  %v613_v34 = vld [vmem:[#allocation6 + $0x620] sm:$0xff] }
  0x9e   :  { %2003 = vmatprep.subr.bf16.mxu1 %v5947_v11  ;;  %2044 = vmatprep.subr.bf16.mxu0 %v6075_v12  ;;  %v489_v39 = vld [vmem:[#allocation6 + $0x240] sm:$0xff]  ;;  %v6107_v44 = vcombine.high %v609_v33, %v613_v34  ;;  %v6106_v46 = vcombine.low %v609_v33, %v613_v34 }
  0x9f   :  { %v493_v40 = vld [vmem:[#allocation6 + $0x260] sm:$0xff] }
  0xa0   :  { %v617_v41 = vld [vmem:[#allocation6 + $0x640] sm:$0xff]  ;;  %v5987_v51 = vcombine.high %v489_v39, %v493_v40  ;;  %v5986_v53 = vcombine.low %v489_v39, %v493_v40  ;;  %v423_v40 = vld [vmem:[#allocation6 + $0x30] sm:$0xff] }
  0xa1   :  { %2004 = vmatpush1.bf16.msra.mxu1 %v5946_v13  ;;  %2045 = vmatpush1.bf16.msra.mxu0 %v6074_v14  ;;  %v621_v42 = vld [vmem:[#allocation6 + $0x660] sm:$0xff] }
  0xa2   :  { %2005 = vmatprep.subr.bf16.mxu1 %v5955_v19  ;;  %2046 = vmatprep.subr.bf16.mxu0 %v6083_v20  ;;  %v497_v47 = vld [vmem:[#allocation6 + $0x280] sm:$0xff]  ;;  %v6115_v52 = vcombine.high %v617_v41, %v621_v42  ;;  %v6114_v54 = vcombine.low %v617_v41, %v621_v42 }
  0xa3   :  { %v501_v48 = vld [vmem:[#allocation6 + $0x2a0] sm:$0xff] }
  0xa4   :  { %v625_v49 = vld [vmem:[#allocation6 + $0x680] sm:$0xff]  ;;  %v5995_v59 = vcombine.high %v497_v47, %v501_v48  ;;  %v5994_v61 = vcombine.low %v497_v47, %v501_v48 }
  0xa5   :  { %2006 = vmatpush1.bf16.msra.mxu1 %v5954_v21  ;;  %2047 = vmatpush1.bf16.msra.mxu0 %v6082_v22  ;;  %v629_v50 = vld [vmem:[#allocation6 + $0x6a0] sm:$0xff] }
  0xa6   :  { %2007 = vmatprep.subr.bf16.mxu1 %v5963_v27  ;;  %2048 = vmatprep.subr.bf16.mxu0 %v6091_v28  ;;  %v505_v55 = vld [vmem:[#allocation6 + $0x2c0] sm:$0xff]  ;;  %v6123_v60 = vcombine.high %v625_v49, %v629_v50  ;;  %v6122_v62 = vcombine.low %v625_v49, %v629_v50 }
  0xa7   :  { %v509_v56 = vld [vmem:[#allocation6 + $0x2e0] sm:$0xff] }
  0xa8   :  { %v633_v57 = vld [vmem:[#allocation6 + $0x6c0] sm:$0xff]  ;;  %v6003_v3 = vcombine.high %v505_v55, %v509_v56  ;;  %v6002_v5 = vcombine.low %v505_v55, %v509_v56 }
  0xa9   :  { %2008 = vmatpush1.bf16.msra.mxu1 %v5962_v29  ;;  %2049 = vmatpush1.bf16.msra.mxu0 %v6090_v30  ;;  %v637_v58 = vld [vmem:[#allocation6 + $0x6e0] sm:$0xff] }
  0xaa   :  { %2009 = vmatprep.subr.bf16.mxu1 %v5971_v35  ;;  %2050 = vmatprep.subr.bf16.mxu0 %v6099_v36  ;;  %v513_v63 = vld [vmem:[#allocation6 + $0x300] sm:$0xff]  ;;  %v6131_v4 = vcombine.high %v633_v57, %v637_v58  ;;  %v6130_v6 = vcombine.low %v633_v57, %v637_v58  ;;  %v7754_v35 = vld [vmem:[#allocation6 + $0x8] sm:$0xff] }
  0xab   :  { %v517_v0 = vld [vmem:[#allocation6 + $0x320] sm:$0xff]  ;;  %v7756_v36 = vld [vmem:[#allocation6 + $0x28] sm:$0xff] }
  0xac   :  { %v641_v1 = vld [vmem:[#allocation6 + $0x700] sm:$0xff]  ;;  %v6011_v11 = vcombine.high %v513_v63, %v517_v0  ;;  %v6010_v13 = vcombine.low %v513_v63, %v517_v0  ;;  %v5917_v39 = vcombine.high %v7754_v35, %v7756_v36 }
  0xad   :  { %2010 = vmatpush1.bf16.msra.mxu1 %v5970_v37  ;;  %2051 = vmatpush1.bf16.msra.mxu0 %v6098_v38  ;;  %v645_v2 = vld [vmem:[#allocation6 + $0x720] sm:$0xff]  ;;  %v7758_v37 = vld [vmem:[#allocation6 + $0x10] sm:$0xff]  ;;  %v5916_v38 = vcombine.low %v7754_v35, %v7756_v36  ;;  %v450_v36 = vld [vmem:[#allocation6 + $0x108] sm:$0xff] }
  0xae   :  { %2011 = vmatprep.subr.bf16.mxu1 %v5979_v43  ;;  %2052 = vmatprep.subr.bf16.mxu0 %v6107_v44  ;;  %v521_v7 = vld [vmem:[#allocation6 + $0x340] sm:$0xff]  ;;  %v6139_v12 = vcombine.high %v641_v1, %v645_v2  ;;  %v6138_v14 = vcombine.low %v641_v1, %v645_v2  ;;  %v5918_v41 = vcombine.low %v7758_v37, %v423_v40  ;;  %v139_v43 = vlaneseq }
  0xaf   :  { %v525_v8 = vld [vmem:[#allocation6 + $0x360] sm:$0xff]  ;;  %v5919_v42 = vcombine.high %v7758_v37, %v423_v40  ;;  %v454_v37 = vld [vmem:[#allocation6 + $0x128] sm:$0xff] }
  0xb0   :  { %v649_v9 = vld [vmem:[#allocation6 + $0x740] sm:$0xff]  ;;  %v6019_v15 = vcombine.high %v521_v7, %v525_v8  ;;  %v6018_v17 = vcombine.low %v521_v7, %v525_v8  ;;  %v7766_v44 = vshrl.u32 %v139_v43, 7  ;;  %v426_v7 = vld [vmem:[#allocation6 + $0x48] sm:$0xff] }
  0xb1   :  { %2012 = vmatpush1.bf16.msra.mxu1 %v5978_v45  ;;  %2053 = vmatpush1.bf16.msra.mxu0 %v6106_v46  ;;  %v653_v10 = vld [vmem:[#allocation6 + $0x760] sm:$0xff]  ;;  %v137_v45 = vld [vmem:[#allocation4] sm:$0xf]  ;;  %v430_v8 = vld [vmem:[#allocation6 + $0x68] sm:$0xff] }
  0xb2   :  { %2013 = vmatprep.subr.bf16.mxu1 %v5987_v51  ;;  %2054 = vmatprep.subr.bf16.mxu0 %v6115_v52  ;;  %v6147_v16 = vcombine.high %v649_v9, %v653_v10  ;;  %v6146_v18 = vcombine.low %v649_v9, %v653_v10  ;;  %v529_v19 = vld [vmem:[#allocation6 + $0x380] sm:$0xff]  ;;  %v7769_v46 = vsub.s32 0, %v7766_v44  ;;  %v7772_v47 = vsub.s32 2, %v7766_v44  ;;  %v427_v9 = vld [vmem:[#allocation6 + $0x50] sm:$0xff] }
  0xb3   :  { %v533_v20 = vld [vmem:[#allocation6 + $0x3a0] sm:$0xff]  ;;  %v7775_v48 = vsub.s32 1, %v7766_v44  ;;  %v7778_v49 = vsub.s32 3, %v7766_v44 }
  0xb4   :  { %v657_v21 = vld [vmem:[#allocation6 + $0x780] sm:$0xff]  ;;  %v6027_v22 = vcombine.high %v529_v19, %v533_v20  ;;  %v6026_v24 = vcombine.low %v529_v19, %v533_v20  ;;  %v142_v50 = vrot.slane %v137_v45, %v7769_v46  ;;  %v150_v51 = vrot.slane %v137_v45, %v7772_v47  ;;  %v435_v20 = vld [vmem:[#allocation6 + $0x90] sm:$0xff] }
  0xb5   :  { %2014 = vmatpush1.bf16.msra.mxu1 %v5986_v53  ;;  %2055 = vmatpush1.bf16.msra.mxu0 %v6114_v54  ;;  %v661_v23 = vld [vmem:[#allocation6 + $0x7a0] sm:$0xff]  ;;  %v146_v52 = vrot.slane %v137_v45, %v7775_v48  ;;  %v154_v53 = vrot.slane %v137_v45, %v7778_v49  ;;  %v458_v45 = vld [vmem:[#allocation6 + $0x148] sm:$0xff] }
  0xb6   :  { %2015 = vmatprep.subr.bf16.mxu1 %v5995_v59  ;;  %2056 = vmatprep.subr.bf16.mxu0 %v6123_v60  ;;  %v6154_v25 = vcombine.low %v657_v21, %v661_v23  ;;  %v6155_v26 = vcombine.high %v657_v21, %v661_v23  ;;  %v537_v27 = vld [vmem:[#allocation6 + $0x3c0] sm:$0xff]  ;;  %v439_v21 = vld [vmem:[#allocation6 + $0xb0] sm:$0xff] }
  0xb7   :  { %v541_v28 = vld [vmem:[#allocation6 + $0x3e0] sm:$0xff] }
  0xb8   :  { %v665_v29 = vld [vmem:[#allocation6 + $0x7c0] sm:$0xff]  ;;  %v6035_v30 = vcombine.high %v537_v27, %v541_v28  ;;  %v6034_v32 = vcombine.low %v537_v27, %v541_v28  ;;  %v446_v27 = vld [vmem:[#allocation6 + $0xe8] sm:$0xff] }
  0xb9   :  { %2016 = vmatpush1.bf16.msra.mxu1 %v5994_v61  ;;  %2057 = vmatpush1.bf16.msra.mxu0 %v6122_v62  ;;  %v669_v31 = vld [vmem:[#allocation6 + $0x7e0] sm:$0xff] }
  0xba   :  { %2017 = vmatprep.subr.bf16.mxu1 %v6003_v3  ;;  %2058 = vmatprep.subr.bf16.mxu0 %v6131_v4  ;;  %v6162_v33 = vcombine.low %v665_v29, %v669_v31  ;;  %v6163_v34 = vcombine.high %v665_v29, %v669_v31  ;;  %v5935_v29 = vcombine.high %v435_v20, %v439_v21  ;;  %v447_v31 = vld [vmem:[#allocation6 + $0xf0] sm:$0xff] }
  0xbd   :  { %2018 = vmatpush1.bf16.msra.mxu1 %v6002_v5  ;;  %2059 = vmatpush1.bf16.msra.mxu0 %v6130_v6 }
  0xbe   :  { %2019 = vmatprep.subr.bf16.mxu1 %v6011_v11  ;;  %2060 = vmatprep.subr.bf16.mxu0 %v6139_v12 }
  0xc1   :  { %2020 = vmatpush1.bf16.msra.mxu1 %v6010_v13  ;;  %2061 = vmatpush1.bf16.msra.mxu0 %v6138_v14  ;;  %v431_v14 = vld [vmem:[#allocation6 + $0x70] sm:$0xff] }
  0xc2   :  { %2021 = vmatprep.subr.bf16.mxu1 %v6019_v15  ;;  %2062 = vmatprep.subr.bf16.mxu0 %v6147_v16  ;;  %v5927_v23 = vcombine.high %v427_v9, %v431_v14 }
  0xc5   :  { %2022 = vmatpush1.bf16.msra.mxu1 %v6018_v17  ;;  %2063 = vmatpush1.bf16.msra.mxu0 %v6146_v18  ;;  %v434_v17 = vld [vmem:[#allocation6 + $0x88] sm:$0xff] }
  0xc6   :  { %2023 = vmatprep.subr.bf16.mxu1 %v6027_v22  ;;  %2064 = vmatprep.subr.bf16.mxu0 %v6155_v26  ;;  %v438_v18 = vld [vmem:[#allocation6 + $0xa8] sm:$0xff]  ;;  %v5925_v22 = vcombine.high %v426_v7, %v430_v8 }
  0xc7   :  { %v442_v26 = vld [vmem:[#allocation6 + $0xc8] sm:$0xff]  ;;  %v5933_v28 = vcombine.high %v434_v17, %v438_v18 }
  0xc8   :  { %v5940_v40 = vcombine.low %v442_v26, %v446_v27 }
  0xc9   :  { %2024 = vmatpush1.bf16.msra.mxu1 %v6026_v24  ;;  %2065 = vmatpush1.bf16.msra.mxu0 %v6154_v25  ;;  %v5924_v24 = vcombine.low %v426_v7, %v430_v8  ;;  %v5926_v25 = vcombine.low %v427_v9, %v431_v14  ;;  %v482_v9 = vld [vmem:[#allocation6 + $0x208] sm:$0xff] }
  0xca   :  { %2025 = vmatprep.subr.bf16.mxu1 %v6035_v30  ;;  %2066 = vmatprep.subr.bf16.mxu0 %v6163_v34  ;;  %v443_v30 = vld [vmem:[#allocation6 + $0xd0] sm:$0xff]  ;;  %v5941_v34 = vcombine.high %v442_v26, %v446_v27 }
  0xcb   :  { %v5943_v35 = vcombine.high %v443_v30, %v447_v31 }
  0xcd   :  { %2026 = vmatpush1.bf16.msra.mxu1 %v6034_v32  ;;  %2067 = vmatpush1.bf16.msra.mxu0 %v6162_v33  ;;  %v5932_v32 = vcombine.low %v434_v17, %v438_v18  ;;  %v5934_v33 = vcombine.low %v435_v20, %v439_v21  ;;  %v490_v21 = vld [vmem:[#allocation6 + $0x248] sm:$0xff] }
  0xce   :  { %2077 = vmatprep.subr.bf16.mxu1 %v5917_v39  ;;  %2159 = vmatprep.subr.bf16.mxu0 %v5919_v42  ;;  %v455_v39 = vld [vmem:[#allocation6 + $0x130] sm:$0xff]  ;;  %v5949_v42 = vcombine.high %v450_v36, %v454_v37 }
 0x163   :  { %v353_v54 = vpop.f32.mrb[0].mxu0  ;;  %v394_v55 = vpop.f32.mrb[0].mxu1 }
 0x164   :  { %v354_v56 = vadd.f32 %v353_v54, %v142_v50  ;;  %v395_v57 = vadd.f32 %v394_v55, %v150_v51  ;;  %v355_v58 = vpop.f32.mrb[1].mxu0  ;;  %v396_v59 = vpop.f32.mrb[1].mxu1  ;;  %v462_v50 = vld [vmem:[#allocation6 + $0x168] sm:$0xff]  ;;  %v459_v51 = vld [vmem:[#allocation6 + $0x150] sm:$0xff] }
 0x165   :  { %v356_v60 = vadd.f32 %v355_v58, %v146_v52  ;;  %v397_v61 = vadd.f32 %v396_v59, %v154_v53  ;;  %v357_v62 = vpop.f32.mrb[2].mxu0  ;;  %v398_v63 = vpop.f32.mrb[2].mxu1  ;;  %v463_v52 = vld [vmem:[#allocation6 + $0x170] sm:$0xff]  ;;  %v5948_v53 = vcombine.low %v450_v36, %v454_v37  ;;  %v5957_v55 = vcombine.high %v458_v45, %v462_v50  ;;  %v470_v58 = vld [vmem:[#allocation6 + $0x1a8] sm:$0xff] }
 0x166   :  { %vm401_vm0 = vcmp.gt.f32.partialorder %v354_v56, 0.0  ;;  %v405_v0 = vmul.f32 0.2, %v354_v56  ;;  %vm403_vm1 = vcmp.gt.f32.partialorder %v395_v57, 0.0  ;;  %v407_v1 = vmul.f32 0.2, %v395_v57 }
 0x167   :  { %vm402_vm2 = vcmp.gt.f32.partialorder %v356_v60, 0.0  ;;  %v406_v2 = vmul.f32 0.2, %v356_v60  ;;  %vm404_vm3 = vcmp.gt.f32.partialorder %v397_v61, 0.0  ;;  %v408_v3 = vmul.f32 0.2, %v397_v61 }
 0x168   :  { %v409_v4 = vsel %vm401_vm0, %v354_v56, %v405_v0  ;;  %v411_v5 = vsel %vm403_vm1, %v395_v57, %v407_v1  ;;  %v358_v6 = vpop.f32.mrb[3].mxu0  ;;  %v399_v10 = vpop.f32.mrb[3].mxu1  ;;  %v5959_v56 = vcombine.high %v459_v51, %v463_v52  ;;  %v466_v57 = vld [vmem:[#allocation6 + $0x188] sm:$0xff]  ;;  %v467_v59 = vld [vmem:[#allocation6 + $0x190] sm:$0xff]  ;;  %v5958_v62 = vcombine.low %v459_v51, %v463_v52 }
 0x169   :  { %v7784_v11 = vpack.c.bf16 %v411_v5, %v411_v5  ;;  %v410_v12 = vsel %vm402_vm2, %v356_v60, %v406_v2  ;;  %v412_v13 = vsel %vm404_vm3, %v397_v61, %v408_v3  ;;  %v7790_v19 = vpack.c.bf16 %v409_v4, %v409_v4  ;;  %v471_v60 = vld [vmem:[#allocation6 + $0x1b0] sm:$0xff]  ;;  %v474_v1 = vld [vmem:[#allocation6 + $0x1c8] sm:$0xff] }
 0x16a   :  { %v7786_v15 = vpack.c.bf16 %v410_v12, %v410_v12  ;;  %v7788_v16 = vpack.c.bf16 %v412_v13, %v412_v13  ;;  %v5956_v61 = vcombine.low %v458_v45, %v462_v50  ;;  %v5965_v63 = vcombine.high %v466_v57, %v470_v58  ;;  %v478_v2 = vld [vmem:[#allocation6 + $0x1e8] sm:$0xff]  ;;  %v475_v3 = vld [vmem:[#allocation6 + $0x1d0] sm:$0xff] }
 0x16b   :  { %v5967_v0 = vcombine.high %v467_v59, %v471_v60  ;;  %v479_v4 = vld [vmem:[#allocation6 + $0x1f0] sm:$0xff]  ;;  %v5964_v5 = vcombine.low %v466_v57, %v470_v58  ;;  %v5966_v6 = vcombine.low %v467_v59, %v471_v60  ;;  %v5973_v7 = vcombine.high %v474_v1, %v478_v2  ;;  %v486_v10 = vld [vmem:[#allocation6 + $0x228] sm:$0xff] }
 0x16c   :  { %2027 = vmatprep.mubr.bf16.mxu1 %v7786_v15  ;;  %2068 = vmatprep.mubr.bf16.mxu0 %v7788_v16  ;;  %v5975_v8 = vcombine.high %v475_v3, %v479_v4  ;;  %v483_v12 = vld [vmem:[#allocation6 + $0x210] sm:$0xff]  ;;  %v5972_v14 = vcombine.low %v474_v1, %v478_v2  ;;  %v5974_v17 = vcombine.low %v475_v3, %v479_v4  ;;  %v506_v37 = vld [vmem:[#allocation6 + $0x2c8] sm:$0xff] }
 0x16d   :  { %2028 = vmatmul.mubr.bf16.vlgmr.msra.gmra.mrb[4].mxu1 %v7790_v19  ;;  %2069 = vmatmul.mubr.bf16.vlgmr.msra.gmra.mrb[4].mxu0 %v7784_v11  ;;  %v487_v13 = vld [vmem:[#allocation6 + $0x230] sm:$0xff]  ;;  %v5981_v18 = vcombine.high %v482_v9, %v486_v10  ;;  %v514_v50 = vld [vmem:[#allocation6 + $0x308] sm:$0xff] }
 0x16e   :  { %2078 = vmatpush1.bf16.msra.mxu1 %v5916_v38  ;;  %2160 = vmatpush1.bf16.msra.mxu0 %v5918_v41  ;;  %v451_v38 = vld [vmem:[#allocation6 + $0x110] sm:$0xff]  ;;  %v5942_v41 = vcombine.low %v443_v30, %v447_v31  ;;  %v5983_v20 = vcombine.high %v483_v12, %v487_v13  ;;  %v5982_v26 = vcombine.low %v483_v12, %v487_v13  ;;  %v502_v30 = vld [vmem:[#allocation6 + $0x2a8] sm:$0xff] }
 0x16f   :  { %2109 = vmatprep.mubr.bf16.mxu1 %v7786_v15  ;;  %2191 = vmatprep.mubr.bf16.mxu0 %v7786_v15  ;;  %v5951_v43 = vcombine.high %v451_v38, %v455_v39  ;;  %v5950_v54 = vcombine.low %v451_v38, %v455_v39  ;;  %v499_v31 = vld [vmem:[#allocation6 + $0x290] sm:$0xff]  ;;  %v510_v38 = vld [vmem:[#allocation6 + $0x2e8] sm:$0xff] }
 0x170   :  { %2079 = vmatprep.subr.bf16.mxu1 %v5925_v22  ;;  %2161 = vmatprep.subr.bf16.mxu0 %v5927_v23  ;;  %v494_v22 = vld [vmem:[#allocation6 + $0x268] sm:$0xff]  ;;  %v491_v23 = vld [vmem:[#allocation6 + $0x250] sm:$0xff] }
 0x171   :  { %v5989_v27 = vcombine.high %v490_v21, %v494_v22  ;;  %v507_v39 = vld [vmem:[#allocation6 + $0x2d0] sm:$0xff]  ;;  %v518_v51 = vld [vmem:[#allocation6 + $0x328] sm:$0xff] }
 0x172   :  { %2080 = vmatpush1.bf16.msra.mxu1 %v5924_v24  ;;  %2162 = vmatpush1.bf16.msra.mxu0 %v5926_v25  ;;  %v495_v24 = vld [vmem:[#allocation6 + $0x270] sm:$0xff]  ;;  %v5980_v25 = vcombine.low %v482_v9, %v486_v10  ;;  %v522_v58 = vld [vmem:[#allocation6 + $0x348] sm:$0xff] }
 0x173   :  { %2081 = vmatprep.subr.bf16.mxu1 %v5933_v28  ;;  %2163 = vmatprep.subr.bf16.mxu0 %v5935_v29  ;;  %v5991_v28 = vcombine.high %v491_v23, %v495_v24  ;;  %v498_v29 = vld [vmem:[#allocation6 + $0x288] sm:$0xff]  ;;  %v515_v52 = vld [vmem:[#allocation6 + $0x310] sm:$0xff] }
 0x174   :  { %v526_v59 = vld [vmem:[#allocation6 + $0x368] sm:$0xff]  ;;  %v523_v60 = vld [vmem:[#allocation6 + $0x350] sm:$0xff] }
 0x175   :  { %v530_v2 = vld [vmem:[#allocation6 + $0x388] sm:$0xff]  ;;  %v531_v4 = vld [vmem:[#allocation6 + $0x390] sm:$0xff] }
 0x176   :  { %2082 = vmatpush1.bf16.msra.mxu1 %v5932_v32  ;;  %2164 = vmatpush1.bf16.msra.mxu0 %v5934_v33  ;;  %v503_v32 = vld [vmem:[#allocation6 + $0x2b0] sm:$0xff]  ;;  %v5988_v33 = vcombine.low %v490_v21, %v494_v22  ;;  %v534_v3 = vld [vmem:[#allocation6 + $0x3a8] sm:$0xff] }
 0x177   :  { %2083 = vmatprep.subr.bf16.mxu1 %v5941_v34  ;;  %2165 = vmatprep.subr.bf16.mxu0 %v5943_v35  ;;  %v5990_v34 = vcombine.low %v491_v23, %v495_v24  ;;  %v5997_v35 = vcombine.high %v498_v29, %v502_v30  ;;  %v5999_v36 = vcombine.high %v499_v31, %v503_v32  ;;  %v538_v10 = vld [vmem:[#allocation6 + $0x3c8] sm:$0xff]  ;;  %v539_v13 = vld [vmem:[#allocation6 + $0x3d0] sm:$0xff] }
 0x178   :  { %v542_v12 = vld [vmem:[#allocation6 + $0x3e8] sm:$0xff]  ;;  %v547_v24 = vld [vmem:[#allocation6 + $0x410] sm:$0xff] }
 0x179   :  { %v546_v22 = vld [vmem:[#allocation6 + $0x408] sm:$0xff] }
 0x17a   :  { %2084 = vmatpush1.bf16.msra.mxu1 %v5940_v40  ;;  %2166 = vmatpush1.bf16.msra.mxu0 %v5942_v41  ;;  %v511_v40 = vld [vmem:[#allocation6 + $0x2f0] sm:$0xff]  ;;  %v5996_v41 = vcombine.low %v498_v29, %v502_v30  ;;  %v550_v23 = vld [vmem:[#allocation6 + $0x428] sm:$0xff] }
 0x17b   :  { %2085 = vmatprep.subr.bf16.mxu1 %v5949_v42  ;;  %2167 = vmatprep.subr.bf16.mxu0 %v5951_v43  ;;  %v5998_v42 = vcombine.low %v499_v31, %v503_v32  ;;  %v6005_v43 = vcombine.high %v506_v37, %v510_v38  ;;  %v6007_v45 = vcombine.high %v507_v39, %v511_v40  ;;  %v554_v30 = vld [vmem:[#allocation6 + $0x448] sm:$0xff]  ;;  %v555_v32 = vld [vmem:[#allocation6 + $0x450] sm:$0xff] }
 0x17c   :  { %v558_v31 = vld [vmem:[#allocation6 + $0x468] sm:$0xff] }
 0x17e   :  { %2086 = vmatpush1.bf16.msra.mxu1 %v5948_v53  ;;  %2168 = vmatpush1.bf16.msra.mxu0 %v5950_v54  ;;  %v519_v53 = vld [vmem:[#allocation6 + $0x330] sm:$0xff]  ;;  %v6004_v54 = vcombine.low %v506_v37, %v510_v38  ;;  %v562_v38 = vld [vmem:[#allocation6 + $0x488] sm:$0xff] }
 0x17f   :  { %2087 = vmatprep.subr.bf16.mxu1 %v5957_v55  ;;  %2169 = vmatprep.subr.bf16.mxu0 %v5959_v56  ;;  %v6006_v55 = vcombine.low %v507_v39, %v511_v40  ;;  %v6013_v56 = vcombine.high %v514_v50, %v518_v51  ;;  %v6015_v57 = vcombine.high %v515_v52, %v519_v53  ;;  %v566_v39 = vld [vmem:[#allocation6 + $0x4a8] sm:$0xff]  ;;  %v563_v40 = vld [vmem:[#allocation6 + $0x490] sm:$0xff] }
 0x182   :  { %2088 = vmatpush1.bf16.msra.mxu1 %v5956_v61  ;;  %2170 = vmatpush1.bf16.msra.mxu0 %v5958_v62  ;;  %v527_v61 = vld [vmem:[#allocation6 + $0x370] sm:$0xff]  ;;  %v6012_v62 = vcombine.low %v514_v50, %v518_v51  ;;  %v570_v51 = vld [vmem:[#allocation6 + $0x4c8] sm:$0xff] }
 0x183   :  { %2089 = vmatprep.subr.bf16.mxu1 %v5965_v63  ;;  %2171 = vmatprep.subr.bf16.mxu0 %v5967_v0  ;;  %v6014_v63 = vcombine.low %v515_v52, %v519_v53  ;;  %v6021_v0 = vcombine.high %v522_v58, %v526_v59  ;;  %v6023_v1 = vcombine.high %v523_v60, %v527_v61  ;;  %v574_v52 = vld [vmem:[#allocation6 + $0x4e8] sm:$0xff]  ;;  %v571_v53 = vld [vmem:[#allocation6 + $0x4d0] sm:$0xff] }
 0x186   :  { %2090 = vmatpush1.bf16.msra.mxu1 %v5964_v5  ;;  %2172 = vmatpush1.bf16.msra.mxu0 %v5966_v6  ;;  %v535_v5 = vld [vmem:[#allocation6 + $0x3b0] sm:$0xff]  ;;  %v6020_v6 = vcombine.low %v522_v58, %v526_v59  ;;  %v578_v59 = vld [vmem:[#allocation6 + $0x508] sm:$0xff] }
 0x187   :  { %2091 = vmatprep.subr.bf16.mxu1 %v5973_v7  ;;  %2173 = vmatprep.subr.bf16.mxu0 %v5975_v8  ;;  %v6022_v7 = vcombine.low %v523_v60, %v527_v61  ;;  %v6029_v8 = vcombine.high %v530_v2, %v534_v3  ;;  %v6031_v9 = vcombine.high %v531_v4, %v535_v5  ;;  %v582_v60 = vld [vmem:[#allocation6 + $0x528] sm:$0xff]  ;;  %v579_v61 = vld [vmem:[#allocation6 + $0x510] sm:$0xff] }
 0x18a   :  { %2092 = vmatpush1.bf16.msra.mxu1 %v5972_v14  ;;  %2174 = vmatpush1.bf16.msra.mxu0 %v5974_v17  ;;  %v543_v14 = vld [vmem:[#allocation6 + $0x3f0] sm:$0xff]  ;;  %v6028_v17 = vcombine.low %v530_v2, %v534_v3  ;;  %v586_v3 = vld [vmem:[#allocation6 + $0x548] sm:$0xff] }
 0x18b   :  { %2093 = vmatprep.subr.bf16.mxu1 %v5981_v18  ;;  %2175 = vmatprep.subr.bf16.mxu0 %v5983_v20  ;;  %v6030_v18 = vcombine.low %v531_v4, %v535_v5  ;;  %v6037_v20 = vcombine.high %v538_v10, %v542_v12  ;;  %v6039_v21 = vcombine.high %v539_v13, %v543_v14  ;;  %v590_v4 = vld [vmem:[#allocation6 + $0x568] sm:$0xff]  ;;  %v587_v5 = vld [vmem:[#allocation6 + $0x550] sm:$0xff] }
 0x18e   :  { %2094 = vmatpush1.bf16.msra.mxu1 %v5980_v25  ;;  %2176 = vmatpush1.bf16.msra.mxu0 %v5982_v26  ;;  %v551_v25 = vld [vmem:[#allocation6 + $0x430] sm:$0xff]  ;;  %v6036_v26 = vcombine.low %v538_v10, %v542_v12  ;;  %v594_v12 = vld [vmem:[#allocation6 + $0x588] sm:$0xff] }
 0x18f   :  { %2095 = vmatprep.subr.bf16.mxu1 %v5989_v27  ;;  %2177 = vmatprep.subr.bf16.mxu0 %v5991_v28  ;;  %v6038_v27 = vcombine.low %v539_v13, %v543_v14  ;;  %v6045_v28 = vcombine.high %v546_v22, %v550_v23  ;;  %v6047_v29 = vcombine.high %v547_v24, %v551_v25  ;;  %v598_v13 = vld [vmem:[#allocation6 + $0x5a8] sm:$0xff]  ;;  %v595_v14 = vld [vmem:[#allocation6 + $0x590] sm:$0xff] }
 0x192   :  { %2096 = vmatpush1.bf16.msra.mxu1 %v5988_v33  ;;  %2178 = vmatpush1.bf16.msra.mxu0 %v5990_v34  ;;  %v559_v33 = vld [vmem:[#allocation6 + $0x470] sm:$0xff]  ;;  %v6044_v34 = vcombine.low %v546_v22, %v550_v23  ;;  %v602_v23 = vld [vmem:[#allocation6 + $0x5c8] sm:$0xff] }
 0x193   :  { %2097 = vmatprep.subr.bf16.mxu1 %v5997_v35  ;;  %2179 = vmatprep.subr.bf16.mxu0 %v5999_v36  ;;  %v6046_v35 = vcombine.low %v547_v24, %v551_v25  ;;  %v6053_v36 = vcombine.high %v554_v30, %v558_v31  ;;  %v6055_v37 = vcombine.high %v555_v32, %v559_v33  ;;  %v606_v24 = vld [vmem:[#allocation6 + $0x5e8] sm:$0xff]  ;;  %v603_v25 = vld [vmem:[#allocation6 + $0x5d0] sm:$0xff] }
 0x196   :  { %2098 = vmatpush1.bf16.msra.mxu1 %v5996_v41  ;;  %2180 = vmatpush1.bf16.msra.mxu0 %v5998_v42  ;;  %v567_v41 = vld [vmem:[#allocation6 + $0x4b0] sm:$0xff]  ;;  %v6052_v42 = vcombine.low %v554_v30, %v558_v31  ;;  %v610_v31 = vld [vmem:[#allocation6 + $0x608] sm:$0xff] }
 0x197   :  { %2099 = vmatprep.subr.bf16.mxu1 %v6005_v43  ;;  %2181 = vmatprep.subr.bf16.mxu0 %v6007_v45  ;;  %v6054_v43 = vcombine.low %v555_v32, %v559_v33  ;;  %v6061_v45 = vcombine.high %v562_v38, %v566_v39  ;;  %v6063_v50 = vcombine.high %v563_v40, %v567_v41  ;;  %v614_v32 = vld [vmem:[#allocation6 + $0x628] sm:$0xff]  ;;  %v611_v33 = vld [vmem:[#allocation6 + $0x610] sm:$0xff] }
 0x19a   :  { %2100 = vmatpush1.bf16.msra.mxu1 %v6004_v54  ;;  %2182 = vmatpush1.bf16.msra.mxu0 %v6006_v55  ;;  %v575_v54 = vld [vmem:[#allocation6 + $0x4f0] sm:$0xff]  ;;  %v6060_v55 = vcombine.low %v562_v38, %v566_v39  ;;  %v618_v39 = vld [vmem:[#allocation6 + $0x648] sm:$0xff] }
 0x19b   :  { %2101 = vmatprep.subr.bf16.mxu1 %v6013_v56  ;;  %2183 = vmatprep.subr.bf16.mxu0 %v6015_v57  ;;  %v6062_v56 = vcombine.low %v563_v40, %v567_v41  ;;  %v6069_v57 = vcombine.high %v570_v51, %v574_v52  ;;  %v6071_v58 = vcombine.high %v571_v53, %v575_v54  ;;  %v622_v40 = vld [vmem:[#allocation6 + $0x668] sm:$0xff]  ;;  %v619_v41 = vld [vmem:[#allocation6 + $0x650] sm:$0xff] }
 0x19e   :  { %2102 = vmatpush1.bf16.msra.mxu1 %v6012_v62  ;;  %2184 = vmatpush1.bf16.msra.mxu0 %v6014_v63  ;;  %v583_v62 = vld [vmem:[#allocation6 + $0x530] sm:$0xff]  ;;  %v6068_v63 = vcombine.low %v570_v51, %v574_v52  ;;  %v626_v52 = vld [vmem:[#allocation6 + $0x688] sm:$0xff] }
 0x19f   :  { %2103 = vmatprep.subr.bf16.mxu1 %v6021_v0  ;;  %2185 = vmatprep.subr.bf16.mxu0 %v6023_v1  ;;  %v6070_v0 = vcombine.low %v571_v53, %v575_v54  ;;  %v6077_v1 = vcombine.high %v578_v59, %v582_v60  ;;  %v6079_v2 = vcombine.high %v579_v61, %v583_v62  ;;  %v630_v53 = vld [vmem:[#allocation6 + $0x6a8] sm:$0xff]  ;;  %v627_v54 = vld [vmem:[#allocation6 + $0x690] sm:$0xff] }
 0x1a2   :  { %2104 = vmatpush1.bf16.msra.mxu1 %v6020_v6  ;;  %2186 = vmatpush1.bf16.msra.mxu0 %v6022_v7  ;;  %v591_v6 = vld [vmem:[#allocation6 + $0x570] sm:$0xff]  ;;  %v6076_v7 = vcombine.low %v578_v59, %v582_v60  ;;  %v634_v60 = vld [vmem:[#allocation6 + $0x6c8] sm:$0xff] }
 0x1a3   :  { %2105 = vmatprep.subr.bf16.mxu1 %v6029_v8  ;;  %2187 = vmatprep.subr.bf16.mxu0 %v6031_v9  ;;  %v6078_v8 = vcombine.low %v579_v61, %v583_v62  ;;  %v6085_v9 = vcombine.high %v586_v3, %v590_v4  ;;  %v6087_v10 = vcombine.high %v587_v5, %v591_v6  ;;  %v638_v61 = vld [vmem:[#allocation6 + $0x6e8] sm:$0xff]  ;;  %v635_v62 = vld [vmem:[#allocation6 + $0x6d0] sm:$0xff] }
 0x1a6   :  { %2106 = vmatpush1.bf16.msra.mxu1 %v6028_v17  ;;  %2188 = vmatpush1.bf16.msra.mxu0 %v6030_v18  ;;  %v599_v17 = vld [vmem:[#allocation6 + $0x5b0] sm:$0xff]  ;;  %v6084_v18 = vcombine.low %v586_v3, %v590_v4  ;;  %v642_v4 = vld [vmem:[#allocation6 + $0x708] sm:$0xff] }
 0x1a7   :  { %2107 = vmatprep.subr.bf16.mxu1 %v6037_v20  ;;  %2189 = vmatprep.subr.bf16.mxu0 %v6039_v21  ;;  %v6086_v20 = vcombine.low %v587_v5, %v591_v6  ;;  %v6093_v21 = vcombine.high %v594_v12, %v598_v13  ;;  %v6095_v22 = vcombine.high %v595_v14, %v599_v17  ;;  %v646_v5 = vld [vmem:[#allocation6 + $0x728] sm:$0xff]  ;;  %v643_v6 = vld [vmem:[#allocation6 + $0x710] sm:$0xff] }
 0x1aa   :  { %2108 = vmatpush1.bf16.msra.mxu1 %v6036_v26  ;;  %2190 = vmatpush1.bf16.msra.mxu0 %v6038_v27  ;;  %v607_v26 = vld [vmem:[#allocation6 + $0x5f0] sm:$0xff]  ;;  %v6092_v27 = vcombine.low %v594_v12, %v598_v13  ;;  %v650_v13 = vld [vmem:[#allocation6 + $0x748] sm:$0xff] }
 0x1ab   :  { %2118 = vmatprep.subr.bf16.mxu1 %v6045_v28  ;;  %2200 = vmatprep.subr.bf16.mxu0 %v6047_v29  ;;  %v6094_v28 = vcombine.low %v595_v14, %v599_v17  ;;  %v6101_v29 = vcombine.high %v602_v23, %v606_v24  ;;  %v6103_v30 = vcombine.high %v603_v25, %v607_v26  ;;  %v654_v14 = vld [vmem:[#allocation6 + $0x768] sm:$0xff]  ;;  %v651_v17 = vld [vmem:[#allocation6 + $0x750] sm:$0xff] }
 0x1ad   :  { %2110 = vmatmul.mubr.bf16.vlgmr.msra.gmra.mrb[8].mxu1 %v7790_v19  ;;  %2192 = vmatmul.mubr.bf16.vlgmr.msra.gmra.mrb[8].mxu0 %v7790_v19 }
 0x1ae   :  { %2119 = vmatpush1.bf16.msra.mxu1 %v6044_v34  ;;  %2150 = vmatprep.mubr.bf16.mxu1 %v7788_v16  ;;  %v615_v34 = vld [vmem:[#allocation6 + $0x630] sm:$0xff] }
 0x1af   :  { %2201 = vmatpush1.bf16.msra.mxu0 %v6046_v35  ;;  %2232 = vmatprep.mubr.bf16.mxu0 %v7788_v16  ;;  %v6100_v35 = vcombine.low %v602_v23, %v606_v24  ;;  %v6111_v38 = vcombine.high %v611_v33, %v615_v34  ;;  %v658_v24 = vld [vmem:[#allocation6 + $0x788] sm:$0xff] }
 0x1b0   :  { %2120 = vmatprep.subr.bf16.mxu1 %v6053_v36  ;;  %2202 = vmatprep.subr.bf16.mxu0 %v6055_v37  ;;  %v6102_v36 = vcombine.low %v603_v25, %v607_v26  ;;  %v6109_v37 = vcombine.high %v610_v31, %v614_v32  ;;  %v662_v25 = vld [vmem:[#allocation6 + $0x7a8] sm:$0xff]  ;;  %v659_v26 = vld [vmem:[#allocation6 + $0x790] sm:$0xff] }
 0x1b2   :  { %2121 = vmatpush1.bf16.msra.mxu1 %v6052_v42  ;;  %v623_v42 = vld [vmem:[#allocation6 + $0x670] sm:$0xff] }
 0x1b3   :  { %2203 = vmatpush1.bf16.msra.mxu0 %v6054_v43  ;;  %2122 = vmatprep.subr.bf16.mxu1 %v6061_v45  ;;  %v6108_v43 = vcombine.low %v610_v31, %v614_v32  ;;  %v6110_v45 = vcombine.low %v611_v33, %v615_v34  ;;  %v6119_v51 = vcombine.high %v619_v41, %v623_v42  ;;  %v666_v32 = vld [vmem:[#allocation6 + $0x7c8] sm:$0xff]  ;;  %v667_v34 = vld [vmem:[#allocation6 + $0x7d0] sm:$0xff] }
 0x1b4   :  { %2204 = vmatprep.subr.bf16.mxu0 %v6063_v50  ;;  %v6117_v50 = vcombine.high %v618_v39, %v622_v40  ;;  %v670_v33 = vld [vmem:[#allocation6 + $0x7e8] sm:$0xff] }
 0x1b6   :  { %2123 = vmatpush1.bf16.msra.mxu1 %v6060_v55  ;;  %v631_v55 = vld [vmem:[#allocation6 + $0x6b0] sm:$0xff] }
 0x1b7   :  { %2205 = vmatpush1.bf16.msra.mxu0 %v6062_v56  ;;  %2124 = vmatprep.subr.bf16.mxu1 %v6069_v57  ;;  %v6116_v56 = vcombine.low %v618_v39, %v622_v40  ;;  %v6118_v57 = vcombine.low %v619_v41, %v623_v42  ;;  %v6127_v59 = vcombine.high %v627_v54, %v631_v55  ;;  %v420_v40 = vld [vmem:[#allocation6 + $0x18] sm:$0xff] }
 0x1b8   :  { %2206 = vmatprep.subr.bf16.mxu0 %v6071_v58  ;;  %v6125_v58 = vcombine.high %v626_v52, %v630_v53  ;;  %v424_v41 = vld [vmem:[#allocation6 + $0x38] sm:$0xff]  ;;  %v6164_v42 = vcombine.low %v666_v32, %v670_v33 }
 0x1ba   :  { %2125 = vmatpush1.bf16.msra.mxu1 %v6068_v63  ;;  %v639_v63 = vld [vmem:[#allocation6 + $0x6f0] sm:$0xff] }
 0x1bb   :  { %2207 = vmatpush1.bf16.msra.mxu0 %v6070_v0  ;;  %2126 = vmatprep.subr.bf16.mxu1 %v6077_v1  ;;  %v6124_v0 = vcombine.low %v626_v52, %v630_v53  ;;  %v6126_v1 = vcombine.low %v627_v54, %v631_v55  ;;  %v6135_v3 = vcombine.high %v635_v62, %v639_v63  ;;  %v6833_v52 = vld [vmem:[#allocation9 + $0x4] ss:$28 sps:$4 sm:$0xff]   ;;  %v436_v55 = vld [vmem:[#allocation6 + $0x98] sm:$0xff] }
 0x1bc   :  { %2208 = vmatprep.subr.bf16.mxu0 %v6079_v2  ;;  %v6133_v2 = vcombine.high %v634_v60, %v638_v61  ;;  %v5920_v53 = vcombine.low %v420_v40, %v424_v41 }
 0x1be   :  { %2127 = vmatpush1.bf16.msra.mxu1 %v6076_v7  ;;  %v647_v7 = vld [vmem:[#allocation6 + $0x730] sm:$0xff] }
 0x1bf   :  { %2209 = vmatpush1.bf16.msra.mxu0 %v6078_v8  ;;  %2128 = vmatprep.subr.bf16.mxu1 %v6085_v9  ;;  %v6132_v8 = vcombine.low %v634_v60, %v638_v61  ;;  %v6134_v9 = vcombine.low %v635_v62, %v639_v63  ;;  %v6143_v12 = vcombine.high %v643_v6, %v647_v7  ;;  %v444_v61 = vld [vmem:[#allocation6 + $0xd8] sm:$0xff] }
 0x1c0   :  { %2210 = vmatprep.subr.bf16.mxu0 %v6087_v10  ;;  %v6141_v10 = vcombine.high %v642_v4, %v646_v5  ;;  %v448_v62 = vld [vmem:[#allocation6 + $0xf8] sm:$0xff] }
 0x1c1   :  { %v6834_v63 = vld [vmem:[#allocation9 + $0x38] ss:$28 sps:$4 sm:$0xff]  }
 0x1c2   :  { %2129 = vmatpush1.bf16.msra.mxu1 %v6084_v18  ;;  %v655_v18 = vld [vmem:[#allocation6 + $0x770] sm:$0xff] }
 0x1c3   :  { %2211 = vmatpush1.bf16.msra.mxu0 %v6086_v20  ;;  %2130 = vmatprep.subr.bf16.mxu1 %v6093_v21  ;;  %v6140_v20 = vcombine.low %v642_v4, %v646_v5  ;;  %v6142_v21 = vcombine.low %v643_v6, %v647_v7  ;;  %v6151_v23 = vcombine.high %v651_v17, %v655_v18  ;;  %v456_v4 = vld [vmem:[#allocation6 + $0x138] sm:$0xff]  ;;  %v6842_v6 = vld [vmem:[#allocation9 + $0xac] ss:$28 sps:$4 sm:$0xff]  }
 0x1c4   :  { %2212 = vmatprep.subr.bf16.mxu0 %v6095_v22  ;;  %v6149_v22 = vcombine.high %v650_v13, %v654_v14  ;;  %v6837_v5 = vld [vmem:[#allocation9 + $0x70] ss:$28 sps:$4 sm:$0xff]  }
 0x1c6   :  { %2131 = vmatpush1.bf16.msra.mxu1 %v6092_v27  ;;  %v663_v27 = vld [vmem:[#allocation6 + $0x7b0] sm:$0xff] }
 0x1c7   :  { %2213 = vmatpush1.bf16.msra.mxu0 %v6094_v28  ;;  %2132 = vmatprep.subr.bf16.mxu1 %v6101_v29  ;;  %v6148_v28 = vcombine.low %v650_v13, %v654_v14  ;;  %v6150_v29 = vcombine.low %v651_v17, %v655_v18  ;;  %v6159_v31 = vcombine.high %v659_v26, %v663_v27  ;;  %v468_v17 = vld [vmem:[#allocation6 + $0x198] sm:$0xff] }
 0x1c8   :  { %2214 = vmatprep.subr.bf16.mxu0 %v6103_v30  ;;  %v6157_v30 = vcombine.high %v658_v24, %v662_v25  ;;  %v472_v18 = vld [vmem:[#allocation6 + $0x1b8] sm:$0xff] }
 0x1ca   :  { %2133 = vmatpush1.bf16.msra.mxu1 %v6100_v35  ;;  %v671_v35 = vld [vmem:[#allocation6 + $0x7f0] sm:$0xff] }
 0x1cb   :  { %2215 = vmatpush1.bf16.msra.mxu0 %v6102_v36  ;;  %2134 = vmatprep.subr.bf16.mxu1 %v6109_v37  ;;  %v6156_v36 = vcombine.low %v658_v24, %v662_v25  ;;  %v6158_v37 = vcombine.low %v659_v26, %v663_v27  ;;  %v6167_v39 = vcombine.high %v667_v34, %v671_v35  ;;  %v476_v24 = vld [vmem:[#allocation6 + $0x1d8] sm:$0xff] }
 0x1cc   :  { %2216 = vmatprep.subr.bf16.mxu0 %v6111_v38  ;;  %v6165_v38 = vcombine.high %v666_v32, %v670_v33  ;;  %v480_v25 = vld [vmem:[#allocation6 + $0x1f8] sm:$0xff]  ;;  %v6854_v33 = vld [vmem:[#allocation9 + $0x18c] ss:$28 sps:$4 sm:$0xff]  }
 0x1cd   :  { %v6846_v26 = vld [vmem:[#allocation9 + $0x118] ss:$28 sps:$4 sm:$0xff]   ;;  %v6849_v32 = vld [vmem:[#allocation9 + $0x150] ss:$28 sps:$4 sm:$0xff]  }
 0x1ce   :  { %2135 = vmatpush1.bf16.msra.mxu1 %v6108_v43  ;;  %v6166_v43 = vcombine.low %v667_v34, %v671_v35  ;;  %v6851_v27 = vld [vmem:[#allocation9 + $0x154] ss:$28 sps:$4 sm:$0xff]   ;;  %v5976_v34 = vcombine.low %v476_v24, %v480_v25 }
 0x1cf   :  { %2217 = vmatpush1.bf16.msra.mxu0 %v6110_v45  ;;  %2136 = vmatprep.subr.bf16.mxu1 %v6117_v50  ;;  %v5921_v45 = vcombine.high %v420_v40, %v424_v41  ;;  %v428_v50 = vld [vmem:[#allocation6 + $0x58] sm:$0xff] }
 0x1d0   :  { %2218 = vmatprep.subr.bf16.mxu0 %v6119_v51  ;;  %v432_v51 = vld [vmem:[#allocation6 + $0x78] sm:$0xff] }
 0x1d1   :  { %v5929_v54 = vcombine.high %v428_v50, %v432_v51 }
 0x1d2   :  { %2137 = vmatpush1.bf16.msra.mxu1 %v6116_v56  ;;  %v440_v56 = vld [vmem:[#allocation6 + $0xb8] sm:$0xff] }
 0x1d3   :  { %2219 = vmatpush1.bf16.msra.mxu0 %v6118_v57  ;;  %2138 = vmatprep.subr.bf16.mxu1 %v6125_v58  ;;  %v6831_v57 = vld [vmem:[#allocation9] ss:$28 sps:$4 sm:$0xff]   ;;  %v5937_v60 = vcombine.high %v436_v55, %v440_v56 }
 0x1d4   :  { %2220 = vmatprep.subr.bf16.mxu0 %v6127_v59  ;;  %v6836_v58 = vld [vmem:[#allocation9 + $0x3c] ss:$28 sps:$4 sm:$0xff]   ;;  %v5928_v59 = vcombine.low %v428_v50, %v432_v51 }
 0x1d5   :  { %v6860_v50 = vld [vmem:[#allocation9 + $0x1fc] ss:$28 sps:$4 sm:$0xff]  }
 0x1d6   :  { %2139 = vmatpush1.bf16.msra.mxu1 %v6124_v0  ;;  %v6839_v0 = vld [vmem:[#allocation9 + $0x74] ss:$28 sps:$4 sm:$0xff]  }
 0x1d7   :  { %2221 = vmatpush1.bf16.msra.mxu0 %v6126_v1  ;;  %2140 = vmatprep.subr.bf16.mxu1 %v6133_v2  ;;  %v5936_v1 = vcombine.low %v436_v55, %v440_v56  ;;  %v5945_v2 = vcombine.high %v444_v61, %v448_v62  ;;  %v6858_v55 = vld [vmem:[#allocation9 + $0x1f8] ss:$28 sps:$4 sm:$0xff]  }
 0x1d8   :  { %2222 = vmatprep.subr.bf16.mxu0 %v6135_v3  ;;  %v452_v3 = vld [vmem:[#allocation6 + $0x118] sm:$0xff] }
 0x1d9   :  { %v5953_v7 = vcombine.high %v452_v3, %v456_v4  ;;  %v5952_v13 = vcombine.low %v452_v3, %v456_v4  ;;  %v6863_v56 = vld [vmem:[#allocation9 + $0x234] ss:$28 sps:$4 sm:$0xff]   ;;  %v6864_v3 = vld [vmem:[#allocation9 + $0x268] ss:$28 sps:$4 sm:$0xff]  }
 0x1da   :  { %2141 = vmatpush1.bf16.msra.mxu1 %v6132_v8  ;;  %v460_v8 = vld [vmem:[#allocation6 + $0x158] sm:$0xff]  ;;  %v6869_v4 = vld [vmem:[#allocation9 + $0x2a4] ss:$28 sps:$4 sm:$0xff]  }
 0x1db   :  { %2223 = vmatpush1.bf16.msra.mxu0 %v6134_v9  ;;  %2142 = vmatprep.subr.bf16.mxu1 %v6141_v10  ;;  %v464_v9 = vld [vmem:[#allocation6 + $0x178] sm:$0xff]  ;;  %v6840_v10 = vld [vmem:[#allocation9 + $0xa8] ss:$28 sps:$4 sm:$0xff]  }
 0x1dc   :  { %2224 = vmatprep.subr.bf16.mxu0 %v6143_v12  ;;  %v6845_v12 = vld [vmem:[#allocation9 + $0xe4] ss:$28 sps:$4 sm:$0xff]   ;;  %v5961_v14 = vcombine.high %v460_v8, %v464_v9 }
 0x1de   :  { %2143 = vmatpush1.bf16.msra.mxu1 %v6140_v20  ;;  %v6843_v20 = vld [vmem:[#allocation9 + $0xe0] ss:$28 sps:$4 sm:$0xff]  }
 0x1df   :  { %2225 = vmatpush1.bf16.msra.mxu0 %v6142_v21  ;;  %2144 = vmatprep.subr.bf16.mxu1 %v6149_v22  ;;  %v6848_v21 = vld [vmem:[#allocation9 + $0x11c] ss:$28 sps:$4 sm:$0xff]   ;;  %v5960_v22 = vcombine.low %v460_v8, %v464_v9 }
 0x1e0   :  { %2226 = vmatprep.subr.bf16.mxu0 %v6151_v23  ;;  %v5969_v23 = vcombine.high %v468_v17, %v472_v18  ;;  %v6867_v8 = vld [vmem:[#allocation9 + $0x2a0] ss:$28 sps:$4 sm:$0xff]  }
 0x1e1   :  { %v6872_v9 = vld [vmem:[#allocation9 + $0x2dc] ss:$28 sps:$4 sm:$0xff]  }
 0x1e2   :  { %2145 = vmatpush1.bf16.msra.mxu1 %v6148_v28  ;;  %v5968_v28 = vcombine.low %v468_v17, %v472_v18  ;;  %v6870_v17 = vld [vmem:[#allocation9 + $0x2d8] ss:$28 sps:$4 sm:$0xff]  }
 0x1e3   :  { %2227 = vmatpush1.bf16.msra.mxu0 %v6150_v29  ;;  %2146 = vmatprep.subr.bf16.mxu1 %v6157_v30  ;;  %v5977_v29 = vcombine.high %v476_v24, %v480_v25  ;;  %v484_v30 = vld [vmem:[#allocation6 + $0x218] sm:$0xff]  ;;  %v6878_v25 = vld [vmem:[#allocation9 + $0x34c] ss:$28 sps:$4 sm:$0xff]  }
 0x1e4   :  { %2228 = vmatprep.subr.bf16.mxu0 %v6159_v31  ;;  %v488_v31 = vld [vmem:[#allocation6 + $0x238] sm:$0xff] }
 0x1e5   :  { %v5985_v35 = vcombine.high %v484_v30, %v488_v31  ;;  %v5984_v40 = vcombine.low %v484_v30, %v488_v31  ;;  %v6875_v18 = vld [vmem:[#allocation9 + $0x314] ss:$28 sps:$4 sm:$0xff]   ;;  %v6876_v30 = vld [vmem:[#allocation9 + $0x348] ss:$28 sps:$4 sm:$0xff]  }
 0x1e6   :  { %2147 = vmatpush1.bf16.msra.mxu1 %v6156_v36  ;;  %v492_v36 = vld [vmem:[#allocation6 + $0x258] sm:$0xff]  ;;  %v6902_v31 = vld [vmem:[#allocation9 + $0x384] ss:$28 sps:$4 sm:$0xff]  }
 0x1e7   :  { %2229 = vmatpush1.bf16.msra.mxu0 %v6158_v37  ;;  %2148 = vmatprep.subr.bf16.mxu1 %v6165_v38  ;;  %v496_v37 = vld [vmem:[#allocation6 + $0x278] sm:$0xff]  ;;  %v6852_v38 = vld [vmem:[#allocation9 + $0x188] ss:$28 sps:$4 sm:$0xff]  }
 0x1e8   :  { %2230 = vmatprep.subr.bf16.mxu0 %v6167_v39  ;;  %v6857_v39 = vld [vmem:[#allocation9 + $0x1c4] ss:$28 sps:$4 sm:$0xff]   ;;  %v5993_v41 = vcombine.high %v492_v36, %v496_v37  ;;  %v5992_v51 = vcombine.low %v492_v36, %v496_v37  ;;  %v6873_v24 = vld [vmem:[#allocation9 + $0x310] ss:$28 sps:$4 sm:$0xff]  }
 0x1ea   :  { %2149 = vmatpush1.bf16.msra.mxu1 %v6164_v42  ;;  %v500_v42 = vld [vmem:[#allocation6 + $0x298] sm:$0xff] }
 0x1eb   :  { %2231 = vmatpush1.bf16.msra.mxu0 %v6166_v43  ;;  %2241 = vmatprep.subr.bf16.mxu1 %v5921_v45  ;;  %v504_v43 = vld [vmem:[#allocation6 + $0x2b8] sm:$0xff]  ;;  %v6855_v45 = vld [vmem:[#allocation9 + $0x1c0] ss:$28 sps:$4 sm:$0xff]  }
 0x1ec   :  { %5208 = vmatprep.subr.bf16.mxu0 %v6833_v52  ;;  %v6001_v52 = vcombine.high %v500_v42, %v504_v43 }
 0x1ed   :  { %2151 = vmatmul.mubr.bf16.vlgmr.msra.gmra.mrb[8].mxu1 %v7784_v11 }
 0x1ee   :  { %2233 = vmatmul.mubr.bf16.vlgmr.msra.gmra.mrb[8].mxu0 %v7784_v11  ;;  %2242 = vmatpush1.bf16.msra.mxu1 %v5920_v53  ;;  %v508_v53 = vld [vmem:[#allocation6 + $0x2d8] sm:$0xff] }
 0x1ef   :  { %2273 = vmatprep.mubr.bf16.mxu1 %v7786_v15  ;;  %2243 = vmatprep.subr.bf16.mxu1 %v5929_v54  ;;  %v5944_v15 = vcombine.low %v444_v61, %v448_v62  ;;  %v512_v54 = vld [vmem:[#allocation6 + $0x2f8] sm:$0xff]  ;;  %v6866_v62 = vld [vmem:[#allocation9 + $0x26c] ss:$28 sps:$4 sm:$0xff]  }
 0x1f0   :  { %5209 = vmatpush1.bf16.msra.mxu0 %v6831_v57  ;;  %v6000_v57 = vcombine.low %v500_v42, %v504_v43  ;;  %v6861_v61 = vld [vmem:[#allocation9 + $0x230] ss:$28 sps:$4 sm:$0xff]  }
 0x1f1   :  { %5210 = vmatprep.subr.bf16.mxu0 %v6836_v58  ;;  %v6009_v58 = vcombine.high %v508_v53, %v512_v54  ;;  %v580_v42 = vld [vmem:[#allocation6 + $0x518] sm:$0xff] }
 0x1f2   :  { %2244 = vmatpush1.bf16.msra.mxu1 %v5928_v59  ;;  %v516_v59 = vld [vmem:[#allocation6 + $0x318] sm:$0xff] }
 0x1f3   :  { %2245 = vmatprep.subr.bf16.mxu1 %v5937_v60  ;;  %v520_v60 = vld [vmem:[#allocation6 + $0x338] sm:$0xff] }
 0x1f4   :  { %5211 = vmatpush1.bf16.msra.mxu0 %v6834_v63  ;;  %v6008_v63 = vcombine.low %v508_v53, %v512_v54  ;;  %v584_v43 = vld [vmem:[#allocation6 + $0x538] sm:$0xff] }
 0x1f5   :  { %5212 = vmatprep.subr.bf16.mxu0 %v6839_v0  ;;  %v6017_v0 = vcombine.high %v516_v59, %v520_v60  ;;  %v596_v54 = vld [vmem:[#allocation6 + $0x598] sm:$0xff] }
 0x1f6   :  { %2246 = vmatpush1.bf16.msra.mxu1 %v5936_v1  ;;  %v524_v1 = vld [vmem:[#allocation6 + $0x358] sm:$0xff] }
 0x1f7   :  { %2247 = vmatprep.subr.bf16.mxu1 %v5945_v2  ;;  %v528_v2 = vld [vmem:[#allocation6 + $0x378] sm:$0xff] }
 0x1f8   :  { %5213 = vmatpush1.bf16.msra.mxu0 %v6837_v5  ;;  %v6016_v5 = vcombine.low %v516_v59, %v520_v60 }
 0x1f9   :  { %5214 = vmatprep.subr.bf16.mxu0 %v6842_v6  ;;  %v6025_v6 = vcombine.high %v524_v1, %v528_v2 }
 0x1fa   :  { %2248 = vmatpush1.bf16.msra.mxu1 %v5944_v15  ;;  %v532_v15 = vld [vmem:[#allocation6 + $0x398] sm:$0xff] }
 0x1fb   :  { %2249 = vmatprep.subr.bf16.mxu1 %v5953_v7  ;;  %v536_v7 = vld [vmem:[#allocation6 + $0x3b8] sm:$0xff] }
 0x1fc   :  { %5215 = vmatpush1.bf16.msra.mxu0 %v6840_v10  ;;  %v6024_v10 = vcombine.low %v524_v1, %v528_v2 }
 0x1fd   :  { %5216 = vmatprep.subr.bf16.mxu0 %v6845_v12  ;;  %v6033_v12 = vcombine.high %v532_v15, %v536_v7 }
 0x1fe   :  { %2250 = vmatpush1.bf16.msra.mxu1 %v5952_v13  ;;  %v540_v13 = vld [vmem:[#allocation6 + $0x3d8] sm:$0xff] }
 0x1ff   :  { %2251 = vmatprep.subr.bf16.mxu1 %v5961_v14  ;;  %v544_v14 = vld [vmem:[#allocation6 + $0x3f8] sm:$0xff] }
 0x200   :  { %5217 = vmatpush1.bf16.msra.mxu0 %v6843_v20  ;;  %v6032_v20 = vcombine.low %v532_v15, %v536_v7 }
 0x201   :  { %5218 = vmatprep.subr.bf16.mxu0 %v6848_v21  ;;  %v6041_v21 = vcombine.high %v540_v13, %v544_v14 }
 0x202   :  { %2252 = vmatpush1.bf16.msra.mxu1 %v5960_v22  ;;  %v548_v22 = vld [vmem:[#allocation6 + $0x418] sm:$0xff] }
 0x203   :  { %2253 = vmatprep.subr.bf16.mxu1 %v5969_v23  ;;  %v552_v23 = vld [vmem:[#allocation6 + $0x438] sm:$0xff] }
 0x204   :  { %5219 = vmatpush1.bf16.msra.mxu0 %v6846_v26  ;;  %v6040_v26 = vcombine.low %v540_v13, %v544_v14  ;;  %v616_v13 = vld [vmem:[#allocation6 + $0x638] sm:$0xff] }
 0x205   :  { %5220 = vmatprep.subr.bf16.mxu0 %v6851_v27  ;;  %v6049_v27 = vcombine.high %v548_v22, %v552_v23 }
 0x206   :  { %2254 = vmatpush1.bf16.msra.mxu1 %v5968_v28  ;;  %v556_v28 = vld [vmem:[#allocation6 + $0x458] sm:$0xff] }
 0x207   :  { %2255 = vmatprep.subr.bf16.mxu1 %v5977_v29  ;;  %v560_v29 = vld [vmem:[#allocation6 + $0x478] sm:$0xff] }
 0x208   :  { %5221 = vmatpush1.bf16.msra.mxu0 %v6849_v32  ;;  %v6048_v32 = vcombine.low %v548_v22, %v552_v23  ;;  %v6056_v36 = vcombine.low %v556_v28, %v560_v29  ;;  %v620_v23 = vld [vmem:[#allocation6 + $0x658] sm:$0xff] }
 0x209   :  { %5222 = vmatprep.subr.bf16.mxu0 %v6854_v33  ;;  %v6057_v33 = vcombine.high %v556_v28, %v560_v29  ;;  %v6908_v29 = vld [vmem:[#allocation9 + $0x3bc] ss:$28 sps:$4 sm:$0xff]  }
 0x20a   :  { %2256 = vmatpush1.bf16.msra.mxu1 %v5976_v34  ;;  %v564_v34 = vld [vmem:[#allocation6 + $0x498] sm:$0xff] }
 0x20b   :  { %2257 = vmatprep.subr.bf16.mxu1 %v5985_v35  ;;  %v568_v35 = vld [vmem:[#allocation6 + $0x4b8] sm:$0xff] }
 0x20c   :  { %5223 = vmatpush1.bf16.msra.mxu0 %v6852_v38  ;;  %v6065_v37 = vcombine.high %v564_v34, %v568_v35  ;;  %v572_v38 = vld [vmem:[#allocation6 + $0x4d8] sm:$0xff] }
 0x20d   :  { %5224 = vmatprep.subr.bf16.mxu0 %v6857_v39  ;;  %v576_v39 = vld [vmem:[#allocation6 + $0x4f8] sm:$0xff] }
 0x20e   :  { %2258 = vmatpush1.bf16.msra.mxu1 %v5984_v40  ;;  %v6064_v40 = vcombine.low %v564_v34, %v568_v35  ;;  %v6914_v35 = vld [vmem:[#allocation9 + $0x3f4] ss:$28 sps:$4 sm:$0xff]  }
 0x20f   :  { %2259 = vmatprep.subr.bf16.mxu1 %v5993_v41  ;;  %v6073_v41 = vcombine.high %v572_v38, %v576_v39 }
 0x210   :  { %5225 = vmatpush1.bf16.msra.mxu0 %v6855_v45  ;;  %v6072_v45 = vcombine.low %v572_v38, %v576_v39  ;;  %v640_v38 = vld [vmem:[#allocation6 + $0x6f8] sm:$0xff] }
 0x211   :  { %5226 = vmatprep.subr.bf16.mxu0 %v6860_v50  ;;  %v6081_v50 = vcombine.high %v580_v42, %v584_v43  ;;  %v6912_v39 = vld [vmem:[#allocation9 + $0x3f0] ss:$28 sps:$4 sm:$0xff]  }
 0x212   :  { %2260 = vmatpush1.bf16.msra.mxu1 %v5992_v51  ;;  %v592_v51 = vld [vmem:[#allocation6 + $0x578] sm:$0xff] }
 0x213   :  { %2261 = vmatprep.subr.bf16.mxu1 %v6001_v52  ;;  %v6080_v52 = vcombine.low %v580_v42, %v584_v43  ;;  %v644_v43 = vld [vmem:[#allocation6 + $0x718] sm:$0xff] }
 0x214   :  { %5227 = vmatpush1.bf16.msra.mxu0 %v6858_v55  ;;  %v600_v55 = vld [vmem:[#allocation6 + $0x5b8] sm:$0xff] }
 0x215   :  { %5228 = vmatprep.subr.bf16.mxu0 %v6863_v56  ;;  %v6097_v59 = vcombine.high %v596_v54, %v600_v55 }
 0x216   :  { %2262 = vmatpush1.bf16.msra.mxu1 %v6000_v57 }
 0x217   :  { %2263 = vmatprep.subr.bf16.mxu1 %v6009_v58 }
 0x218   :  { %5229 = vmatpush1.bf16.msra.mxu0 %v6861_v61 }
 0x219   :  { %5230 = vmatprep.subr.bf16.mxu0 %v6866_v62  ;;  %v604_v62 = vld [vmem:[#allocation6 + $0x5d8] sm:$0xff] }
 0x21a   :  { %2264 = vmatpush1.bf16.msra.mxu1 %v6008_v63  ;;  %v608_v63 = vld [vmem:[#allocation6 + $0x5f8] sm:$0xff] }
 0x21b   :  { %2265 = vmatprep.subr.bf16.mxu1 %v6017_v0 }
 0x21c   :  { %5231 = vmatpush1.bf16.msra.mxu0 %v6864_v3 }
 0x21d   :  { %5232 = vmatprep.subr.bf16.mxu0 %v6869_v4 }
 0x21e   :  { %2266 = vmatpush1.bf16.msra.mxu1 %v6016_v5  ;;  %v6096_v5 = vcombine.low %v596_v54, %v600_v55  ;;  %v656_v54 = vld [vmem:[#allocation6 + $0x778] sm:$0xff]  ;;  %v6924_v55 = vld [vmem:[#allocation9 + $0x460] ss:$28 sps:$4 sm:$0xff]  }
 0x21f   :  { %2267 = vmatprep.subr.bf16.mxu1 %v6025_v6 }
 0x220   :  { %5233 = vmatpush1.bf16.msra.mxu0 %v6867_v8  ;;  %v6105_v8 = vcombine.high %v604_v62, %v608_v63 }
 0x221   :  { %5234 = vmatprep.subr.bf16.mxu0 %v6872_v9 }
 0x222   :  { %2268 = vmatpush1.bf16.msra.mxu1 %v6024_v10 }
 0x223   :  { %2269 = vmatprep.subr.bf16.mxu1 %v6033_v12  ;;  %v612_v12 = vld [vmem:[#allocation6 + $0x618] sm:$0xff] }
 0x224   :  { %5235 = vmatpush1.bf16.msra.mxu0 %v6870_v17  ;;  %v6112_v28 = vcombine.low %v612_v12, %v616_v13 }
 0x225   :  { %5236 = vmatprep.subr.bf16.mxu0 %v6875_v18  ;;  %v6104_v18 = vcombine.low %v604_v62, %v608_v63  ;;  %v6938_v63 = vld [vmem:[#allocation9 + $0x4d4] ss:$28 sps:$4 sm:$0xff]  }
 0x226   :  { %2270 = vmatpush1.bf16.msra.mxu1 %v6032_v20 }
 0x227   :  { %2271 = vmatprep.subr.bf16.mxu1 %v6041_v21  ;;  %v6113_v21 = vcombine.high %v612_v12, %v616_v13  ;;  %v6879_v12 = vld [vmem:[#allocation9 + $0x8] ss:$28 sps:$4 sm:$0xff]  }
 0x228   :  { %5237 = vmatpush1.bf16.msra.mxu0 %v6873_v24  ;;  %v624_v24 = vld [vmem:[#allocation6 + $0x678] sm:$0xff]  ;;  %v6884_v13 = vld [vmem:[#allocation9 + $0x44] ss:$28 sps:$4 sm:$0xff]  }
 0x229   :  { %5238 = vmatprep.subr.bf16.mxu0 %v6878_v25  ;;  %v6120_v34 = vcombine.low %v620_v23, %v624_v24 }
 0x22a   :  { %2272 = vmatpush1.bf16.msra.mxu1 %v6040_v26  ;;  %v6900_v26 = vld [vmem:[#allocation9 + $0x380] ss:$28 sps:$4 sm:$0xff]  }
 0x22b   :  { %2282 = vmatprep.subr.bf16.mxu1 %v6049_v27 }
 0x22c   :  { %5239 = vmatpush1.bf16.msra.mxu0 %v6876_v30  ;;  %v6121_v30 = vcombine.high %v620_v23, %v624_v24  ;;  %v6885_v23 = vld [vmem:[#allocation9 + $0x78] ss:$28 sps:$4 sm:$0xff]   ;;  %v6968_v24 = vld [vmem:[#allocation9 + $0x5ec] ss:$28 sps:$4 sm:$0xff]  }
 0x22d   :  { %2274 = vmatmul.mubr.bf16.vlgmr.msra.gmra.mrb[12].mxu1 %v7790_v19  ;;  %5249 = vmatprep.subr.bf16.mxu0 %v6902_v31  ;;  %v588_v19 = vld [vmem:[#allocation6 + $0x558] sm:$0xff] }
 0x22e   :  { %2283 = vmatpush1.bf16.msra.mxu1 %v6048_v32  ;;  %2314 = vmatprep.mubr.bf16.mxu1 %v7788_v16  ;;  %v7807_v16 = vld [vmem:[#allocation7] sm:$0xff]  ;;  %v6089_v53 = vcombine.high %v588_v19, %v592_v51  ;;  %v6088_v57 = vcombine.low %v588_v19, %v592_v51  ;;  %v628_v31 = vld [vmem:[#allocation6 + $0x698] sm:$0xff]  ;;  %v6926_v51 = vld [vmem:[#allocation9 + $0x464] ss:$28 sps:$4 sm:$0xff]  }
 0x22f   :  { %2284 = vmatprep.subr.bf16.mxu1 %v6057_v33  ;;  %v678_v56 = vrot.slane %v7807_v16, %v7769_v46  ;;  %v682_v58 = vrot.slane %v7807_v16, %v7775_v48  ;;  %v632_v32 = vld [vmem:[#allocation6 + $0x6b8] sm:$0xff] }
 0x230   :  { %v6906_v33 = vld [vmem:[#allocation9 + $0x3b8] ss:$28 sps:$4 sm:$0xff]  }
 0x232   :  { %2285 = vmatpush1.bf16.msra.mxu1 %v6056_v36  ;;  %v6129_v36 = vcombine.high %v628_v31, %v632_v32 }
 0x233   :  { %2286 = vmatprep.subr.bf16.mxu1 %v6065_v37  ;;  %v636_v37 = vld [vmem:[#allocation6 + $0x6d8] sm:$0xff] }
 0x234   :  { %v6137_v42 = vcombine.high %v636_v37, %v640_v38  ;;  %v6136_v19 = vcombine.low %v636_v37, %v640_v38  ;;  %v6986_v37 = vld [vmem:[#allocation9 + $0x694] ss:$28 sps:$4 sm:$0xff]   ;;  %v6899_v38 = vld [vmem:[#allocation9 + $0x15c] ss:$28 sps:$4 sm:$0xff]  }
 0x236   :  { %2287 = vmatpush1.bf16.msra.mxu1 %v6064_v40  ;;  %v6128_v40 = vcombine.low %v628_v31, %v632_v32  ;;  %v6972_v31 = vld [vmem:[#allocation9 + $0x620] ss:$28 sps:$4 sm:$0xff]   ;;  %v6891_v32 = vld [vmem:[#allocation9 + $0xe8] ss:$28 sps:$4 sm:$0xff]  }
 0x237   :  { %2288 = vmatprep.subr.bf16.mxu1 %v6073_v41  ;;  %v6920_v41 = vld [vmem:[#allocation9 + $0x42c] ss:$28 sps:$4 sm:$0xff]  }
 0x23a   :  { %2289 = vmatpush1.bf16.msra.mxu1 %v6072_v45  ;;  %v648_v45 = vld [vmem:[#allocation6 + $0x738] sm:$0xff] }
 0x23b   :  { %2290 = vmatprep.subr.bf16.mxu1 %v6081_v50  ;;  %v6918_v50 = vld [vmem:[#allocation9 + $0x428] ss:$28 sps:$4 sm:$0xff]  }
 0x23e   :  { %2291 = vmatpush1.bf16.msra.mxu1 %v6080_v52  ;;  %v6145_v52 = vcombine.high %v644_v43, %v648_v45 }
 0x23f   :  { %2292 = vmatprep.subr.bf16.mxu1 %v6089_v53  ;;  %v652_v53 = vld [vmem:[#allocation6 + $0x758] sm:$0xff] }
 0x240   :  { %v2029_v60 = vpop.f32.mrb[4].mxu1  ;;  %v2070_v61 = vpop.f32.mrb[4].mxu0  ;;  %v6152_v62 = vcombine.low %v652_v53, %v656_v54 }
 0x241   :  { %v2030_v0 = vadd.f32 %v2029_v60, %v678_v56  ;;  %v2031_v1 = vpop.f32.mrb[5].mxu1  ;;  %v2072_v2 = vpop.f32.mrb[5].mxu0  ;;  %v6144_v56 = vcombine.low %v644_v43, %v648_v45  ;;  %v664_v60 = vld [vmem:[#allocation6 + $0x7b8] sm:$0xff]  ;;  %v6990_v43 = vld [vmem:[#allocation9 + $0x6c8] ss:$28 sps:$4 sm:$0xff]  }
 0x242   :  { %v2032_v3 = vadd.f32 %v2031_v1, %v682_v58  ;;  %2293 = vmatpush1.bf16.msra.mxu1 %v6088_v57  ;;  %v2033_v4 = vpop.f32.mrb[6].mxu1  ;;  %v2074_v6 = vpop.f32.mrb[6].mxu0  ;;  %v6932_v57 = vld [vmem:[#allocation9 + $0x49c] ss:$28 sps:$4 sm:$0xff]   ;;  %v6153_v58 = vcombine.high %v652_v53, %v656_v54  ;;  %v668_v1 = vld [vmem:[#allocation6 + $0x7d8] sm:$0xff] }
 0x243   :  { %v2071_v15 = vadd.f32 %v2070_v61, %v2030_v0  ;;  %v2034_v7 = vpop.f32.mrb[7].mxu1  ;;  %2294 = vmatprep.subr.bf16.mxu1 %v6097_v59  ;;  %v2075_v9 = vpop.f32.mrb[7].mxu0  ;;  %v660_v59 = vld [vmem:[#allocation6 + $0x798] sm:$0xff]  ;;  %v6915_v53 = vld [vmem:[#allocation9 + $0x200] ss:$28 sps:$4 sm:$0xff]  }
 0x244   :  { %v2073_v10 = vadd.f32 %v2072_v2, %v2032_v3  ;;  %v6930_v61 = vld [vmem:[#allocation9 + $0x498] ss:$28 sps:$4 sm:$0xff]   ;;  %v6161_v0 = vcombine.high %v660_v59, %v664_v60  ;;  %v6936_v3 = vld [vmem:[#allocation9 + $0x4d0] ss:$28 sps:$4 sm:$0xff]   ;;  %v6160_v4 = vcombine.low %v660_v59, %v664_v60  ;;  %v6933_v59 = vld [vmem:[#allocation9 + $0x2a8] ss:$28 sps:$4 sm:$0xff]  }
 0x245   :  { %vm2323_vm4 = vcmp.gt.f32.partialorder %v2071_v15, 0.0  ;;  %v2331_v14 = vmul.f32 0.2, %v2071_v15  ;;  %v672_v2 = vld [vmem:[#allocation6 + $0x7f8] sm:$0xff]  ;;  %v6881_v9 = vld [vmem:[#allocation9 + $0xc] ss:$28 sps:$4 sm:$0xff]  }
 0x246   :  { %vm2324_vm5 = vcmp.gt.f32.partialorder %v2073_v10, 0.0  ;;  %v2332_v17 = vmul.f32 0.2, %v2073_v10  ;;  %2295 = vmatpush1.bf16.msra.mxu1 %v6096_v5  ;;  %v6944_v5 = vld [vmem:[#allocation9 + $0x50c] ss:$28 sps:$4 sm:$0xff]   ;;  %v6169_v6 = vcombine.high %v668_v1, %v672_v2  ;;  %v6168_v7 = vcombine.low %v668_v1, %v672_v2 }
 0x247   :  { %v2339_v20 = vsel %vm2323_vm4, %v2071_v15, %v2331_v14  ;;  %2296 = vmatprep.subr.bf16.mxu1 %v6105_v8  ;;  %v6942_v15 = vld [vmem:[#allocation9 + $0x508] ss:$28 sps:$4 sm:$0xff]   ;;  %v6956_v14 = vld [vmem:[#allocation9 + $0x57c] ss:$28 sps:$4 sm:$0xff]   ;;  %v6903_v45 = vld [vmem:[#allocation9 + $0x190] ss:$28 sps:$4 sm:$0xff]  }
 0x248   :  { %v2340_v22 = vsel %vm2324_vm5, %v2073_v10, %v2332_v17  ;;  %v7815_v27 = vpack.c.bf16 %v2339_v20, %v2339_v20  ;;  %v6950_v8 = vld [vmem:[#allocation9 + $0x544] ss:$28 sps:$4 sm:$0xff]   ;;  %v6954_v17 = vld [vmem:[#allocation9 + $0x578] ss:$28 sps:$4 sm:$0xff]   ;;  %v6951_v1 = vld [vmem:[#allocation9 + $0x350] ss:$28 sps:$4 sm:$0xff]  }
 0x249   :  { %v7813_v25 = vpack.c.bf16 %v2340_v22, %v2340_v22  ;;  %v6948_v10 = vld [vmem:[#allocation9 + $0x540] ss:$28 sps:$4 sm:$0xff]   ;;  %v6962_v20 = vld [vmem:[#allocation9 + $0x5b4] ss:$28 sps:$4 sm:$0xff]   ;;  %v6959_v2 = vld [vmem:[#allocation9 + $0x38c] ss:$28 sps:$4 sm:$0xff]  }
 0x24a   :  { %2297 = vmatpush1.bf16.msra.mxu1 %v6104_v18  ;;  %v6882_v18 = vld [vmem:[#allocation9 + $0x40] ss:$28 sps:$4 sm:$0xff]   ;;  %v6960_v22 = vld [vmem:[#allocation9 + $0x5b0] ss:$28 sps:$4 sm:$0xff]  }
 0x24b   :  { %5240 = vmatprep.mubr.bf16.mxu0 %v7813_v25  ;;  %2298 = vmatprep.subr.bf16.mxu1 %v6113_v21  ;;  %v6887_v21 = vld [vmem:[#allocation9 + $0x7c] ss:$28 sps:$4 sm:$0xff]   ;;  %v6941_v60 = vld [vmem:[#allocation9 + $0x2e4] ss:$28 sps:$4 sm:$0xff]  }
 0x24c   :  { %5241 = vmatmul.mubr.bf16.vlgmr.msra.gmra.mrb[12].mxu0 %v7815_v27  ;;  %v6923_v54 = vld [vmem:[#allocation9 + $0x23c] ss:$28 sps:$4 sm:$0xff]  }
 0x24d   :  { %5250 = vmatpush1.bf16.msra.mxu0 %v6900_v26  ;;  %v6890_v26 = vld [vmem:[#allocation9 + $0xb4] ss:$28 sps:$4 sm:$0xff]  }
 0x24e   :  { %2299 = vmatpush1.bf16.msra.mxu1 %v6112_v28  ;;  %5251 = vmatprep.subr.bf16.mxu0 %v6908_v29  ;;  %v6888_v28 = vld [vmem:[#allocation9 + $0xb0] ss:$28 sps:$4 sm:$0xff]   ;;  %v6974_v29 = vld [vmem:[#allocation9 + $0x624] ss:$28 sps:$4 sm:$0xff]  }
 0x24f   :  { %2300 = vmatprep.subr.bf16.mxu1 %v6121_v30  ;;  %v6893_v30 = vld [vmem:[#allocation9 + $0xec] ss:$28 sps:$4 sm:$0xff]  }
 0x251   :  { %5252 = vmatpush1.bf16.msra.mxu0 %v6906_v33  ;;  %v6980_v33 = vld [vmem:[#allocation9 + $0x65c] ss:$28 sps:$4 sm:$0xff]  }
 0x252   :  { %2301 = vmatpush1.bf16.msra.mxu1 %v6120_v34  ;;  %5253 = vmatprep.subr.bf16.mxu0 %v6914_v35  ;;  %v6896_v34 = vld [vmem:[#allocation9 + $0x124] ss:$28 sps:$4 sm:$0xff]   ;;  %v6978_v35 = vld [vmem:[#allocation9 + $0x658] ss:$28 sps:$4 sm:$0xff]  }
 0x253   :  { %2302 = vmatprep.subr.bf16.mxu1 %v6129_v36  ;;  %v6894_v36 = vld [vmem:[#allocation9 + $0x120] ss:$28 sps:$4 sm:$0xff]  }
 0x255   :  { %5254 = vmatpush1.bf16.msra.mxu0 %v6912_v39  ;;  %v6984_v39 = vld [vmem:[#allocation9 + $0x690] ss:$28 sps:$4 sm:$0xff]  }
 0x256   :  { %2303 = vmatpush1.bf16.msra.mxu1 %v6128_v40  ;;  %5255 = vmatprep.subr.bf16.mxu0 %v6920_v41  ;;  %v6897_v40 = vld [vmem:[#allocation9 + $0x158] ss:$28 sps:$4 sm:$0xff]   ;;  %v6992_v41 = vld [vmem:[#allocation9 + $0x6cc] ss:$28 sps:$4 sm:$0xff]  }
 0x257   :  { %2304 = vmatprep.subr.bf16.mxu1 %v6137_v42  ;;  %v6905_v42 = vld [vmem:[#allocation9 + $0x194] ss:$28 sps:$4 sm:$0xff]  }
 0x259   :  { %5256 = vmatpush1.bf16.msra.mxu0 %v6918_v50  ;;  %v6998_v50 = vld [vmem:[#allocation9 + $0x704] ss:$28 sps:$4 sm:$0xff]  }
 0x25a   :  { %2305 = vmatpush1.bf16.msra.mxu1 %v6136_v19  ;;  %5257 = vmatprep.subr.bf16.mxu0 %v6926_v51  ;;  %v6911_v19 = vld [vmem:[#allocation9 + $0x1cc] ss:$28 sps:$4 sm:$0xff]  }
 0x25b   :  { %2306 = vmatprep.subr.bf16.mxu1 %v6145_v52  ;;  %v6909_v51 = vld [vmem:[#allocation9 + $0x1c8] ss:$28 sps:$4 sm:$0xff]  }
 0x25c   :  { %v6917_v52 = vld [vmem:[#allocation9 + $0x204] ss:$28 sps:$4 sm:$0xff]  }
 0x25d   :  { %5258 = vmatpush1.bf16.msra.mxu0 %v6924_v55  ;;  %v6921_v55 = vld [vmem:[#allocation9 + $0x238] ss:$28 sps:$4 sm:$0xff]  }
 0x25e   :  { %2307 = vmatpush1.bf16.msra.mxu1 %v6144_v56  ;;  %5259 = vmatprep.subr.bf16.mxu0 %v6932_v57  ;;  %v6929_v56 = vld [vmem:[#allocation9 + $0x274] ss:$28 sps:$4 sm:$0xff]  }
 0x25f   :  { %2308 = vmatprep.subr.bf16.mxu1 %v6153_v58  ;;  %v6927_v57 = vld [vmem:[#allocation9 + $0x270] ss:$28 sps:$4 sm:$0xff]  }
 0x260   :  { %v6935_v58 = vld [vmem:[#allocation9 + $0x2ac] ss:$28 sps:$4 sm:$0xff]  }
 0x261   :  { %5260 = vmatpush1.bf16.msra.mxu0 %v6930_v61  ;;  %v6939_v61 = vld [vmem:[#allocation9 + $0x2e0] ss:$28 sps:$4 sm:$0xff]  }
 0x262   :  { %2309 = vmatpush1.bf16.msra.mxu1 %v6152_v62  ;;  %5261 = vmatprep.subr.bf16.mxu0 %v6938_v63  ;;  %v6947_v62 = vld [vmem:[#allocation9 + $0x31c] ss:$28 sps:$4 sm:$0xff]  }
 0x263   :  { %2310 = vmatprep.subr.bf16.mxu1 %v6161_v0  ;;  %v6945_v63 = vld [vmem:[#allocation9 + $0x318] ss:$28 sps:$4 sm:$0xff]  }
 0x264   :  { %v6953_v0 = vld [vmem:[#allocation9 + $0x354] ss:$28 sps:$4 sm:$0xff]  }
 0x265   :  { %5262 = vmatpush1.bf16.msra.mxu0 %v6936_v3  ;;  %v6957_v3 = vld [vmem:[#allocation9 + $0x388] ss:$28 sps:$4 sm:$0xff]  }
 0x266   :  { %2311 = vmatpush1.bf16.msra.mxu1 %v6160_v4  ;;  %5263 = vmatprep.subr.bf16.mxu0 %v6944_v5  ;;  %v6965_v4 = vld [vmem:[#allocation9 + $0x3c4] ss:$28 sps:$4 sm:$0xff]  }
 0x267   :  { %2312 = vmatprep.subr.bf16.mxu1 %v6169_v6  ;;  %v6963_v5 = vld [vmem:[#allocation9 + $0x3c0] ss:$28 sps:$4 sm:$0xff]  }
 0x268   :  { %v6971_v6 = vld [vmem:[#allocation9 + $0x3fc] ss:$28 sps:$4 sm:$0xff]  }
 0x269   :  { %5264 = vmatpush1.bf16.msra.mxu0 %v6942_v15  ;;  %v6969_v15 = vld [vmem:[#allocation9 + $0x3f8] ss:$28 sps:$4 sm:$0xff]  }
 0x26a   :  { %2313 = vmatpush1.bf16.msra.mxu1 %v6168_v7  ;;  %5265 = vmatprep.subr.bf16.mxu0 %v6950_v8  ;;  %v6977_v7 = vld [vmem:[#allocation9 + $0x434] ss:$28 sps:$4 sm:$0xff]  }
 0x26b   :  { %5372 = vmatprep.subr.bf16.mxu1 %v6881_v9  ;;  %v6975_v8 = vld [vmem:[#allocation9 + $0x430] ss:$28 sps:$4 sm:$0xff]  }
 0x26c   :  { %v6983_v9 = vld [vmem:[#allocation9 + $0x46c] ss:$28 sps:$4 sm:$0xff]  }
 0x26d   :  { %2315 = vmatmul.mubr.bf16.vlgmr.msra.gmra.mrb[12].mxu1 %v7784_v11  ;;  %5266 = vmatpush1.bf16.msra.mxu0 %v6948_v10  ;;  %v6966_v11 = vld [vmem:[#allocation9 + $0x5e8] ss:$28 sps:$4 sm:$0xff]  }
 0x26e   :  { %5373 = vmatpush1.bf16.msra.mxu1 %v6879_v12  ;;  %5404 = vmatprep.mubr.bf16.mxu1 %v7813_v25  ;;  %v6981_v10 = vld [vmem:[#allocation9 + $0x468] ss:$28 sps:$4 sm:$0xff]   ;;  %v697_v12 = vsub.s32 5, %v7766_v44 }
 0x26f   :  { %5374 = vmatprep.subr.bf16.mxu1 %v6884_v13  ;;  %5267 = vmatprep.subr.bf16.mxu0 %v6956_v14  ;;  %v6989_v13 = vld [vmem:[#allocation9 + $0x4a4] ss:$28 sps:$4 sm:$0xff]   ;;  %v686_v14 = vrot.slane %v7807_v16, %v7772_v47 }
 0x271   :  { %5268 = vmatpush1.bf16.msra.mxu0 %v6954_v17  ;;  %v690_v17 = vrot.slane %v7807_v16, %v7778_v49 }
 0x272   :  { %5375 = vmatpush1.bf16.msra.mxu1 %v6882_v18  ;;  %5269 = vmatprep.subr.bf16.mxu0 %v6962_v20  ;;  %v6987_v18 = vld [vmem:[#allocation9 + $0x4a0] ss:$28 sps:$4 sm:$0xff]   ;;  %v698_v20 = vrot.slane %v7807_v16, %v697_v12 }
 0x273   :  { %5376 = vmatprep.subr.bf16.mxu1 %v6887_v21  ;;  %v6995_v21 = vld [vmem:[#allocation9 + $0x4dc] ss:$28 sps:$4 sm:$0xff]  }
 0x275   :  { %5270 = vmatpush1.bf16.msra.mxu0 %v6960_v22 }
 0x276   :  { %5377 = vmatpush1.bf16.msra.mxu1 %v6885_v23  ;;  %5271 = vmatprep.subr.bf16.mxu0 %v6968_v24 }
 0x277   :  { %5378 = vmatprep.subr.bf16.mxu1 %v6890_v26 }
 0x279   :  { %5272 = vmatpush1.bf16.msra.mxu0 %v6966_v11 }
 0x27a   :  { %5379 = vmatpush1.bf16.msra.mxu1 %v6888_v28  ;;  %5273 = vmatprep.subr.bf16.mxu0 %v6974_v29 }
 0x27b   :  { %5380 = vmatprep.subr.bf16.mxu1 %v6893_v30  ;;  %v6993_v30 = vld [vmem:[#allocation9 + $0x4d8] ss:$28 sps:$4 sm:$0xff]  }
 0x27d   :  { %5274 = vmatpush1.bf16.msra.mxu0 %v6972_v31  ;;  %v7001_v31 = vld [vmem:[#allocation9 + $0x514] ss:$28 sps:$4 sm:$0xff]  }
 0x27e   :  { %5381 = vmatpush1.bf16.msra.mxu1 %v6891_v32  ;;  %5275 = vmatprep.subr.bf16.mxu0 %v6980_v33 }
 0x27f   :  { %5382 = vmatprep.subr.bf16.mxu1 %v6896_v34 }
 0x281   :  { %5276 = vmatpush1.bf16.msra.mxu0 %v6978_v35 }
 0x282   :  { %5383 = vmatpush1.bf16.msra.mxu1 %v6894_v36  ;;  %5277 = vmatprep.subr.bf16.mxu0 %v6986_v37 }
 0x283   :  { %5384 = vmatprep.subr.bf16.mxu1 %v6899_v38 }
 0x285   :  { %5278 = vmatpush1.bf16.msra.mxu0 %v6984_v39 }
 0x286   :  { %5385 = vmatpush1.bf16.msra.mxu1 %v6897_v40  ;;  %5279 = vmatprep.subr.bf16.mxu0 %v6992_v41  ;;  %v6999_v41 = vld [vmem:[#allocation9 + $0x510] ss:$28 sps:$4 sm:$0xff]  }
 0x287   :  { %5386 = vmatprep.subr.bf16.mxu1 %v6905_v42 }
 0x289   :  { %5280 = vmatpush1.bf16.msra.mxu0 %v6990_v43 }
 0x28a   :  { %5387 = vmatpush1.bf16.msra.mxu1 %v6903_v45  ;;  %5290 = vmatprep.subr.bf16.mxu0 %v6998_v50  ;;  %v6996_v45 = vld [vmem:[#allocation9 + $0x700] ss:$28 sps:$4 sm:$0xff]  }
 0x28b   :  { %5388 = vmatprep.subr.bf16.mxu1 %v6911_v19  ;;  %v7004_v19 = vld [vmem:[#allocation9 + $0x73c] ss:$28 sps:$4 sm:$0xff]  }
 0x28e   :  { %5389 = vmatpush1.bf16.msra.mxu1 %v6909_v51  ;;  %v7007_v51 = vld [vmem:[#allocation9 + $0x54c] ss:$28 sps:$4 sm:$0xff]  }
 0x28f   :  { %5390 = vmatprep.subr.bf16.mxu1 %v6917_v52 }
 0x292   :  { %5391 = vmatpush1.bf16.msra.mxu1 %v6915_v53  ;;  %v7005_v53 = vld [vmem:[#allocation9 + $0x548] ss:$28 sps:$4 sm:$0xff]  }
 0x293   :  { %5392 = vmatprep.subr.bf16.mxu1 %v6923_v54  ;;  %v7002_v54 = vld [vmem:[#allocation9 + $0x738] ss:$28 sps:$4 sm:$0xff]  }
 0x296   :  { %5393 = vmatpush1.bf16.msra.mxu1 %v6921_v55  ;;  %v7013_v55 = vld [vmem:[#allocation9 + $0x584] ss:$28 sps:$4 sm:$0xff]  }
 0x297   :  { %5394 = vmatprep.subr.bf16.mxu1 %v6929_v56  ;;  %v7010_v56 = vld [vmem:[#allocation9 + $0x774] ss:$28 sps:$4 sm:$0xff]  }
 0x29a   :  { %5395 = vmatpush1.bf16.msra.mxu1 %v6927_v57  ;;  %v7011_v57 = vld [vmem:[#allocation9 + $0x580] ss:$28 sps:$4 sm:$0xff]  }
 0x29b   :  { %5396 = vmatprep.subr.bf16.mxu1 %v6935_v58  ;;  %v7008_v58 = vld [vmem:[#allocation9 + $0x770] ss:$28 sps:$4 sm:$0xff]  }
 0x29e   :  { %5397 = vmatpush1.bf16.msra.mxu1 %v6933_v59  ;;  %v7019_v59 = vld [vmem:[#allocation9 + $0x5bc] ss:$28 sps:$4 sm:$0xff]  }
 0x29f   :  { %5398 = vmatprep.subr.bf16.mxu1 %v6941_v60  ;;  %v7016_v60 = vld [vmem:[#allocation9 + $0x7ac] ss:$28 sps:$4 sm:$0xff]  }
 0x2a2   :  { %5399 = vmatpush1.bf16.msra.mxu1 %v6939_v61  ;;  %v7017_v61 = vld [vmem:[#allocation9 + $0x5b8] ss:$28 sps:$4 sm:$0xff]  }
 0x2a3   :  { %5400 = vmatprep.subr.bf16.mxu1 %v6947_v62  ;;  %v7014_v62 = vld [vmem:[#allocation9 + $0x7a8] ss:$28 sps:$4 sm:$0xff]  }
 0x2a6   :  { %5401 = vmatpush1.bf16.msra.mxu1 %v6945_v63  ;;  %v7025_v63 = vld [vmem:[#allocation9 + $0x5f4] ss:$28 sps:$4 sm:$0xff]  }
 0x2a7   :  { %5402 = vmatprep.subr.bf16.mxu1 %v6953_v0  ;;  %v7022_v0 = vld [vmem:[#allocation9 + $0x7e4] ss:$28 sps:$4 sm:$0xff]  }
 0x2aa   :  { %5403 = vmatpush1.bf16.msra.mxu1 %v6951_v1  ;;  %v7023_v1 = vld [vmem:[#allocation9 + $0x5f0] ss:$28 sps:$4 sm:$0xff]  }
 0x2ab   :  { %5413 = vmatprep.subr.bf16.mxu1 %v6959_v2  ;;  %v7020_v2 = vld [vmem:[#allocation9 + $0x7e0] ss:$28 sps:$4 sm:$0xff]  }
 0x2ad   :  { %5405 = vmatmul.mubr.bf16.vlgmr.msra.gmra.mrb[16].mxu1 %v7815_v27 }
 0x2ae   :  { %5414 = vmatpush1.bf16.msra.mxu1 %v6957_v3  ;;  %v7031_v3 = vld [vmem:[#allocation9 + $0x62c] ss:$28 sps:$4 sm:$0xff]  }
 0x2af   :  { %5415 = vmatprep.subr.bf16.mxu1 %v6965_v4  ;;  %v7028_v4 = vld [vmem:[#allocation9 + $0x81c] ss:$28 sps:$4 sm:$0xff]  }
 0x2b2   :  { %5416 = vmatpush1.bf16.msra.mxu1 %v6963_v5  ;;  %v7029_v5 = vld [vmem:[#allocation9 + $0x628] ss:$28 sps:$4 sm:$0xff]  }
 0x2b3   :  { %5417 = vmatprep.subr.bf16.mxu1 %v6971_v6  ;;  %v7026_v6 = vld [vmem:[#allocation9 + $0x818] ss:$28 sps:$4 sm:$0xff]  }
 0x2b6   :  { %5418 = vmatpush1.bf16.msra.mxu1 %v6969_v15  ;;  %v7037_v15 = vld [vmem:[#allocation9 + $0x664] ss:$28 sps:$4 sm:$0xff]  }
 0x2b7   :  { %5419 = vmatprep.subr.bf16.mxu1 %v6977_v7  ;;  %v7034_v7 = vld [vmem:[#allocation9 + $0x854] ss:$28 sps:$4 sm:$0xff]  }
 0x2ba   :  { %5420 = vmatpush1.bf16.msra.mxu1 %v6975_v8  ;;  %v7035_v8 = vld [vmem:[#allocation9 + $0x660] ss:$28 sps:$4 sm:$0xff]  }
 0x2bb   :  { %5421 = vmatprep.subr.bf16.mxu1 %v6983_v9  ;;  %v7032_v9 = vld [vmem:[#allocation9 + $0x850] ss:$28 sps:$4 sm:$0xff]  }
 0x2be   :  { %5422 = vmatpush1.bf16.msra.mxu1 %v6981_v10  ;;  %v7043_v10 = vld [vmem:[#allocation9 + $0x69c] ss:$28 sps:$4 sm:$0xff]  }
 0x2bf   :  { %5423 = vmatprep.subr.bf16.mxu1 %v6989_v13  ;;  %v7040_v13 = vld [vmem:[#allocation9 + $0x88c] ss:$28 sps:$4 sm:$0xff]  }
 0x2c0   :  { %v2152_v22 = vpop.f32.mrb[8].mxu1 }
 0x2c1   :  { %v6710_v23 = vadd.f32 %v2152_v22, %v686_v14  ;;  %v7830_v24 = vpop.f32.mrb[8].mxu0  ;;  %v2154_v26 = vpop.f32.mrb[9].mxu1  ;;  %v7041_v14 = vld [vmem:[#allocation9 + $0x698] ss:$28 sps:$4 sm:$0xff]   ;;  %v7044_v22 = vld [vmem:[#allocation9 + $0x8c0] ss:$28 sps:$4 sm:$0xff]  }
 0x2c2   :  { %v6711_v11 = vadd.f32 %v2154_v26, %v690_v17  ;;  %v2236_v28 = vpop.f32.mrb[9].mxu0  ;;  %v2156_v29 = vpop.f32.mrb[10].mxu1  ;;  %5424 = vmatpush1.bf16.msra.mxu1 %v6987_v18  ;;  %v7038_v17 = vld [vmem:[#allocation9 + $0x888] ss:$28 sps:$4 sm:$0xff]   ;;  %v7049_v18 = vld [vmem:[#allocation9 + $0x6d4] ss:$28 sps:$4 sm:$0xff]  }
 0x2c3   :  { %vm2325_vm6 = vcmp.gt.f32.partialorder %v6710_v23, 0.0  ;;  %v2333_v32 = vmul.f32 0.2, %v6710_v23  ;;  %v6713_v33 = vadd.f32 %v2236_v28, %v698_v20  ;;  %v2238_v34 = vpop.f32.mrb[10].mxu0  ;;  %v2157_v35 = vpop.f32.mrb[11].mxu1  ;;  %5425 = vmatprep.subr.bf16.mxu1 %v6995_v21 }
 0x2c4   :  { %vm2326_vm7 = vcmp.gt.f32.partialorder %v6711_v11, 0.0  ;;  %v2334_v36 = vmul.f32 0.2, %v6711_v11  ;;  %v2239_v39 = vpop.f32.mrb[11].mxu0  ;;  %v7046_v20 = vld [vmem:[#allocation9 + $0x8c4] ss:$28 sps:$4 sm:$0xff]  }
 0x2c5   :  { %v2341_v37 = vsel %vm2325_vm6, %v6710_v23, %v2333_v32  ;;  %vm2328_vm8 = vcmp.gt.f32.partialorder %v6713_v33, 0.0  ;;  %v2336_v38 = vmul.f32 0.2, %v6713_v33  ;;  %v7047_v21 = vld [vmem:[#allocation9 + $0x6d0] ss:$28 sps:$4 sm:$0xff]   ;;  %v693_v39 = vsub.s32 4, %v7766_v44 }
 0x2c6   :  { %v2342_v40 = vsel %vm2326_vm7, %v6711_v11, %v2334_v36  ;;  %5426 = vmatpush1.bf16.msra.mxu1 %v6993_v30  ;;  %v7834_v50 = vpack.c.bf16 %v2341_v37, %v2341_v37  ;;  %v7055_v23 = vld [vmem:[#allocation9 + $0x70c] ss:$28 sps:$4 sm:$0xff]   ;;  %v7052_v26 = vld [vmem:[#allocation9 + $0x8fc] ss:$28 sps:$4 sm:$0xff]   ;;  %v7061_v29 = vld [vmem:[#allocation9 + $0x744] ss:$28 sps:$4 sm:$0xff]  }
 0x2c7   :  { %v7832_v42 = vpack.c.bf16 %v2342_v40, %v2342_v40  ;;  %v2344_v43 = vsel %vm2328_vm8, %v6713_v33, %v2336_v38  ;;  %5427 = vmatprep.subr.bf16.mxu1 %v7001_v31  ;;  %v7053_v11 = vld [vmem:[#allocation9 + $0x708] ss:$28 sps:$4 sm:$0xff]   ;;  %v7050_v28 = vld [vmem:[#allocation9 + $0x8f8] ss:$28 sps:$4 sm:$0xff]   ;;  %v7059_v31 = vld [vmem:[#allocation9 + $0x740] ss:$28 sps:$4 sm:$0xff]  }
 0x2c8   :  { %v7836_v52 = vpack.c.bf16 %v2344_v43, %v2344_v43  ;;  %v7058_v30 = vld [vmem:[#allocation9 + $0x934] ss:$28 sps:$4 sm:$0xff]   ;;  %v7067_v33 = vld [vmem:[#allocation9 + $0x77c] ss:$28 sps:$4 sm:$0xff]   ;;  %v7064_v34 = vld [vmem:[#allocation9 + $0x96c] ss:$28 sps:$4 sm:$0xff]  }
 0x2c9   :  { %5281 = vmatprep.mubr.bf16.mxu0 %v7832_v42  ;;  %5445 = vmatprep.mubr.bf16.mxu1 %v7832_v42  ;;  %v7056_v32 = vld [vmem:[#allocation9 + $0x930] ss:$28 sps:$4 sm:$0xff]   ;;  %v7065_v35 = vld [vmem:[#allocation9 + $0x778] ss:$28 sps:$4 sm:$0xff]   ;;  %v7062_v36 = vld [vmem:[#allocation9 + $0x968] ss:$28 sps:$4 sm:$0xff]  }
 0x2ca   :  { %5282 = vmatmul.mubr.bf16.vlgmr.msra.gmra.mrb[12].mxu0 %v7834_v50  ;;  %5428 = vmatpush1.bf16.msra.mxu1 %v6999_v41  ;;  %v7073_v37 = vld [vmem:[#allocation9 + $0x7b4] ss:$28 sps:$4 sm:$0xff]   ;;  %v7070_v38 = vld [vmem:[#allocation9 + $0x9a4] ss:$28 sps:$4 sm:$0xff]   ;;  %v7079_v43 = vld [vmem:[#allocation9 + $0x7ec] ss:$28 sps:$4 sm:$0xff]  }
 0x2cb   :  { %5291 = vmatpush1.bf16.msra.mxu0 %v6996_v45  ;;  %5322 = vmatprep.mubr.bf16.mxu0 %v7836_v52  ;;  %v7071_v40 = vld [vmem:[#allocation9 + $0x7b0] ss:$28 sps:$4 sm:$0xff]   ;;  %v7068_v41 = vld [vmem:[#allocation9 + $0x9a0] ss:$28 sps:$4 sm:$0xff]  }
 0x2cc   :  { %5292 = vmatprep.subr.bf16.mxu0 %v7004_v19  ;;  %5429 = vmatprep.subr.bf16.mxu1 %v7007_v51  ;;  %v7076_v45 = vld [vmem:[#allocation9 + $0x9dc] ss:$28 sps:$4 sm:$0xff]   ;;  %v694_v19 = vrot.slane %v7807_v16, %v693_v39  ;;  %v7077_v51 = vld [vmem:[#allocation9 + $0x7e8] ss:$28 sps:$4 sm:$0xff]  }
 0x2cd   :  { %v7089_v16 = vld [vmem:[#allocation9 + $0x858] ss:$28 sps:$4 sm:$0xff]  }
 0x2ce   :  { %5430 = vmatpush1.bf16.msra.mxu1 %v7005_v53  ;;  %v7074_v53 = vld [vmem:[#allocation9 + $0x9d8] ss:$28 sps:$4 sm:$0xff]  }
 0x2cf   :  { %5293 = vmatpush1.bf16.msra.mxu0 %v7002_v54  ;;  %5431 = vmatprep.subr.bf16.mxu1 %v7013_v55  ;;  %v7085_v54 = vld [vmem:[#allocation9 + $0x824] ss:$28 sps:$4 sm:$0xff]   ;;  %v7082_v55 = vld [vmem:[#allocation9 + $0xa14] ss:$28 sps:$4 sm:$0xff]  }
 0x2d0   :  { %5294 = vmatprep.subr.bf16.mxu0 %v7010_v56  ;;  %v6712_v56 = vadd.f32 %v7830_v24, %v694_v19  ;;  %v7095_v24 = vld [vmem:[#allocation9 + $0x890] ss:$28 sps:$4 sm:$0xff]   ;;  %v7148_v19 = vld [vmem:[#allocation9 + $0xc7c] ss:$28 sps:$4 sm:$0xff]  }
 0x2d2   :  { %5432 = vmatpush1.bf16.msra.mxu1 %v7011_v57  ;;  %v7083_v57 = vld [vmem:[#allocation9 + $0x820] ss:$28 sps:$4 sm:$0xff]   ;;  %vm2327_vm9 = vcmp.gt.f32.partialorder %v6712_v56, 0.0 }
 0x2d3   :  { %5295 = vmatpush1.bf16.msra.mxu0 %v7008_v58  ;;  %5433 = vmatprep.subr.bf16.mxu1 %v7019_v59  ;;  %v7080_v58 = vld [vmem:[#allocation9 + $0xa10] ss:$28 sps:$4 sm:$0xff]   ;;  %v7091_v59 = vld [vmem:[#allocation9 + $0x85c] ss:$28 sps:$4 sm:$0xff]  }
 0x2d4   :  { %5296 = vmatprep.subr.bf16.mxu0 %v7016_v60  ;;  %v7088_v60 = vld [vmem:[#allocation9 + $0xa4c] ss:$28 sps:$4 sm:$0xff]  }
 0x2d6   :  { %5434 = vmatpush1.bf16.msra.mxu1 %v7017_v61  ;;  %v2335_v61 = vmul.f32 0.2, %v6712_v56 }
 0x2d7   :  { %5297 = vmatpush1.bf16.msra.mxu0 %v7014_v62  ;;  %5435 = vmatprep.subr.bf16.mxu1 %v7025_v63  ;;  %v7086_v62 = vld [vmem:[#allocation9 + $0xa48] ss:$28 sps:$4 sm:$0xff]   ;;  %v7097_v63 = vld [vmem:[#allocation9 + $0x894] ss:$28 sps:$4 sm:$0xff]  }
 0x2d8   :  { %5298 = vmatprep.subr.bf16.mxu0 %v7022_v0  ;;  %v7094_v0 = vld [vmem:[#allocation9 + $0xa84] ss:$28 sps:$4 sm:$0xff]  }
 0x2da   :  { %5436 = vmatpush1.bf16.msra.mxu1 %v7023_v1  ;;  %v2343_v1 = vsel %vm2327_vm9, %v6712_v56, %v2335_v61  ;;  %v7155_v56 = vld [vmem:[#allocation9 + $0xac0] ss:$28 sps:$4 sm:$0xff]   ;;  %v7158_v61 = vld [vmem:[#allocation9 + $0xce8] ss:$28 sps:$4 sm:$0xff]  }
 0x2db   :  { %5299 = vmatpush1.bf16.msra.mxu0 %v7020_v2  ;;  %5437 = vmatprep.subr.bf16.mxu1 %v7031_v3  ;;  %v7092_v2 = vld [vmem:[#allocation9 + $0xa80] ss:$28 sps:$4 sm:$0xff]   ;;  %v7103_v3 = vld [vmem:[#allocation9 + $0x8cc] ss:$28 sps:$4 sm:$0xff]  }
 0x2dc   :  { %5300 = vmatprep.subr.bf16.mxu0 %v7028_v4  ;;  %v7849_v4 = vpack.c.bf16 %v2343_v1, %v2343_v1  ;;  %v7175_v1 = vld [vmem:[#allocation9 + $0xb6c] ss:$28 sps:$4 sm:$0xff]  }
 0x2de   :  { %5438 = vmatpush1.bf16.msra.mxu1 %v7029_v5  ;;  %v7100_v5 = vld [vmem:[#allocation9 + $0xabc] ss:$28 sps:$4 sm:$0xff]  }
 0x2df   :  { %5301 = vmatpush1.bf16.msra.mxu0 %v7026_v6  ;;  %5439 = vmatprep.subr.bf16.mxu1 %v7037_v15  ;;  %v7101_v6 = vld [vmem:[#allocation9 + $0x8c8] ss:$28 sps:$4 sm:$0xff]   ;;  %v7098_v15 = vld [vmem:[#allocation9 + $0xab8] ss:$28 sps:$4 sm:$0xff]  }
 0x2e0   :  { %5302 = vmatprep.subr.bf16.mxu0 %v7034_v7  ;;  %v7109_v7 = vld [vmem:[#allocation9 + $0x904] ss:$28 sps:$4 sm:$0xff]  }
 0x2e2   :  { %5440 = vmatpush1.bf16.msra.mxu1 %v7035_v8  ;;  %v7106_v8 = vld [vmem:[#allocation9 + $0xaf4] ss:$28 sps:$4 sm:$0xff]  }
 0x2e3   :  { %5303 = vmatpush1.bf16.msra.mxu0 %v7032_v9  ;;  %5441 = vmatprep.subr.bf16.mxu1 %v7043_v10  ;;  %v7107_v9 = vld [vmem:[#allocation9 + $0x900] ss:$28 sps:$4 sm:$0xff]   ;;  %v7104_v10 = vld [vmem:[#allocation9 + $0xaf0] ss:$28 sps:$4 sm:$0xff]  }
 0x2e4   :  { %5304 = vmatprep.subr.bf16.mxu0 %v7040_v13  ;;  %v7115_v13 = vld [vmem:[#allocation9 + $0x93c] ss:$28 sps:$4 sm:$0xff]  }
 0x2e6   :  { %5442 = vmatpush1.bf16.msra.mxu1 %v7041_v14  ;;  %v7112_v14 = vld [vmem:[#allocation9 + $0xb2c] ss:$28 sps:$4 sm:$0xff]  }
 0x2e7   :  { %5305 = vmatpush1.bf16.msra.mxu0 %v7038_v17  ;;  %5443 = vmatprep.subr.bf16.mxu1 %v7049_v18  ;;  %v7113_v17 = vld [vmem:[#allocation9 + $0x938] ss:$28 sps:$4 sm:$0xff]   ;;  %v7110_v18 = vld [vmem:[#allocation9 + $0xb28] ss:$28 sps:$4 sm:$0xff]  }
 0x2e8   :  { %5306 = vmatprep.subr.bf16.mxu0 %v7046_v20  ;;  %v7121_v20 = vld [vmem:[#allocation9 + $0x974] ss:$28 sps:$4 sm:$0xff]  }
 0x2ea   :  { %5444 = vmatpush1.bf16.msra.mxu1 %v7047_v21  ;;  %v7118_v21 = vld [vmem:[#allocation9 + $0xb64] ss:$28 sps:$4 sm:$0xff]  }
 0x2eb   :  { %5307 = vmatpush1.bf16.msra.mxu0 %v7044_v22  ;;  %5454 = vmatprep.subr.bf16.mxu1 %v7055_v23  ;;  %v7119_v22 = vld [vmem:[#allocation9 + $0x970] ss:$28 sps:$4 sm:$0xff]   ;;  %v7116_v23 = vld [vmem:[#allocation9 + $0xb60] ss:$28 sps:$4 sm:$0xff]  }
 0x2ec   :  { %5308 = vmatprep.subr.bf16.mxu0 %v7052_v26  ;;  %v7127_v26 = vld [vmem:[#allocation9 + $0x9ac] ss:$28 sps:$4 sm:$0xff]  }
 0x2ed   :  { %5446 = vmatmul.mubr.bf16.vlgmr.msra.gmra.mrb[16].mxu1 %v7834_v50 }
 0x2ee   :  { %5455 = vmatpush1.bf16.msra.mxu1 %v7053_v11  ;;  %5486 = vmatprep.mubr.bf16.mxu1 %v7836_v52  ;;  %v7124_v11 = vld [vmem:[#allocation9 + $0xb9c] ss:$28 sps:$4 sm:$0xff]  }
 0x2ef   :  { %5309 = vmatpush1.bf16.msra.mxu0 %v7050_v28  ;;  %5456 = vmatprep.subr.bf16.mxu1 %v7061_v29  ;;  %v7125_v28 = vld [vmem:[#allocation9 + $0x9a8] ss:$28 sps:$4 sm:$0xff]   ;;  %v7122_v29 = vld [vmem:[#allocation9 + $0xb98] ss:$28 sps:$4 sm:$0xff]  }
 0x2f0   :  { %5310 = vmatprep.subr.bf16.mxu0 %v7058_v30  ;;  %v7133_v30 = vld [vmem:[#allocation9 + $0x9e4] ss:$28 sps:$4 sm:$0xff]  }
 0x2f2   :  { %5457 = vmatpush1.bf16.msra.mxu1 %v7059_v31  ;;  %v7130_v31 = vld [vmem:[#allocation9 + $0xbd4] ss:$28 sps:$4 sm:$0xff]  }
 0x2f3   :  { %5311 = vmatpush1.bf16.msra.mxu0 %v7056_v32  ;;  %5458 = vmatprep.subr.bf16.mxu1 %v7067_v33  ;;  %v7131_v32 = vld [vmem:[#allocation9 + $0x9e0] ss:$28 sps:$4 sm:$0xff]   ;;  %v7128_v33 = vld [vmem:[#allocation9 + $0xbd0] ss:$28 sps:$4 sm:$0xff]  }
 0x2f4   :  { %5312 = vmatprep.subr.bf16.mxu0 %v7064_v34  ;;  %v7139_v34 = vld [vmem:[#allocation9 + $0xa1c] ss:$28 sps:$4 sm:$0xff]  }
 0x2f6   :  { %5459 = vmatpush1.bf16.msra.mxu1 %v7065_v35  ;;  %v7136_v35 = vld [vmem:[#allocation9 + $0xc0c] ss:$28 sps:$4 sm:$0xff]  }
 0x2f7   :  { %5313 = vmatpush1.bf16.msra.mxu0 %v7062_v36  ;;  %5460 = vmatprep.subr.bf16.mxu1 %v7073_v37  ;;  %v7137_v36 = vld [vmem:[#allocation9 + $0xa18] ss:$28 sps:$4 sm:$0xff]   ;;  %v7134_v37 = vld [vmem:[#allocation9 + $0xc08] ss:$28 sps:$4 sm:$0xff]  }
 0x2f8   :  { %5314 = vmatprep.subr.bf16.mxu0 %v7070_v38  ;;  %v7145_v38 = vld [vmem:[#allocation9 + $0xa54] ss:$28 sps:$4 sm:$0xff]  }
 0x2fa   :  { %5461 = vmatpush1.bf16.msra.mxu1 %v7071_v40  ;;  %v7142_v40 = vld [vmem:[#allocation9 + $0xc44] ss:$28 sps:$4 sm:$0xff]  }
 0x2fb   :  { %5315 = vmatpush1.bf16.msra.mxu0 %v7068_v41  ;;  %5462 = vmatprep.subr.bf16.mxu1 %v7079_v43  ;;  %v7143_v41 = vld [vmem:[#allocation9 + $0xa50] ss:$28 sps:$4 sm:$0xff]   ;;  %v7140_v43 = vld [vmem:[#allocation9 + $0xc40] ss:$28 sps:$4 sm:$0xff]  }
 0x2fc   :  { %5316 = vmatprep.subr.bf16.mxu0 %v7076_v45  ;;  %v7151_v45 = vld [vmem:[#allocation9 + $0xa8c] ss:$28 sps:$4 sm:$0xff]  }
 0x2fe   :  { %5463 = vmatpush1.bf16.msra.mxu1 %v7077_v51  ;;  %v7149_v51 = vld [vmem:[#allocation9 + $0xa88] ss:$28 sps:$4 sm:$0xff]  }
 0x2ff   :  { %5317 = vmatpush1.bf16.msra.mxu0 %v7074_v53  ;;  %5464 = vmatprep.subr.bf16.mxu1 %v7085_v54  ;;  %v7146_v53 = vld [vmem:[#allocation9 + $0xc78] ss:$28 sps:$4 sm:$0xff]   ;;  %v7157_v54 = vld [vmem:[#allocation9 + $0xac4] ss:$28 sps:$4 sm:$0xff]  }
 0x300   :  { %5318 = vmatprep.subr.bf16.mxu0 %v7082_v55  ;;  %v7154_v55 = vld [vmem:[#allocation9 + $0xcb4] ss:$28 sps:$4 sm:$0xff]  }
 0x302   :  { %5465 = vmatpush1.bf16.msra.mxu1 %v7083_v57  ;;  %v7152_v57 = vld [vmem:[#allocation9 + $0xcb0] ss:$28 sps:$4 sm:$0xff]  }
 0x303   :  { %5319 = vmatpush1.bf16.msra.mxu0 %v7080_v58  ;;  %5466 = vmatprep.subr.bf16.mxu1 %v7091_v59  ;;  %v7163_v58 = vld [vmem:[#allocation9 + $0xafc] ss:$28 sps:$4 sm:$0xff]   ;;  %v7160_v59 = vld [vmem:[#allocation9 + $0xcec] ss:$28 sps:$4 sm:$0xff]  }
 0x304   :  { %5320 = vmatprep.subr.bf16.mxu0 %v7088_v60  ;;  %v7161_v60 = vld [vmem:[#allocation9 + $0xaf8] ss:$28 sps:$4 sm:$0xff]  }
 0x306   :  { %5467 = vmatpush1.bf16.msra.mxu1 %v7089_v16  ;;  %v7169_v16 = vld [vmem:[#allocation9 + $0xb34] ss:$28 sps:$4 sm:$0xff]  }
 0x307   :  { %5321 = vmatpush1.bf16.msra.mxu0 %v7086_v62  ;;  %5468 = vmatprep.subr.bf16.mxu1 %v7097_v63  ;;  %v7166_v62 = vld [vmem:[#allocation9 + $0xd24] ss:$28 sps:$4 sm:$0xff]   ;;  %v7167_v63 = vld [vmem:[#allocation9 + $0xb30] ss:$28 sps:$4 sm:$0xff]  }
 0x308   :  { %5331 = vmatprep.subr.bf16.mxu0 %v7094_v0  ;;  %v7164_v0 = vld [vmem:[#allocation9 + $0xd20] ss:$28 sps:$4 sm:$0xff]  }
 0x30a   :  { %5323 = vmatmul.mubr.bf16.vlgmr.msra.gmra.mrb[12].mxu0 %v7849_v4  ;;  %5469 = vmatpush1.bf16.msra.mxu1 %v7095_v24  ;;  %v7172_v24 = vld [vmem:[#allocation9 + $0xd5c] ss:$28 sps:$4 sm:$0xff]  }
 0x30b   :  { %5332 = vmatpush1.bf16.msra.mxu0 %v7092_v2  ;;  %5470 = vmatprep.subr.bf16.mxu1 %v7103_v3  ;;  %v701_v2 = vsub.s32 6, %v7766_v44  ;;  %v7173_v3 = vld [vmem:[#allocation9 + $0xb68] ss:$28 sps:$4 sm:$0xff]  }
 0x30c   :  { %5333 = vmatprep.subr.bf16.mxu0 %v7100_v5  ;;  %v705_v5 = vsub.s32 7, %v7766_v44 }
 0x30e   :  { %5471 = vmatpush1.bf16.msra.mxu1 %v7101_v6  ;;  %v7170_v6 = vld [vmem:[#allocation9 + $0xd58] ss:$28 sps:$4 sm:$0xff]  }
 0x30f   :  { %5334 = vmatpush1.bf16.msra.mxu0 %v7098_v15  ;;  %5472 = vmatprep.subr.bf16.mxu1 %v7109_v7  ;;  %v7181_v15 = vld [vmem:[#allocation9 + $0xba4] ss:$28 sps:$4 sm:$0xff]   ;;  %v7178_v7 = vld [vmem:[#allocation9 + $0xd94] ss:$28 sps:$4 sm:$0xff]  }
 0x310   :  { %5335 = vmatprep.subr.bf16.mxu0 %v7106_v8  ;;  %v7485_v8 = vld [vmem:[#allocation7] sm:$0xff] }
 0x312   :  { %5473 = vmatpush1.bf16.msra.mxu1 %v7107_v9  ;;  %v702_v9 = vrot.slane %v7485_v8, %v701_v2 }
 0x313   :  { %5336 = vmatpush1.bf16.msra.mxu0 %v7104_v10  ;;  %5474 = vmatprep.subr.bf16.mxu1 %v7115_v13  ;;  %v706_v10 = vrot.slane %v7485_v8, %v705_v5  ;;  %v7179_v13 = vld [vmem:[#allocation9 + $0xba0] ss:$28 sps:$4 sm:$0xff]  }
 0x314   :  { %5337 = vmatprep.subr.bf16.mxu0 %v7112_v14  ;;  %v7176_v14 = vld [vmem:[#allocation9 + $0xd90] ss:$28 sps:$4 sm:$0xff]   ;;  %v7229_v5 = vld [vmem:[#allocation9 + $0x164] ss:$28 sps:$4 sm:$0xff]   ;;  %v7235_v8 = vld [vmem:[#allocation9 + $0x19c] ss:$28 sps:$4 sm:$0xff]  }
 0x316   :  { %5475 = vmatpush1.bf16.msra.mxu1 %v7113_v17  ;;  %v7187_v17 = vld [vmem:[#allocation9 + $0xbdc] ss:$28 sps:$4 sm:$0xff]  }
 0x317   :  { %5338 = vmatpush1.bf16.msra.mxu0 %v7110_v18  ;;  %5476 = vmatprep.subr.bf16.mxu1 %v7121_v20  ;;  %v7184_v20 = vld [vmem:[#allocation9 + $0xdcc] ss:$28 sps:$4 sm:$0xff]  }
 0x318   :  { %5339 = vmatprep.subr.bf16.mxu0 %v7118_v21 }
 0x31a   :  { %5477 = vmatpush1.bf16.msra.mxu1 %v7119_v22 }
 0x31b   :  { %5340 = vmatpush1.bf16.msra.mxu0 %v7116_v23  ;;  %5478 = vmatprep.subr.bf16.mxu1 %v7127_v26 }
 0x31c   :  { %5341 = vmatprep.subr.bf16.mxu0 %v7124_v11  ;;  %v7182_v11 = vld [vmem:[#allocation9 + $0xdc8] ss:$28 sps:$4 sm:$0xff]  }
 0x31e   :  { %5479 = vmatpush1.bf16.msra.mxu1 %v7125_v28  ;;  %v7185_v28 = vld [vmem:[#allocation9 + $0xbd8] ss:$28 sps:$4 sm:$0xff]  }
 0x31f   :  { %5342 = vmatpush1.bf16.msra.mxu0 %v7122_v29  ;;  %5480 = vmatprep.subr.bf16.mxu1 %v7133_v30 }
 0x320   :  { %5343 = vmatprep.subr.bf16.mxu0 %v7130_v31  ;;  %v7190_v31 = vld [vmem:[#allocation9 + $0xc14] ss:$28 sps:$4 sm:$0xff]  }
 0x322   :  { %5481 = vmatpush1.bf16.msra.mxu1 %v7131_v32 }
 0x323   :  { %5344 = vmatpush1.bf16.msra.mxu0 %v7128_v33  ;;  %5482 = vmatprep.subr.bf16.mxu1 %v7139_v34  ;;  %v7193_v33 = vld [vmem:[#allocation9 + $0x14] ss:$28 sps:$4 sm:$0xff]  }
 0x324   :  { %5345 = vmatprep.subr.bf16.mxu0 %v7136_v35 }
 0x326   :  { %5483 = vmatpush1.bf16.msra.mxu1 %v7137_v36  ;;  %v7188_v36 = vld [vmem:[#allocation9 + $0xc10] ss:$28 sps:$4 sm:$0xff]  }
 0x327   :  { %5346 = vmatpush1.bf16.msra.mxu0 %v7134_v37  ;;  %5484 = vmatprep.subr.bf16.mxu1 %v7145_v38  ;;  %v7191_v38 = vld [vmem:[#allocation9 + $0x10] ss:$28 sps:$4 sm:$0xff]  }
 0x328   :  { %5347 = vmatprep.subr.bf16.mxu0 %v7142_v40 }
 0x32a   :  { %5485 = vmatpush1.bf16.msra.mxu1 %v7143_v41  ;;  %v7196_v41 = vld [vmem:[#allocation9 + $0xc4c] ss:$28 sps:$4 sm:$0xff]  }
 0x32b   :  { %5348 = vmatpush1.bf16.msra.mxu0 %v7140_v43  ;;  %5495 = vmatprep.subr.bf16.mxu1 %v7151_v45  ;;  %v7199_v43 = vld [vmem:[#allocation9 + $0x4c] ss:$28 sps:$4 sm:$0xff]  }
 0x32c   :  { %5349 = vmatprep.subr.bf16.mxu0 %v7148_v19  ;;  %v7194_v45 = vld [vmem:[#allocation9 + $0xc48] ss:$28 sps:$4 sm:$0xff]  }
 0x32d   :  { %5487 = vmatmul.mubr.bf16.vlgmr.msra.gmra.mrb[16].mxu1 %v7849_v4  ;;  %v7197_v19 = vld [vmem:[#allocation9 + $0x48] ss:$28 sps:$4 sm:$0xff]  }
 0x32e   :  { %5496 = vmatpush1.bf16.msra.mxu1 %v7149_v51  ;;  %v7202_v51 = vld [vmem:[#allocation9 + $0xc84] ss:$28 sps:$4 sm:$0xff]  }
 0x32f   :  { %5350 = vmatpush1.bf16.msra.mxu0 %v7146_v53  ;;  %5497 = vmatprep.subr.bf16.mxu1 %v7157_v54  ;;  %v7205_v53 = vld [vmem:[#allocation9 + $0x84] ss:$28 sps:$4 sm:$0xff]  }
 0x330   :  { %5351 = vmatprep.subr.bf16.mxu0 %v7154_v55  ;;  %v7200_v54 = vld [vmem:[#allocation9 + $0xc80] ss:$28 sps:$4 sm:$0xff]  }
 0x331   :  { %v7203_v55 = vld [vmem:[#allocation9 + $0x80] ss:$28 sps:$4 sm:$0xff]  }
 0x332   :  { %5498 = vmatpush1.bf16.msra.mxu1 %v7155_v56  ;;  %v7208_v56 = vld [vmem:[#allocation9 + $0xcbc] ss:$28 sps:$4 sm:$0xff]  }
 0x333   :  { %5352 = vmatpush1.bf16.msra.mxu0 %v7152_v57  ;;  %5499 = vmatprep.subr.bf16.mxu1 %v7163_v58  ;;  %v7211_v57 = vld [vmem:[#allocation9 + $0xbc] ss:$28 sps:$4 sm:$0xff]  }
 0x334   :  { %5353 = vmatprep.subr.bf16.mxu0 %v7160_v59  ;;  %v7206_v58 = vld [vmem:[#allocation9 + $0xcb8] ss:$28 sps:$4 sm:$0xff]  }
 0x335   :  { %v7209_v59 = vld [vmem:[#allocation9 + $0xb8] ss:$28 sps:$4 sm:$0xff]  }
 0x336   :  { %5500 = vmatpush1.bf16.msra.mxu1 %v7161_v60  ;;  %v7214_v60 = vld [vmem:[#allocation9 + $0xcf4] ss:$28 sps:$4 sm:$0xff]  }
 0x337   :  { %5354 = vmatpush1.bf16.msra.mxu0 %v7158_v61  ;;  %5501 = vmatprep.subr.bf16.mxu1 %v7169_v16  ;;  %v7217_v61 = vld [vmem:[#allocation9 + $0xf4] ss:$28 sps:$4 sm:$0xff]  }
 0x338   :  { %5355 = vmatprep.subr.bf16.mxu0 %v7166_v62  ;;  %v7212_v16 = vld [vmem:[#allocation9 + $0xcf0] ss:$28 sps:$4 sm:$0xff]  }
 0x339   :  { %v7215_v62 = vld [vmem:[#allocation9 + $0xf0] ss:$28 sps:$4 sm:$0xff]  }
 0x33a   :  { %5502 = vmatpush1.bf16.msra.mxu1 %v7167_v63  ;;  %v7220_v63 = vld [vmem:[#allocation9 + $0xd2c] ss:$28 sps:$4 sm:$0xff]  }
 0x33b   :  { %5356 = vmatpush1.bf16.msra.mxu0 %v7164_v0  ;;  %5503 = vmatprep.subr.bf16.mxu1 %v7175_v1  ;;  %v7223_v0 = vld [vmem:[#allocation9 + $0x12c] ss:$28 sps:$4 sm:$0xff]  }
 0x33c   :  { %5357 = vmatprep.subr.bf16.mxu0 %v7172_v24  ;;  %v7218_v1 = vld [vmem:[#allocation9 + $0xd28] ss:$28 sps:$4 sm:$0xff]  }
 0x33d   :  { %v7221_v24 = vld [vmem:[#allocation9 + $0x128] ss:$28 sps:$4 sm:$0xff]  }
 0x33e   :  { %5504 = vmatpush1.bf16.msra.mxu1 %v7173_v3  ;;  %v7226_v3 = vld [vmem:[#allocation9 + $0xd64] ss:$28 sps:$4 sm:$0xff]  }
 0x33f   :  { %5358 = vmatpush1.bf16.msra.mxu0 %v7170_v6  ;;  %5505 = vmatprep.subr.bf16.mxu1 %v7181_v15  ;;  %v7224_v6 = vld [vmem:[#allocation9 + $0xd60] ss:$28 sps:$4 sm:$0xff]  }
 0x340   :  { %v2316_v18 = vpop.f32.mrb[12].mxu1  ;;  %5359 = vmatprep.subr.bf16.mxu0 %v7178_v7  ;;  %v7227_v15 = vld [vmem:[#allocation9 + $0x160] ss:$28 sps:$4 sm:$0xff]  }
 0x341   :  { %v6714_v21 = vadd.f32 %v2316_v18, %v702_v9  ;;  %v2318_v22 = vpop.f32.mrb[13].mxu1  ;;  %v7232_v7 = vld [vmem:[#allocation9 + $0xd9c] ss:$28 sps:$4 sm:$0xff]   ;;  %v7239_v18 = vld [vmem:[#allocation9 + $0x1d0] ss:$28 sps:$4 sm:$0xff]  }
 0x342   :  { %v6715_v23 = vadd.f32 %v2318_v22, %v706_v10  ;;  %v2320_v26 = vpop.f32.mrb[14].mxu1  ;;  %5506 = vmatpush1.bf16.msra.mxu1 %v7179_v13  ;;  %v7230_v9 = vld [vmem:[#allocation9 + $0xd98] ss:$28 sps:$4 sm:$0xff]  }
 0x343   :  { %vm2329_vm10 = vcmp.gt.f32.partialorder %v6714_v21, 0.0  ;;  %v2337_v29 = vmul.f32 0.2, %v6714_v21  ;;  %5360 = vmatpush1.bf16.msra.mxu0 %v7176_v14  ;;  %v2321_v30 = vpop.f32.mrb[15].mxu1  ;;  %5507 = vmatprep.subr.bf16.mxu1 %v7187_v17  ;;  %v7233_v10 = vld [vmem:[#allocation9 + $0x198] ss:$28 sps:$4 sm:$0xff]  }
 0x344   :  { %vm2330_vm11 = vcmp.gt.f32.partialorder %v6715_v23, 0.0  ;;  %v2338_v32 = vmul.f32 0.2, %v6715_v23  ;;  %5361 = vmatprep.subr.bf16.mxu0 %v7184_v20  ;;  %v7238_v13 = vld [vmem:[#allocation9 + $0xdd4] ss:$28 sps:$4 sm:$0xff]  }
 0x345   :  { %v2345_v34 = vsel %vm2329_vm10, %v6714_v21, %v2337_v29  ;;  %v7241_v14 = vld [vmem:[#allocation9 + $0x1d4] ss:$28 sps:$4 sm:$0xff]   ;;  %v7244_v21 = vld [vmem:[#allocation9 + $0x20c] ss:$28 sps:$4 sm:$0xff]   ;;  %v7247_v29 = vld [vmem:[#allocation9 + $0x240] ss:$28 sps:$4 sm:$0xff]  }
 0x346   :  { %v2346_v35 = vsel %vm2330_vm11, %v6715_v23, %v2338_v32  ;;  %5508 = vmatpush1.bf16.msra.mxu1 %v7185_v28  ;;  %v7859_v40 = vpack.c.bf16 %v2345_v34, %v2345_v34  ;;  %v7236_v17 = vld [vmem:[#allocation9 + $0xdd0] ss:$28 sps:$4 sm:$0xff]   ;;  %v7245_v20 = vld [vmem:[#allocation9 + $0x1d8] ss:$28 sps:$4 sm:$0xff]   ;;  %v7242_v23 = vld [vmem:[#allocation9 + $0x208] ss:$28 sps:$4 sm:$0xff]  }
 0x347   :  { %v7857_v37 = vpack.c.bf16 %v2346_v35, %v2346_v35  ;;  %5362 = vmatpush1.bf16.msra.mxu0 %v7182_v11  ;;  %5509 = vmatprep.subr.bf16.mxu1 %v7190_v31  ;;  %v7246_v22 = vld [vmem:[#allocation9 + $0x18] ss:$28 sps:$4 sm:$0xff]   ;;  %v7250_v26 = vld [vmem:[#allocation9 + $0x210] ss:$28 sps:$4 sm:$0xff]   ;;  %v7249_v11 = vld [vmem:[#allocation9 + $0x244] ss:$28 sps:$4 sm:$0xff]  }
 0x348   :  { %5536 = vmatprep.subr.bf16.mxu0 %v7193_v33  ;;  %v7251_v28 = vld [vmem:[#allocation9 + $0x50] ss:$28 sps:$4 sm:$0xff]   ;;  %v7255_v30 = vld [vmem:[#allocation9 + $0x248] ss:$28 sps:$4 sm:$0xff]   ;;  %v7254_v31 = vld [vmem:[#allocation9 + $0x27c] ss:$28 sps:$4 sm:$0xff]  }
 0x349   :  { %5363 = vmatprep.mubr.bf16.mxu0 %v7857_v37  ;;  %5527 = vmatprep.mubr.bf16.mxu1 %v7857_v37  ;;  %v7256_v32 = vld [vmem:[#allocation9 + $0x88] ss:$28 sps:$4 sm:$0xff]   ;;  %v7252_v33 = vld [vmem:[#allocation9 + $0x278] ss:$28 sps:$4 sm:$0xff]   ;;  %v7260_v34 = vld [vmem:[#allocation9 + $0x280] ss:$28 sps:$4 sm:$0xff]  }
 0x34a   :  { %5364 = vmatmul.mubr.bf16.vlgmr.msra.gmra.mrb[12].mxu0 %v7859_v40  ;;  %5510 = vmatpush1.bf16.msra.mxu1 %v7188_v36  ;;  %v7259_v35 = vld [vmem:[#allocation9 + $0x2b4] ss:$28 sps:$4 sm:$0xff]   ;;  %v7261_v36 = vld [vmem:[#allocation9 + $0xc0] ss:$28 sps:$4 sm:$0xff]  }
 0x34b   :  { %5537 = vmatpush1.bf16.msra.mxu0 %v7191_v38  ;;  %5568 = vmatprep.mubr.bf16.mxu0 %v7813_v25  ;;  %v7257_v38 = vld [vmem:[#allocation9 + $0x2b0] ss:$28 sps:$4 sm:$0xff]  }
 0x34c   :  { %5511 = vmatprep.subr.bf16.mxu1 %v7196_v41  ;;  %5538 = vmatprep.subr.bf16.mxu0 %v7199_v43  ;;  %v7264_v41 = vld [vmem:[#allocation9 + $0x2ec] ss:$28 sps:$4 sm:$0xff]   ;;  %v7266_v43 = vld [vmem:[#allocation9 + $0xf8] ss:$28 sps:$4 sm:$0xff]  }
 0x34e   :  { %5512 = vmatpush1.bf16.msra.mxu1 %v7194_v45  ;;  %v7262_v45 = vld [vmem:[#allocation9 + $0x2e8] ss:$28 sps:$4 sm:$0xff]  }
 0x34f   :  { %5539 = vmatpush1.bf16.msra.mxu0 %v7197_v19  ;;  %5513 = vmatprep.subr.bf16.mxu1 %v7202_v51  ;;  %v7270_v19 = vld [vmem:[#allocation9 + $0x2f0] ss:$28 sps:$4 sm:$0xff]   ;;  %v7269_v51 = vld [vmem:[#allocation9 + $0x324] ss:$28 sps:$4 sm:$0xff]  }
 0x350   :  { %5540 = vmatprep.subr.bf16.mxu0 %v7205_v53  ;;  %v7271_v53 = vld [vmem:[#allocation9 + $0x130] ss:$28 sps:$4 sm:$0xff]  }
 0x352   :  { %5514 = vmatpush1.bf16.msra.mxu1 %v7200_v54  ;;  %v7267_v54 = vld [vmem:[#allocation9 + $0x320] ss:$28 sps:$4 sm:$0xff]  }
 0x353   :  { %5541 = vmatpush1.bf16.msra.mxu0 %v7203_v55  ;;  %5515 = vmatprep.subr.bf16.mxu1 %v7208_v56  ;;  %v7275_v55 = vld [vmem:[#allocation9 + $0x328] ss:$28 sps:$4 sm:$0xff]   ;;  %v7274_v56 = vld [vmem:[#allocation9 + $0x35c] ss:$28 sps:$4 sm:$0xff]  }
 0x354   :  { %5542 = vmatprep.subr.bf16.mxu0 %v7211_v57  ;;  %v7276_v57 = vld [vmem:[#allocation9 + $0x168] ss:$28 sps:$4 sm:$0xff]  }
 0x356   :  { %5516 = vmatpush1.bf16.msra.mxu1 %v7206_v58  ;;  %v7272_v58 = vld [vmem:[#allocation9 + $0x358] ss:$28 sps:$4 sm:$0xff]  }
 0x357   :  { %5543 = vmatpush1.bf16.msra.mxu0 %v7209_v59  ;;  %5517 = vmatprep.subr.bf16.mxu1 %v7214_v60  ;;  %v7280_v59 = vld [vmem:[#allocation9 + $0x360] ss:$28 sps:$4 sm:$0xff]   ;;  %v7279_v60 = vld [vmem:[#allocation9 + $0x394] ss:$28 sps:$4 sm:$0xff]  }
 0x358   :  { %5544 = vmatprep.subr.bf16.mxu0 %v7217_v61  ;;  %v7281_v61 = vld [vmem:[#allocation9 + $0x1a0] ss:$28 sps:$4 sm:$0xff]  }
 0x35a   :  { %5518 = vmatpush1.bf16.msra.mxu1 %v7212_v16  ;;  %v7277_v16 = vld [vmem:[#allocation9 + $0x390] ss:$28 sps:$4 sm:$0xff]  }
 0x35b   :  { %5545 = vmatpush1.bf16.msra.mxu0 %v7215_v62  ;;  %5519 = vmatprep.subr.bf16.mxu1 %v7220_v63  ;;  %v7284_v62 = vld [vmem:[#allocation9 + $0x3cc] ss:$28 sps:$4 sm:$0xff]   ;;  %v7285_v63 = vld [vmem:[#allocation9 + $0x558] ss:$28 sps:$4 sm:$0xff]  }
 0x35c   :  { %5546 = vmatprep.subr.bf16.mxu0 %v7223_v0  ;;  %v7286_v0 = vld [vmem:[#allocation9 + $0x398] ss:$28 sps:$4 sm:$0xff]  }
 0x35e   :  { %5520 = vmatpush1.bf16.msra.mxu1 %v7218_v1  ;;  %v7282_v1 = vld [vmem:[#allocation9 + $0x3c8] ss:$28 sps:$4 sm:$0xff]  }
 0x35f   :  { %5547 = vmatpush1.bf16.msra.mxu0 %v7221_v24  ;;  %5521 = vmatprep.subr.bf16.mxu1 %v7226_v3  ;;  %v7290_v24 = vld [vmem:[#allocation9 + $0x590] ss:$28 sps:$4 sm:$0xff]   ;;  %v7289_v3 = vld [vmem:[#allocation9 + $0x404] ss:$28 sps:$4 sm:$0xff]  }
 0x360   :  { %5548 = vmatprep.subr.bf16.mxu0 %v7229_v5  ;;  %v7291_v5 = vld [vmem:[#allocation9 + $0x3d0] ss:$28 sps:$4 sm:$0xff]  }
 0x362   :  { %5522 = vmatpush1.bf16.msra.mxu1 %v7224_v6  ;;  %v7287_v6 = vld [vmem:[#allocation9 + $0x400] ss:$28 sps:$4 sm:$0xff]  }
 0x363   :  { %5549 = vmatpush1.bf16.msra.mxu0 %v7227_v15  ;;  %5523 = vmatprep.subr.bf16.mxu1 %v7232_v7  ;;  %v7295_v15 = vld [vmem:[#allocation9 + $0x5c8] ss:$28 sps:$4 sm:$0xff]   ;;  %v7294_v7 = vld [vmem:[#allocation9 + $0x43c] ss:$28 sps:$4 sm:$0xff]  }
 0x364   :  { %5550 = vmatprep.subr.bf16.mxu0 %v7235_v8  ;;  %v7296_v8 = vld [vmem:[#allocation9 + $0x408] ss:$28 sps:$4 sm:$0xff]  }
 0x366   :  { %5524 = vmatpush1.bf16.msra.mxu1 %v7230_v9  ;;  %v7292_v9 = vld [vmem:[#allocation9 + $0x438] ss:$28 sps:$4 sm:$0xff]  }
 0x367   :  { %5551 = vmatpush1.bf16.msra.mxu0 %v7233_v10  ;;  %5525 = vmatprep.subr.bf16.mxu1 %v7238_v13  ;;  %v7300_v10 = vld [vmem:[#allocation9 + $0x600] ss:$28 sps:$4 sm:$0xff]   ;;  %v7299_v13 = vld [vmem:[#allocation9 + $0x474] ss:$28 sps:$4 sm:$0xff]  }
 0x368   :  { %5552 = vmatprep.subr.bf16.mxu0 %v7241_v14  ;;  %v7297_v14 = vld [vmem:[#allocation9 + $0x470] ss:$28 sps:$4 sm:$0xff]  }
 0x36a   :  { %5526 = vmatpush1.bf16.msra.mxu1 %v7236_v17  ;;  %v7304_v17 = vld [vmem:[#allocation9 + $0x4ac] ss:$28 sps:$4 sm:$0xff]  }
 0x36b   :  { %5553 = vmatpush1.bf16.msra.mxu0 %v7239_v18  ;;  %6618 = vmatprep.subr.bf16.mxu1 %v7245_v20  ;;  %v7306_v18 = vld [vmem:[#allocation9 + $0x478] ss:$28 sps:$4 sm:$0xff]   ;;  %v7302_v20 = vld [vmem:[#allocation9 + $0x4a8] ss:$28 sps:$4 sm:$0xff]  }
 0x36c   :  { %5554 = vmatprep.subr.bf16.mxu0 %v7244_v21  ;;  %v7310_v21 = vld [vmem:[#allocation9 + $0x670] ss:$28 sps:$4 sm:$0xff]  }
 0x36d   :  { %5528 = vmatmul.mubr.bf16.vlgmr.msra.gmra.mrb[16].mxu1 %v7859_v40 }
 0x36e   :  { %6619 = vmatpush3.bf16.msra.mxu1 %v7246_v22  ;;  %5732 = vmatprep.mubr.bf16.mxu1 %v7813_v25  ;;  %v7265_v25 = vld [vmem:[#allocation9 + $0x2b8] ss:$28 sps:$4 sm:$0xff]   ;;  %v7309_v22 = vld [vmem:[#allocation9 + $0x4e4] ss:$28 sps:$4 sm:$0xff]  }
 0x36f   :  { %5555 = vmatpush1.bf16.msra.mxu0 %v7242_v23  ;;  %6620 = vmatprep.subr.bf16.mxu1 %v7250_v26  ;;  %v7311_v23 = vld [vmem:[#allocation9 + $0x4b0] ss:$28 sps:$4 sm:$0xff]   ;;  %v7307_v26 = vld [vmem:[#allocation9 + $0x4e0] ss:$28 sps:$4 sm:$0xff]  }
 0x370   :  { %5556 = vmatprep.subr.bf16.mxu0 %v7249_v11  ;;  %v7315_v11 = vld [vmem:[#allocation9 + $0x6a8] ss:$28 sps:$4 sm:$0xff]  }
 0x372   :  { %6621 = vmatpush3.bf16.msra.mxu1 %v7251_v28  ;;  %v7314_v28 = vld [vmem:[#allocation9 + $0x51c] ss:$28 sps:$4 sm:$0xff]  }
 0x373   :  { %5557 = vmatpush1.bf16.msra.mxu0 %v7247_v29  ;;  %6622 = vmatprep.subr.bf16.mxu1 %v7255_v30  ;;  %v7316_v29 = vld [vmem:[#allocation9 + $0x4e8] ss:$28 sps:$4 sm:$0xff]   ;;  %v7312_v30 = vld [vmem:[#allocation9 + $0x518] ss:$28 sps:$4 sm:$0xff]  }
 0x374   :  { %5558 = vmatprep.subr.bf16.mxu0 %v7254_v31  ;;  %v7320_v31 = vld [vmem:[#allocation9 + $0x6e0] ss:$28 sps:$4 sm:$0xff]  }
 0x376   :  { %6623 = vmatpush3.bf16.msra.mxu1 %v7256_v32  ;;  %v7319_v32 = vld [vmem:[#allocation9 + $0x554] ss:$28 sps:$4 sm:$0xff]  }
 0x377   :  { %5559 = vmatpush1.bf16.msra.mxu0 %v7252_v33  ;;  %6624 = vmatprep.subr.bf16.mxu1 %v7260_v34  ;;  %v7321_v33 = vld [vmem:[#allocation9 + $0x520] ss:$28 sps:$4 sm:$0xff]   ;;  %v7317_v34 = vld [vmem:[#allocation9 + $0x550] ss:$28 sps:$4 sm:$0xff]  }
 0x378   :  { %5560 = vmatprep.subr.bf16.mxu0 %v7259_v35  ;;  %v7325_v35 = vld [vmem:[#allocation9 + $0x8d8] ss:$28 sps:$4 sm:$0xff]  }
 0x37a   :  { %6625 = vmatpush3.bf16.msra.mxu1 %v7261_v36  ;;  %v7324_v36 = vld [vmem:[#allocation9 + $0x58c] ss:$28 sps:$4 sm:$0xff]  }
 0x37b   :  { %5561 = vmatpush1.bf16.msra.mxu0 %v7257_v38  ;;  %6626 = vmatprep.subr.bf16.mxu1 %v7265_v25  ;;  %v7326_v38 = vld [vmem:[#allocation9 + $0x718] ss:$28 sps:$4 sm:$0xff]   ;;  %v7322_v25 = vld [vmem:[#allocation9 + $0x588] ss:$28 sps:$4 sm:$0xff]  }
 0x37c   :  { %5562 = vmatprep.subr.bf16.mxu0 %v7264_v41  ;;  %v7330_v41 = vld [vmem:[#allocation9 + $0x910] ss:$28 sps:$4 sm:$0xff]  }
 0x37e   :  { %6627 = vmatpush3.bf16.msra.mxu1 %v7266_v43  ;;  %v7329_v43 = vld [vmem:[#allocation9 + $0x5c4] ss:$28 sps:$4 sm:$0xff]  }
 0x37f   :  { %5563 = vmatpush1.bf16.msra.mxu0 %v7262_v45  ;;  %6628 = vmatprep.subr.bf16.mxu1 %v7270_v19  ;;  %v7331_v45 = vld [vmem:[#allocation9 + $0x750] ss:$28 sps:$4 sm:$0xff]   ;;  %v7327_v19 = vld [vmem:[#allocation9 + $0x5c0] ss:$28 sps:$4 sm:$0xff]  }
 0x380   :  { %5564 = vmatprep.subr.bf16.mxu0 %v7269_v51  ;;  %v7335_v51 = vld [vmem:[#allocation9 + $0x948] ss:$28 sps:$4 sm:$0xff]  }
 0x382   :  { %6629 = vmatpush3.bf16.msra.mxu1 %v7271_v53  ;;  %v7334_v53 = vld [vmem:[#allocation9 + $0x5fc] ss:$28 sps:$4 sm:$0xff]  }
 0x383   :  { %5565 = vmatpush1.bf16.msra.mxu0 %v7267_v54  ;;  %6630 = vmatprep.subr.bf16.mxu1 %v7275_v55  ;;  %v7336_v54 = vld [vmem:[#allocation9 + $0x788] ss:$28 sps:$4 sm:$0xff]   ;;  %v7332_v55 = vld [vmem:[#allocation9 + $0x5f8] ss:$28 sps:$4 sm:$0xff]  }
 0x384   :  { %5566 = vmatprep.subr.bf16.mxu0 %v7274_v56  ;;  %v7340_v56 = vld [vmem:[#allocation9 + $0x980] ss:$28 sps:$4 sm:$0xff]  }
 0x386   :  { %6631 = vmatpush3.bf16.msra.mxu1 %v7276_v57  ;;  %v7339_v57 = vld [vmem:[#allocation9 + $0x634] ss:$28 sps:$4 sm:$0xff]  }
 0x387   :  { %5567 = vmatpush1.bf16.msra.mxu0 %v7272_v58  ;;  %6632 = vmatprep.subr.bf16.mxu1 %v7280_v59  ;;  %v7341_v58 = vld [vmem:[#allocation9 + $0x7c0] ss:$28 sps:$4 sm:$0xff]   ;;  %v7337_v59 = vld [vmem:[#allocation9 + $0x630] ss:$28 sps:$4 sm:$0xff]  }
 0x388   :  { %5577 = vmatprep.subr.bf16.mxu0 %v7279_v60  ;;  %v7345_v60 = vld [vmem:[#allocation9 + $0x9b8] ss:$28 sps:$4 sm:$0xff]  }
 0x38a   :  { %5569 = vmatmul.mubr.bf16.vlgmr.msra.gmra.mrb[16].mxu0 %v7815_v27  ;;  %6633 = vmatpush3.bf16.msra.mxu1 %v7281_v61  ;;  %v7344_v61 = vld [vmem:[#allocation9 + $0x66c] ss:$28 sps:$4 sm:$0xff]  }
 0x38b   :  { %5578 = vmatpush1.bf16.msra.mxu0 %v7277_v16  ;;  %5609 = vmatprep.mubr.bf16.mxu0 %v7832_v42  ;;  %v7346_v16 = vld [vmem:[#allocation9 + $0x7f8] ss:$28 sps:$4 sm:$0xff]  }
 0x38c   :  { %5579 = vmatprep.subr.bf16.mxu0 %v7284_v62  ;;  %6640 = vmatprep.subr.bf16.mxu1 %v7285_v63  ;;  %v7342_v62 = vld [vmem:[#allocation9 + $0x668] ss:$28 sps:$4 sm:$0xff]   ;;  %v7350_v63 = vld [vmem:[#allocation9 + $0x9f0] ss:$28 sps:$4 sm:$0xff]  }
 0x38d   :  { %5733 = vmatmul.mubr.bf16.vlgmr.msra.gmra.mrb[20].mxu1 %v7815_v27  ;;  %v7301_v27 = vld [vmem:[#allocation9 + $0x440] ss:$28 sps:$4 sm:$0xff]  }
 0x38e   :  { %6641 = vmatpush3.bf16.msra.mxu1 %v7286_v0  ;;  %5772 = vmatprep.mubr.bf16.mxu1 %v7832_v42  ;;  %v7305_v42 = vld [vmem:[#allocation9 + $0x638] ss:$28 sps:$4 sm:$0xff]   ;;  %v7349_v0 = vld [vmem:[#allocation9 + $0x6a4] ss:$28 sps:$4 sm:$0xff]  }
 0x38f   :  { %5580 = vmatpush1.bf16.msra.mxu0 %v7282_v1  ;;  %6642 = vmatprep.subr.bf16.mxu1 %v7290_v24  ;;  %v7351_v1 = vld [vmem:[#allocation9 + $0x830] ss:$28 sps:$4 sm:$0xff]   ;;  %v7347_v24 = vld [vmem:[#allocation9 + $0x6a0] ss:$28 sps:$4 sm:$0xff]  }
 0x390   :  { %5581 = vmatprep.subr.bf16.mxu0 %v7289_v3  ;;  %v7355_v3 = vld [vmem:[#allocation9 + $0xa28] ss:$28 sps:$4 sm:$0xff]  }
 0x392   :  { %6643 = vmatpush3.bf16.msra.mxu1 %v7291_v5  ;;  %v7354_v5 = vld [vmem:[#allocation9 + $0x6dc] ss:$28 sps:$4 sm:$0xff]  }
 0x393   :  { %5582 = vmatpush1.bf16.msra.mxu0 %v7287_v6  ;;  %6644 = vmatprep.subr.bf16.mxu1 %v7295_v15  ;;  %v7356_v6 = vld [vmem:[#allocation9 + $0x868] ss:$28 sps:$4 sm:$0xff]   ;;  %v7352_v15 = vld [vmem:[#allocation9 + $0x6d8] ss:$28 sps:$4 sm:$0xff]  }
 0x394   :  { %5583 = vmatprep.subr.bf16.mxu0 %v7294_v7  ;;  %v7360_v7 = vld [vmem:[#allocation9 + $0xa60] ss:$28 sps:$4 sm:$0xff]  }
 0x396   :  { %6645 = vmatpush3.bf16.msra.mxu1 %v7296_v8  ;;  %v7359_v8 = vld [vmem:[#allocation9 + $0x714] ss:$28 sps:$4 sm:$0xff]  }
 0x397   :  { %5584 = vmatpush1.bf16.msra.mxu0 %v7292_v9  ;;  %6646 = vmatprep.subr.bf16.mxu1 %v7300_v10  ;;  %v7361_v9 = vld [vmem:[#allocation9 + $0x8a0] ss:$28 sps:$4 sm:$0xff]   ;;  %v7357_v10 = vld [vmem:[#allocation9 + $0x710] ss:$28 sps:$4 sm:$0xff]  }
 0x398   :  { %5585 = vmatprep.subr.bf16.mxu0 %v7299_v13  ;;  %v7364_v13 = vld [vmem:[#allocation9 + $0x74c] ss:$28 sps:$4 sm:$0xff]  }
 0x39a   :  { %6647 = vmatpush3.bf16.msra.mxu1 %v7301_v27  ;;  %v7365_v27 = vld [vmem:[#allocation9 + $0xc58] ss:$28 sps:$4 sm:$0xff]  }
 0x39b   :  { %5586 = vmatpush1.bf16.msra.mxu0 %v7297_v14  ;;  %6648 = vmatprep.subr.bf16.mxu1 %v7305_v42  ;;  %v7366_v14 = vld [vmem:[#allocation9 + $0xa98] ss:$28 sps:$4 sm:$0xff]   ;;  %v7362_v42 = vld [vmem:[#allocation9 + $0x748] ss:$28 sps:$4 sm:$0xff]  }
 0x39c   :  { %5587 = vmatprep.subr.bf16.mxu0 %v7304_v17  ;;  %v7370_v17 = vld [vmem:[#allocation9 + $0xc90] ss:$28 sps:$4 sm:$0xff]  }
 0x39e   :  { %6649 = vmatpush3.bf16.msra.mxu1 %v7306_v18  ;;  %v7369_v18 = vld [vmem:[#allocation9 + $0x784] ss:$28 sps:$4 sm:$0xff]  }
 0x39f   :  { %5588 = vmatpush1.bf16.msra.mxu0 %v7302_v20  ;;  %6650 = vmatprep.subr.bf16.mxu1 %v7310_v21  ;;  %v7371_v20 = vld [vmem:[#allocation9 + $0xad0] ss:$28 sps:$4 sm:$0xff]   ;;  %v7367_v21 = vld [vmem:[#allocation9 + $0x780] ss:$28 sps:$4 sm:$0xff]  }
 0x3a0   :  { %5589 = vmatprep.subr.bf16.mxu0 %v7309_v22  ;;  %v7374_v22 = vld [vmem:[#allocation9 + $0x7bc] ss:$28 sps:$4 sm:$0xff]  }
 0x3a2   :  { %6651 = vmatpush3.bf16.msra.mxu1 %v7311_v23  ;;  %v7376_v23 = vld [vmem:[#allocation9 + $0xb08] ss:$28 sps:$4 sm:$0xff]  }
 0x3a3   :  { %5590 = vmatpush1.bf16.msra.mxu0 %v7307_v26  ;;  %6652 = vmatprep.subr.bf16.mxu1 %v7315_v11  ;;  %v7380_v26 = vld [vmem:[#allocation9 + $0xd00] ss:$28 sps:$4 sm:$0xff]   ;;  %v7379_v11 = vld [vmem:[#allocation9 + $0x7f4] ss:$28 sps:$4 sm:$0xff]  }
 0x3a4   :  { %5591 = vmatprep.subr.bf16.mxu0 %v7314_v28  ;;  %v7381_v28 = vld [vmem:[#allocation9 + $0xb40] ss:$28 sps:$4 sm:$0xff]  }
 0x3a6   :  { %6653 = vmatpush3.bf16.msra.mxu1 %v7316_v29  ;;  %v7377_v29 = vld [vmem:[#allocation9 + $0x7f0] ss:$28 sps:$4 sm:$0xff]  }
 0x3a7   :  { %5592 = vmatpush1.bf16.msra.mxu0 %v7312_v30  ;;  %6654 = vmatprep.subr.bf16.mxu1 %v7320_v31  ;;  %v7385_v30 = vld [vmem:[#allocation9 + $0xd38] ss:$28 sps:$4 sm:$0xff]   ;;  %v7384_v31 = vld [vmem:[#allocation9 + $0x82c] ss:$28 sps:$4 sm:$0xff]  }
 0x3a8   :  { %5593 = vmatprep.subr.bf16.mxu0 %v7319_v32  ;;  %v7386_v32 = vld [vmem:[#allocation9 + $0xb78] ss:$28 sps:$4 sm:$0xff]  }
 0x3aa   :  { %6655 = vmatpush3.bf16.msra.mxu1 %v7321_v33  ;;  %v7382_v33 = vld [vmem:[#allocation9 + $0x828] ss:$28 sps:$4 sm:$0xff]  }
 0x3ab   :  { %5594 = vmatpush1.bf16.msra.mxu0 %v7317_v34  ;;  %6662 = vmatprep.subr.bf16.mxu1 %v7325_v35  ;;  %v7390_v34 = vld [vmem:[#allocation9 + $0xd70] ss:$28 sps:$4 sm:$0xff]   ;;  %v7389_v35 = vld [vmem:[#allocation9 + $0x864] ss:$28 sps:$4 sm:$0xff]  }
 0x3ac   :  { %5595 = vmatprep.subr.bf16.mxu0 %v7324_v36  ;;  %v7391_v36 = vld [vmem:[#allocation9 + $0xbb0] ss:$28 sps:$4 sm:$0xff]  }
 0x3ad   :  { %5773 = vmatmul.mubr.bf16.vlgmr.msra.gmra.mrb[24].mxu1 %v7834_v50 }
 0x3ae   :  { %6663 = vmatpush3.bf16.msra.mxu1 %v7326_v38  ;;  %5812 = vmatprep.mubr.bf16.mxu1 %v7836_v52  ;;  %v7387_v38 = vld [vmem:[#allocation9 + $0x860] ss:$28 sps:$4 sm:$0xff]  }
 0x3af   :  { %5596 = vmatpush1.bf16.msra.mxu0 %v7322_v25  ;;  %6664 = vmatprep.subr.bf16.mxu1 %v7330_v41  ;;  %v7395_v25 = vld [vmem:[#allocation9 + $0xda8] ss:$28 sps:$4 sm:$0xff]   ;;  %v7394_v41 = vld [vmem:[#allocation9 + $0x89c] ss:$28 sps:$4 sm:$0xff]  }
 0x3b0   :  { %5597 = vmatprep.subr.bf16.mxu0 %v7329_v43  ;;  %v7396_v43 = vld [vmem:[#allocation9 + $0xbe8] ss:$28 sps:$4 sm:$0xff]  }
 0x3b2   :  { %6665 = vmatpush3.bf16.msra.mxu1 %v7331_v45  ;;  %v7392_v45 = vld [vmem:[#allocation9 + $0x898] ss:$28 sps:$4 sm:$0xff]  }
 0x3b3   :  { %5598 = vmatpush1.bf16.msra.mxu0 %v7327_v19  ;;  %6666 = vmatprep.subr.bf16.mxu1 %v7335_v51  ;;  %v7400_v19 = vld [vmem:[#allocation9 + $0xde0] ss:$28 sps:$4 sm:$0xff]   ;;  %v7399_v51 = vld [vmem:[#allocation9 + $0x8d4] ss:$28 sps:$4 sm:$0xff]  }
 0x3b4   :  { %5599 = vmatprep.subr.bf16.mxu0 %v7334_v53  ;;  %v7401_v53 = vld [vmem:[#allocation9 + $0xc20] ss:$28 sps:$4 sm:$0xff]  }
 0x3b6   :  { %6667 = vmatpush3.bf16.msra.mxu1 %v7336_v54  ;;  %v7397_v54 = vld [vmem:[#allocation9 + $0x8d0] ss:$28 sps:$4 sm:$0xff]  }
 0x3b7   :  { %5600 = vmatpush1.bf16.msra.mxu0 %v7332_v55  ;;  %6668 = vmatprep.subr.bf16.mxu1 %v7340_v56  ;;  %v7404_v55 = vld [vmem:[#allocation9 + $0x90c] ss:$28 sps:$4 sm:$0xff]  }
 0x3b8   :  { %5601 = vmatprep.subr.bf16.mxu0 %v7339_v57  ;;  %v7402_v56 = vld [vmem:[#allocation9 + $0x908] ss:$28 sps:$4 sm:$0xff]  }
 0x3b9   :  { %v7407_v57 = vld [vmem:[#allocation9 + $0x944] ss:$28 sps:$4 sm:$0xff]  }
 0x3ba   :  { %6669 = vmatpush3.bf16.msra.mxu1 %v7341_v58  ;;  %v7405_v58 = vld [vmem:[#allocation9 + $0x940] ss:$28 sps:$4 sm:$0xff]  }
 0x3bb   :  { %5602 = vmatpush1.bf16.msra.mxu0 %v7337_v59  ;;  %6670 = vmatprep.subr.bf16.mxu1 %v7345_v60  ;;  %v7410_v59 = vld [vmem:[#allocation9 + $0x97c] ss:$28 sps:$4 sm:$0xff]  }
 0x3bc   :  { %5603 = vmatprep.subr.bf16.mxu0 %v7344_v61  ;;  %v7408_v60 = vld [vmem:[#allocation9 + $0x978] ss:$28 sps:$4 sm:$0xff]  }
 0x3bd   :  { %v7413_v61 = vld [vmem:[#allocation9 + $0x9b4] ss:$28 sps:$4 sm:$0xff]  }
 0x3be   :  { %6671 = vmatpush3.bf16.msra.mxu1 %v7346_v16  ;;  %v7411_v16 = vld [vmem:[#allocation9 + $0x9b0] ss:$28 sps:$4 sm:$0xff]  }
 0x3bf   :  { %5604 = vmatpush1.bf16.msra.mxu0 %v7342_v62  ;;  %6672 = vmatprep.subr.bf16.mxu1 %v7350_v63  ;;  %v7416_v62 = vld [vmem:[#allocation9 + $0x9ec] ss:$28 sps:$4 sm:$0xff]  }
 0x3c0   :  { %5605 = vmatprep.subr.bf16.mxu0 %v7349_v0  ;;  %v7414_v63 = vld [vmem:[#allocation9 + $0x9e8] ss:$28 sps:$4 sm:$0xff]  }
 0x3c1   :  { %v7419_v0 = vld [vmem:[#allocation9 + $0xa24] ss:$28 sps:$4 sm:$0xff]  }
 0x3c2   :  { %6673 = vmatpush3.bf16.msra.mxu1 %v7351_v1  ;;  %v7417_v1 = vld [vmem:[#allocation9 + $0xa20] ss:$28 sps:$4 sm:$0xff]  }
 0x3c3   :  { %5606 = vmatpush1.bf16.msra.mxu0 %v7347_v24  ;;  %6674 = vmatprep.subr.bf16.mxu1 %v7355_v3  ;;  %v7422_v24 = vld [vmem:[#allocation9 + $0xa5c] ss:$28 sps:$4 sm:$0xff]  }
 0x3c4   :  { %5607 = vmatprep.subr.bf16.mxu0 %v7354_v5  ;;  %v7420_v3 = vld [vmem:[#allocation9 + $0xa58] ss:$28 sps:$4 sm:$0xff]  }
 0x3c5   :  { %v7425_v5 = vld [vmem:[#allocation9 + $0xa94] ss:$28 sps:$4 sm:$0xff]  }
 0x3c6   :  { %6675 = vmatpush3.bf16.msra.mxu1 %v7356_v6  ;;  %v7423_v6 = vld [vmem:[#allocation9 + $0xa90] ss:$28 sps:$4 sm:$0xff]  }
 0x3c7   :  { %5608 = vmatpush1.bf16.msra.mxu0 %v7352_v15  ;;  %6676 = vmatprep.subr.bf16.mxu1 %v7360_v7  ;;  %v7428_v15 = vld [vmem:[#allocation9 + $0xacc] ss:$28 sps:$4 sm:$0xff]  }
 0x3c8   :  { %5618 = vmatprep.subr.bf16.mxu0 %v7359_v8  ;;  %v7426_v7 = vld [vmem:[#allocation9 + $0xac8] ss:$28 sps:$4 sm:$0xff]  }
 0x3c9   :  { %v7431_v8 = vld [vmem:[#allocation9 + $0xb04] ss:$28 sps:$4 sm:$0xff]  }
 0x3ca   :  { %5610 = vmatmul.mubr.bf16.vlgmr.msra.gmra.mrb[16].mxu0 %v7834_v50  ;;  %6677 = vmatpush3.bf16.msra.mxu1 %v7361_v9  ;;  %v7375_v50 = vld [vmem:[#allocation9 + $0xcc8] ss:$28 sps:$4 sm:$0xff]   ;;  %v7429_v9 = vld [vmem:[#allocation9 + $0xb00] ss:$28 sps:$4 sm:$0xff]  }
 0x3cb   :  { %5619 = vmatpush1.bf16.msra.mxu0 %v7357_v10  ;;  %5650 = vmatprep.mubr.bf16.mxu0 %v7836_v52  ;;  %v7372_v52 = vld [vmem:[#allocation9 + $0x7b8] ss:$28 sps:$4 sm:$0xff]  }
 0x3cc   :  { %5620 = vmatprep.subr.bf16.mxu0 %v7364_v13  ;;  %6684 = vmatprep.subr.bf16.mxu1 %v7365_v27  ;;  %v7434_v10 = vld [vmem:[#allocation9 + $0xb3c] ss:$28 sps:$4 sm:$0xff]   ;;  %v7437_v27 = vld [vmem:[#allocation9 + $0xb74] ss:$28 sps:$4 sm:$0xff]  }
 0x3cd   :  { %5813 = vmatmul.mubr.bf16.vlgmr.msra.gmra.mrb[28].mxu1 %v7849_v4  ;;  %v7432_v13 = vld [vmem:[#allocation9 + $0xb38] ss:$28 sps:$4 sm:$0xff]  }
 0x3ce   :  { %6685 = vmatpush3.bf16.msra.mxu1 %v7366_v14  ;;  %5852 = vmatprep.mubr.bf16.mxu1 %v7857_v37  ;;  %v7435_v14 = vld [vmem:[#allocation9 + $0xb70] ss:$28 sps:$4 sm:$0xff]  }
 0x3cf   :  { %5621 = vmatpush1.bf16.msra.mxu0 %v7362_v42  ;;  %6686 = vmatprep.subr.bf16.mxu1 %v7370_v17  ;;  %v7880_v42 = vld [vmem:[#allocation10] sm:$0xff] }
 0x3d0   :  { %5622 = vmatprep.subr.bf16.mxu0 %v7369_v18  ;;  %v7438_v17 = vld [vmem:[#allocation9 + $0xba8] ss:$28 sps:$4 sm:$0xff]   ;;  %v2876_v18 = vrot.slane %v7880_v42, %v7775_v48  ;;  %v7447_v48 = vld [vmem:[#allocation9 + $0xc50] ss:$28 sps:$4 sm:$0xff]  }
 0x3d2   :  { %6687 = vmatpush3.bf16.msra.mxu1 %v7371_v20  ;;  %v7443_v20 = vld [vmem:[#allocation9 + $0xbe4] ss:$28 sps:$4 sm:$0xff]  }
 0x3d3   :  { %5623 = vmatpush1.bf16.msra.mxu0 %v7367_v21  ;;  %6688 = vmatprep.subr.bf16.mxu1 %v7375_v50 }
 0x3d4   :  { %5624 = vmatprep.subr.bf16.mxu0 %v7374_v22 }
 0x3d6   :  { %6689 = vmatpush3.bf16.msra.mxu1 %v7376_v23 }
 0x3d7   :  { %5625 = vmatpush1.bf16.msra.mxu0 %v7372_v52  ;;  %6690 = vmatprep.subr.bf16.mxu1 %v7380_v26  ;;  %v7441_v26 = vld [vmem:[#allocation9 + $0xbe0] ss:$28 sps:$4 sm:$0xff]  }
 0x3d8   :  { %5626 = vmatprep.subr.bf16.mxu0 %v7379_v11 }
 0x3da   :  { %6691 = vmatpush3.bf16.msra.mxu1 %v7381_v28  ;;  %v7446_v28 = vld [vmem:[#allocation9 + $0xc1c] ss:$28 sps:$4 sm:$0xff]  }
 0x3db   :  { %5627 = vmatpush1.bf16.msra.mxu0 %v7377_v29  ;;  %6692 = vmatprep.subr.bf16.mxu1 %v7385_v30  ;;  %v7449_v29 = vld [vmem:[#allocation9 + $0xc54] ss:$28 sps:$4 sm:$0xff]   ;;  %v7452_v30 = vld [vmem:[#allocation9 + $0xc8c] ss:$28 sps:$4 sm:$0xff]  }
 0x3dc   :  { %5628 = vmatprep.subr.bf16.mxu0 %v7384_v31 }
 0x3de   :  { %6693 = vmatpush3.bf16.msra.mxu1 %v7386_v32 }
 0x3df   :  { %5629 = vmatpush1.bf16.msra.mxu0 %v7382_v33  ;;  %6694 = vmatprep.subr.bf16.mxu1 %v7390_v34  ;;  %v7450_v33 = vld [vmem:[#allocation9 + $0xc88] ss:$28 sps:$4 sm:$0xff]  }
 0x3e0   :  { %5630 = vmatprep.subr.bf16.mxu0 %v7389_v35  ;;  %v7455_v34 = vld [vmem:[#allocation9 + $0xcc4] ss:$28 sps:$4 sm:$0xff]  }
 0x3e1   :  { %v7453_v35 = vld [vmem:[#allocation9 + $0xcc0] ss:$28 sps:$4 sm:$0xff]  }
 0x3e2   :  { %6695 = vmatpush3.bf16.msra.mxu1 %v7391_v36  ;;  %v7458_v36 = vld [vmem:[#allocation9 + $0xcfc] ss:$28 sps:$4 sm:$0xff]  }
 0x3e3   :  { %5631 = vmatpush1.bf16.msra.mxu0 %v7387_v38  ;;  %6696 = vmatprep.subr.bf16.mxu1 %v7395_v25  ;;  %v7456_v38 = vld [vmem:[#allocation9 + $0xcf8] ss:$28 sps:$4 sm:$0xff]  }
 0x3e4   :  { %5632 = vmatprep.subr.bf16.mxu0 %v7394_v41  ;;  %v7461_v25 = vld [vmem:[#allocation9 + $0xd34] ss:$28 sps:$4 sm:$0xff]  }
 0x3e5   :  { %v7459_v41 = vld [vmem:[#allocation9 + $0xd30] ss:$28 sps:$4 sm:$0xff]  }
 0x3e6   :  { %6697 = vmatpush3.bf16.msra.mxu1 %v7396_v43  ;;  %v7464_v43 = vld [vmem:[#allocation9 + $0xd6c] ss:$28 sps:$4 sm:$0xff]  }
 0x3e7   :  { %5633 = vmatpush1.bf16.msra.mxu0 %v7392_v45  ;;  %6698 = vmatprep.subr.bf16.mxu1 %v7400_v19  ;;  %v7462_v45 = vld [vmem:[#allocation9 + $0xd68] ss:$28 sps:$4 sm:$0xff]  }
 0x3e8   :  { %5634 = vmatprep.subr.bf16.mxu0 %v7399_v51  ;;  %v7467_v19 = vld [vmem:[#allocation9 + $0xda4] ss:$28 sps:$4 sm:$0xff]   ;;  %v2880_v51 = vrot.slane %v7880_v42, %v7772_v47 }
 0x3ea   :  { %6699 = vmatpush3.bf16.msra.mxu1 %v7401_v53  ;;  %v2884_v53 = vrot.slane %v7880_v42, %v7778_v49 }
 0x3eb   :  { %5635 = vmatpush1.bf16.msra.mxu0 %v7397_v54  ;;  %v7465_v54 = vld [vmem:[#allocation9 + $0xda0] ss:$28 sps:$4 sm:$0xff]  }
 0x3ec   :  { %5636 = vmatprep.subr.bf16.mxu0 %v7404_v55 }
 0x3ed   :  { %5853 = vmatmul.mubr.bf16.vlgmr.msra.gmra.mrb[32].mxu1 %v7859_v40 }
 0x3ef   :  { %5637 = vmatpush1.bf16.msra.mxu0 %v7402_v56  ;;  %v7470_v56 = vld [vmem:[#allocation9 + $0xddc] ss:$28 sps:$4 sm:$0xff]  }
 0x3f0   :  { %5638 = vmatprep.subr.bf16.mxu0 %v7407_v57 }
 0x3f3   :  { %5639 = vmatpush1.bf16.msra.mxu0 %v7405_v58 }
 0x3f4   :  { %5640 = vmatprep.subr.bf16.mxu0 %v7410_v59 }
 0x3f7   :  { %5641 = vmatpush1.bf16.msra.mxu0 %v7408_v60 }
 0x3f8   :  { %5642 = vmatprep.subr.bf16.mxu0 %v7413_v61 }
 0x3fb   :  { %5643 = vmatpush1.bf16.msra.mxu0 %v7411_v16  ;;  %v7468_v16 = vld [vmem:[#allocation9 + $0xdd8] ss:$28 sps:$4 sm:$0xff]  }
 0x3fc   :  { %5644 = vmatprep.subr.bf16.mxu0 %v7416_v62 }
 0x3ff   :  { %5645 = vmatpush1.bf16.msra.mxu0 %v7414_v63 }
 0x400   :  { %5646 = vmatprep.subr.bf16.mxu0 %v7419_v0 }
 0x403   :  { %5647 = vmatpush1.bf16.msra.mxu0 %v7417_v1 }
 0x404   :  { %5648 = vmatprep.subr.bf16.mxu0 %v7422_v24 }
 0x407   :  { %5649 = vmatpush1.bf16.msra.mxu0 %v7420_v3  ;;  %v2896_v3 = vrot.slane %v7880_v42, %v701_v2 }
 0x408   :  { %5659 = vmatprep.subr.bf16.mxu0 %v7425_v5 }
 0x40a   :  { %5651 = vmatmul.mubr.bf16.vlgmr.msra.gmra.mrb[16].mxu0 %v7849_v4  ;;  %v7440_v4 = vld [vmem:[#allocation9 + $0xbac] ss:$28 sps:$4 sm:$0xff]  }
 0x40b   :  { %5660 = vmatpush1.bf16.msra.mxu0 %v7423_v6  ;;  %5691 = vmatprep.mubr.bf16.mxu0 %v7857_v37  ;;  %v2872_v37 = vrot.slane %v7880_v42, %v7769_v46  ;;  %v7444_v46 = vld [vmem:[#allocation9 + $0xc18] ss:$28 sps:$4 sm:$0xff]  }
 0x40c   :  { %5661 = vmatprep.subr.bf16.mxu0 %v7428_v15 }
 0x40f   :  { %5662 = vmatpush1.bf16.msra.mxu0 %v7426_v7 }
 0x410   :  { %5663 = vmatprep.subr.bf16.mxu0 %v7431_v8 }
 0x413   :  { %5664 = vmatpush1.bf16.msra.mxu0 %v7429_v9 }
 0x414   :  { %5665 = vmatprep.subr.bf16.mxu0 %v7434_v10 }
 0x417   :  { %5666 = vmatpush1.bf16.msra.mxu0 %v7432_v13 }
 0x418   :  { %5667 = vmatprep.subr.bf16.mxu0 %v7437_v27 }
 0x41b   :  { %5668 = vmatpush1.bf16.msra.mxu0 %v7435_v14 }
 0x41c   :  { %5669 = vmatprep.subr.bf16.mxu0 %v7440_v4 }
 0x41d   :  { %v5365_v21 = vpop.f32.mrb[12].mxu0 }
 0x41e   :  { %v6716_v50 = vadd.f32 %v5365_v21, %v2872_v37  ;;  %v5367_v22 = vpop.f32.mrb[13].mxu0 }
 0x41f   :  { %v6717_v23 = vadd.f32 %v5367_v22, %v2876_v18  ;;  %5670 = vmatpush1.bf16.msra.mxu0 %v7438_v17  ;;  %v5369_v52 = vpop.f32.mrb[14].mxu0 }
 0x420   :  { %7471 = vtanh.f32 %v6716_v50  ;;  %v5370_v11 = vpop.f32.mrb[15].mxu0  ;;  %5671 = vmatprep.subr.bf16.mxu0 %v7443_v20  ;;  %v2892_v52 = vrot.slane %v7880_v42, %v697_v12 }
 0x421   :  { %7473 = vtanh.f32 %v6717_v23  ;;  %v2888_v23 = vrot.slane %v7880_v42, %v693_v39 }
 0x423   :  { %5672 = vmatpush1.bf16.msra.mxu0 %v7441_v26 }
 0x424   :  { %5673 = vmatprep.subr.bf16.mxu0 %v7446_v28 }
 0x427   :  { %5674 = vmatpush1.bf16.msra.mxu0 %v7444_v46 }
 0x428   :  { %5675 = vmatprep.subr.bf16.mxu0 %v7449_v29 }
 0x42a   :  { %v7472_v31 = vpop.eup %7471 }
 0x42b   :  { %v7474_v32 = vpop.eup %7473  ;;  %5867 = vst [vmem:[%s7928_s7] sm:$0xff] %v7472_v31  ;;  %5676 = vmatpush1.bf16.msra.mxu0 %v7447_v48 }
 0x42c   :  { %5868 = vst [vmem:[%s7928_s7 + $0x8] sm:$0xff] %v7474_v32  ;;  %5677 = vmatprep.subr.bf16.mxu0 %v7452_v30 }
 0x42f   :  { %5678 = vmatpush1.bf16.msra.mxu0 %v7450_v33 }
 0x430   :  { %5679 = vmatprep.subr.bf16.mxu0 %v7455_v34 }
 0x433   :  { %5680 = vmatpush1.bf16.msra.mxu0 %v7453_v35 }
 0x434   :  { %5681 = vmatprep.subr.bf16.mxu0 %v7458_v36 }
 0x437   :  { %5682 = vmatpush1.bf16.msra.mxu0 %v7456_v38 }
 0x438   :  { %5683 = vmatprep.subr.bf16.mxu0 %v7461_v25 }
 0x43b   :  { %5684 = vmatpush1.bf16.msra.mxu0 %v7459_v41 }
 0x43c   :  { %5685 = vmatprep.subr.bf16.mxu0 %v7464_v43 }
 0x43f   :  { %5686 = vmatpush1.bf16.msra.mxu0 %v7462_v45 }
 0x440   :  { %v5529_v55 = vpop.f32.mrb[16].mxu1  ;;  %5687 = vmatprep.subr.bf16.mxu0 %v7467_v19 }
 0x441   :  { %v6718_v57 = vadd.f32 %v5529_v55, %v2880_v51  ;;  %v5531_v58 = vpop.f32.mrb[17].mxu1 }
 0x442   :  { %v6719_v59 = vadd.f32 %v5531_v58, %v2884_v53  ;;  %v5533_v60 = vpop.f32.mrb[18].mxu1 }
 0x443   :  { %7475 = vtanh.f32 %v6718_v57  ;;  %5688 = vmatpush1.bf16.msra.mxu0 %v7465_v54  ;;  %v5534_v61 = vpop.f32.mrb[19].mxu1 }
 0x444   :  { %7477 = vtanh.f32 %v6719_v59  ;;  %5689 = vmatprep.subr.bf16.mxu0 %v7470_v56 }
 0x447   :  { %5690 = vmatpush1.bf16.msra.mxu0 %v7468_v16 }
 0x44a   :  { %5692 = vmatmul.mubr.bf16.vlgmr.msra.gmra.mrb[16].mxu0 %v7859_v40 }
 0x44d   :  { %v7476_v47 = vpop.eup %7475 }
 0x44e   :  { %v7478_v49 = vpop.eup %7477  ;;  %5869 = vst [vmem:[%s7928_s7 + $0x10] sm:$0xff] %v7476_v47 }
 0x44f   :  { %5870 = vst [vmem:[%s7928_s7 + $0x18] sm:$0xff] %v7478_v49 }
 0x460   :  { %v6634_v62 = vpop.f32.mrb[20].mxu1 }
 0x461   :  { %v6635_v63 = vpop.f32.mrb[21].mxu1 }
 0x462   :  { %v6636_v0 = vadd.f32 %v6635_v63, %v6634_v62  ;;  %v6637_v1 = vpop.f32.mrb[22].mxu1 }
 0x463   :  { %v6638_v24 = vpop.f32.mrb[23].mxu1 }
 0x464   :  { %v5735_v6 = vadd.f32 %v6636_v0, %v2896_v3 }
 0x480   :  { %v6656_v40 = vpop.f32.mrb[24].mxu1 }
 0x481   :  { %v6657_v5 = vpop.f32.mrb[25].mxu1 }
 0x482   :  { %v6658_v15 = vadd.f32 %v6657_v5, %v6656_v40  ;;  %v6659_v7 = vpop.f32.mrb[26].mxu1 }
 0x483   :  { %v6660_v8 = vpop.f32.mrb[27].mxu1 }
 0x484   :  { %v5775_v9 = vadd.f32 %v6658_v15, %v5735_v6 }
 0x4a0   :  { %v6678_v10 = vpop.f32.mrb[28].mxu1 }
 0x4a1   :  { %v6679_v13 = vpop.f32.mrb[29].mxu1 }
 0x4a2   :  { %v6680_v27 = vadd.f32 %v6679_v13, %v6678_v10  ;;  %v6681_v14 = vpop.f32.mrb[30].mxu1 }
 0x4a3   :  { %v6682_v4 = vpop.f32.mrb[31].mxu1 }
 0x4a4   :  { %v5815_v37 = vadd.f32 %v6680_v27, %v5775_v9 }
 0x4c0   :  { %v6700_v17 = vpop.f32.mrb[32].mxu1 }
 0x4c1   :  { %v6701_v18 = vpop.f32.mrb[33].mxu1 }
 0x4c2   :  { %v6702_v20 = vadd.f32 %v6701_v18, %v6700_v17  ;;  %v6703_v21 = vpop.f32.mrb[34].mxu1 }
 0x4c3   :  { %v6704_v50 = vpop.f32.mrb[35].mxu1 }
 0x4c4   :  { %v5855_v22 = vadd.f32 %v6702_v20, %v5815_v37 }
 0x4c6   :  { %7479 = vtanh.f32 %v5855_v22 }
 0x4d0   :  { %v7480_v2 = vpop.eup %7479 }
 0x4d1   :  { %5873 = vst [vmem:[%s7928_s7 + $0x30] sm:$0xff] %v7480_v2 }
 0x51d   :  { %v5693_v26 = vpop.f32.mrb[16].mxu0 }
 0x51e   :  { %v6720_v11 = vadd.f32 %v5693_v26, %v2888_v23  ;;  %v5695_v28 = vpop.f32.mrb[17].mxu0 }
 0x51f   :  { %v6721_v46 = vadd.f32 %v5695_v28, %v2892_v52  ;;  %v5697_v29 = vpop.f32.mrb[18].mxu0 }
 0x520   :  { %7481 = vtanh.f32 %v6720_v11  ;;  %v5698_v48 = vpop.f32.mrb[19].mxu0 }
 0x521   :  { %7483 = vtanh.f32 %v6721_v46 }
 0x52a   :  { %v7482_v30 = vpop.eup %7481 }
 0x52b   :  { %v7484_v31 = vpop.eup %7483  ;;  %5871 = vst [vmem:[%s7928_s7 + $0x20] sm:$0xff] %v7482_v30 }
 0x52c   :  { %5872 = vst [vmem:[%s7928_s7 + $0x28] sm:$0xff] %v7484_v31 }
 0x52d   :  { %5878 = vsyncpa [#allocation3], 1 }
 0x52e   :  { %5879 = vsyncpa [#allocation5], 1 }
 0x52f   :  { %5880 = vsyncpa [#allocation8], 1 }
 0x530   :  { %5881 = vsyncpa [#allocation11], 1 }

</bundles_post_ra>
